<compile_context>
chip_gen: v5e
topology: v5e:2x2
jax: 0.10.0
libtpu: 0.0.40
codegen_flags: <defaults>
</compile_context>

<pallas_src>
import math

import jax
import jax.numpy as jnp
from jax.experimental import pallas as pl
from jax.experimental.pallas import tpu as pltpu

# ----------------------------- config ---------------------------------------
B = 2          # batch
S = 8          # sequence length (user history / item list / item_y list; assumed equal)
D = 32         # d_model
H = 4          # attention heads
DH = D // H    # per-head dim
DFF = 64       # feed-forward hidden dim
VOCAB = 50
N_LAYERS = 2
EPS = 1e-6


# ----------------------------- in-kernel helpers ------------------------------


def _layer_norm(x, a, b):
    # Annotated-Transformer LayerNorm: a * (x - mean) / (std + eps) + b,
    # std = unbiased (divides by D-1), matching torch.std(-1).
    mean = jnp.mean(x, axis=-1, keepdims=True)
    d = x - mean
    var = jnp.sum(d * d, axis=-1, keepdims=True) * (1.0 / (D - 1))
    std = jnp.sqrt(var)
    inv = pl.reciprocal(std + EPS, approx=True)        # EUP slot, not a VALU divide
    return a * d * inv + b


def _mha(q, k, v, amask, hsel, wo, bo):
    """All-head attention + output projection with head-packed scores (3 MXU pushes).

    q: (Mq, D) f32, k/v: (Mk, D) f32 projected activations (flattened over batch).
    amask: (H*Mq, Mk) f32 ADDITIVE mask (0 = attend, -1e9 = masked), tiled over heads
           along rows (block-diagonal over batch x key padding).
    hsel:  (H*Mq, D) f32 0/1 head selector: row block h keeps only columns of head h.
    wo: (D, D) bf16 output projection; bo: (1, D) f32 bias.

    Row block h of the packed queries only carries head-h feature columns, so a single
    (H*Mq, D) x (D, Mk) matmul yields the per-head score blocks stacked along rows and
    the per-head softmax is a plain row softmax.
    """
    mq = q.shape[0]
    scale = 1.0 / math.sqrt(DH)
    qp = (jnp.concatenate([q] * H, axis=0) * hsel).astype(jnp.bfloat16)   # (H*Mq, D)
    s = jnp.einsum("qd,kd->qk", qp, k.astype(jnp.bfloat16),
                   preferred_element_type=jnp.float32) * scale + amask     # (H*Mq, Mk)
    # Row-max subtraction keeps the denominator >= 1 (finite even for all-masked rows).
    s = s - jnp.max(s, axis=-1, keepdims=True)
    p = jnp.exp(s)
    p = p * pl.reciprocal(jnp.sum(p, axis=-1, keepdims=True), approx=True)
    o = jnp.dot(p.astype(jnp.bfloat16), v.astype(jnp.bfloat16),
                preferred_element_type=jnp.float32)                        # (H*Mq, D)
    o = o * hsel                                   # row block h keeps head-h columns only
    oc = o[0:mq, :]
    for h in range(1, H):                          # fold row blocks -> head concat (Mq, D)
        oc = oc + o[h * mq:(h + 1) * mq, :]
    return jnp.dot(oc.astype(jnp.bfloat16), wo,
                   preferred_element_type=jnp.float32) + bo


# ----------------------------- fused ThreeTower kernel -------------------------


def _three_tower_kernel(
        # tower-indexed encoder inputs/weights (leading block dim 1, tower-selected)
        enc_x_ref, enc_amask_ref, enc_wqkv_ref, enc_bqkv_ref, enc_wo_ref, enc_bo_ref,
        enc_w1_ref, enc_b1_ref, enc_w2_ref, enc_b2_ref, enc_lns_ref, enc_fnorm_ref,
        # shared constants / decoder inputs & weights (whole array)
        hsel_ref, dec_x_ref, dec_smask_ref, dec_cmask_ref,
        sa_wqkv_ref, sa_bqkv_ref, sa_wo_ref, sa_bo_ref,
        ca_wq_ref, ca_bq_ref, ca_wkv_ref, ca_bkv_ref, ca_wo_ref, ca_bo_ref,
        ff_w1_ref, ff_b1_ref, ff_w2_ref, ff_b2_ref, dec_lns_ref, dec_fnorm_ref,
        out_ref):
    tower = pl.program_id(0)
    hsel = hsel_ref[...]                           # (H*M, D) head block-diagonal selector

    # -------- encoder tower (tower 0: user encoder, tower 1: item encoder) --------
    x = enc_x_ref[0]                               # (M, D) f32
    amask = enc_amask_ref[0]                       # (H*M, M) additive mask
    for l in range(N_LAYERS):                      # static unroll
        ln = enc_lns_ref[0, l]                     # (4, D): ln1_a, ln1_b, ln2_a, ln2_b
        # self-attention sublayer (pre-norm residual)
        nx = _layer_norm(x, ln[0:1], ln[1:2])
        qkv = jnp.dot(nx.astype(jnp.bfloat16), enc_wqkv_ref[0, l],
                      preferred_element_type=jnp.float32) + enc_bqkv_ref[0, l]
        x = x + _mha(qkv[:, 0:D], qkv[:, D:2 * D], qkv[:, 2 * D:3 * D],
                     amask, hsel, enc_wo_ref[0, l], enc_bo_ref[0, l])
        # feed-forward sublayer
        nx = _layer_norm(x, ln[2:3], ln[3:4])
        h1 = jnp.maximum(
            jnp.dot(nx.astype(jnp.bfloat16), enc_w1_ref[0, l],
                    preferred_element_type=jnp.float32) + enc_b1_ref[0, l], 0.0)
        x = x + jnp.dot(h1.astype(jnp.bfloat16), enc_w2_ref[0, l],
                        preferred_element_type=jnp.float32) + enc_b2_ref[0, l]
    fn = enc_fnorm_ref[0]                          # (2, D)
    enc_out = _layer_norm(x, fn[0:1], fn[1:2])

    # -------- tower 1: emit the item encoder output --------
    @pl.when(tower == 1)
    def _():
        out_ref[0] = enc_out

    # -------- tower 0: user decoder, consuming enc_out straight from VMEM --------
    @pl.when(tower == 0)
    def _():
        mem_bf = enc_out.astype(jnp.bfloat16)      # cross-attn K/V source, hoisted
        y = dec_x_ref[...]                         # (M, D) f32
        smask = dec_smask_ref[...]                 # (H*M, M) self-attn additive mask
        cmask = dec_cmask_ref[...]                 # (H*M, M) cross-attn additive mask
        for l in range(N_LAYERS):
            ln = dec_lns_ref[l]                    # (6, D)
            # masked self-attention
            nx = _layer_norm(y, ln[0:1], ln[1:2])
            qkv = jnp.dot(nx.astype(jnp.bfloat16), sa_wqkv_ref[l],
                          preferred_element_type=jnp.float32) + sa_bqkv_ref[l]
            y = y + _mha(qkv[:, 0:D], qkv[:, D:2 * D], qkv[:, 2 * D:3 * D],
                         smask, hsel, sa_wo_ref[l], sa_bo_ref[l])
            # cross-attention over encoder memory
            nx = _layer_norm(y, ln[2:3], ln[3:4])
            q = jnp.dot(nx.astype(jnp.bfloat16), ca_wq_ref[l],
                        preferred_element_type=jnp.float32) + ca_bq_ref[l]
            kv = jnp.dot(mem_bf, ca_wkv_ref[l],
                         preferred_element_type=jnp.float32) + ca_bkv_ref[l]
            y = y + _mha(q, kv[:, 0:D], kv[:, D:2 * D],
                         cmask, hsel, ca_wo_ref[l], ca_bo_ref[l])
            # feed-forward
            nx = _layer_norm(y, ln[4:5], ln[5:6])
            h1 = jnp.maximum(
                jnp.dot(nx.astype(jnp.bfloat16), ff_w1_ref[l],
                        preferred_element_type=jnp.float32) + ff_b1_ref[l], 0.0)
            y = y + jnp.dot(h1.astype(jnp.bfloat16), ff_w2_ref[l],
                            preferred_element_type=jnp.float32) + ff_b2_ref[l]
        fn2 = dec_fnorm_ref[...]
        out_ref[0] = _layer_norm(y, fn2[0:1], fn2[1:2])


# ----------------------------- host-side helpers ------------------------------


def _make_attn_mask(key_mask, sq):
    """(B, 1, Sk) bool key-padding mask -> (H*B*sq, B*Sk) ADDITIVE f32 mask.

    0 where attend, -1e9 where masked; block-diagonal over the flattened batch and
    tiled over heads along rows (matches the head-packed score layout in _mha).
    """
    km = key_mask.reshape(key_mask.shape[0], -1).astype(jnp.float32)   # (B, Sk)
    bsz, sk = km.shape
    eye = jnp.eye(bsz, dtype=jnp.float32)
    m4 = eye[:, None, :, None] * km[None, None, :, :]                  # (B,1,B,Sk)
    m4 = jnp.broadcast_to(m4, (bsz, sq, bsz, sk)).reshape(bsz * sq, bsz * sk)
    add = jnp.where(m4 > 0, 0.0, -1e9).astype(jnp.float32)
    return jnp.tile(add, (H, 1))                                       # (H*B*sq, B*Sk)


def _make_head_select(mq):
    """(H*mq, D) f32: row block h has ones exactly in columns [h*DH, (h+1)*DH)."""
    rows = jnp.arange(H * mq) // mq
    cols = jnp.arange(D) // DH
    return (rows[:, None] == cols[None, :]).astype(jnp.float32)


def _tower_spec(per_tower_shape):
    zeros = (0,) * len(per_tower_shape)
    return pl.BlockSpec((1,) + tuple(per_tower_shape), lambda t: (t,) + zeros)


def _full_spec(shape):
    zeros = (0,) * len(shape)
    return pl.BlockSpec(tuple(shape), lambda t: zeros)


def embed(p, tokens):
    # Embeddings: lut(x) * sqrt(d_model) + sinusoidal positional encoding.
    # TODO(synk): mercatran's exact embedding sub-modules (multi-feature embeds,
    # user_event_id branch) are not specified; token embed + PE is one XLA gather/add
    # per tower and is intentionally kept outside the kernel.
    x = p["lut"][tokens] * math.sqrt(D)
    return x + p["pe"][: tokens.shape[1]][None]


# ----------------------------- ThreeTower forward ------------------------------


def three_tower_forward(params, user, user_mask, item, item_mask, item_y,
                        item_mask_y, user_event_id=None):
    # user_event_id is None -> `else` branch of the PyTorch forward is taken.
    user_x = embed(params["user_encoder_embed"], user)        # (B, S, D) f32
    item_x = embed(params["user_decoder_embed"], item)        # (B, S, D) f32
    itemy_x = embed(params["item_encoder_embed"], item_y)     # (B, S, D) f32

    Bx, Sx, Dx = user_x.shape
    M = Bx * Sx
    # NOTE: the 2-wide tower grid assumes user and item_y sequences share (B, S);
    # pad or fall back to separate calls otherwise.

    enc_x = jnp.stack([user_x.reshape(M, Dx), itemy_x.reshape(M, Dx)])     # (2, M, D)
    enc_amask = jnp.stack([_make_attn_mask(user_mask, Sx),
                           _make_attn_mask(item_mask_y, Sx)])              # (2, H*M, M)
    hsel = _make_head_select(M)                                            # (H*M, D)

    p_ue, p_ie = params["user_encoder"], params["item_encoder"]
    enc = {k: jnp.stack([p_ue[k], p_ie[k]]) for k in p_ue}                 # (2, L, ...)

    p_d = params["user_decoder"]
    dec_x = item_x.reshape(M, Dx)
    # TODO(synk): masks are raw forward() inputs; if the mercatran caller composes a
    # causal/subsequent target mask into item_mask, build it here — padding-only now.
    smask = _make_attn_mask(item_mask, Sx)     # decoder self-attn (tgt key padding)
    cmask = _make_attn_mask(user_mask, Sx)     # decoder cross-attn (src key padding)

    tower_args = [enc_x, enc_amask,
                  enc["wqkv"], enc["bqkv"], enc["wo"], enc["bo"],
                  enc["w1"], enc["b1"], enc["w2"], enc["b2"],
                  enc["lns"], enc["fnorm"]]
    shared_args = [hsel, dec_x, smask, cmask,
                   p_d["sa_wqkv"], p_d["sa_bqkv"], p_d["sa_wo"], p_d["sa_bo"],
                   p_d["ca_wq"], p_d["ca_bq"], p_d["ca_wkv"], p_d["ca_bkv"],
                   p_d["ca_wo"], p_d["ca_bo"],
                   p_d["w1"], p_d["b1"], p_d["w2"], p_d["b2"],
                   p_d["lns"], p_d["fnorm"]]
    in_specs = ([_tower_spec(a.shape[1:]) for a in tower_args]
                + [_full_spec(a.shape) for a in shared_args])

    out = pl.pallas_call(
        _three_tower_kernel,
        out_shape=jax.ShapeDtypeStruct((2, M, Dx), jnp.float32),
        grid=(2,),                                  # tower axis: 0 = user chain, 1 = item enc
        in_specs=in_specs,
        out_specs=pl.BlockSpec((1, M, Dx), lambda t: (t, 0, 0)),
        compiler_params=pltpu.CompilerParams(
            dimension_semantics=("parallel",)),     # shards the two towers across v7x's TCs
    )(*tower_args, *shared_args)

    user_dec_out = out[0].reshape(Bx, Sx, Dx)
    item_enc_out = out[1].reshape(Bx, Sx, Dx)
    return user_dec_out, item_enc_out


# ----------------------------- deterministic init ------------------------------


def _init_linear(key, din, dout):
    kw, kb = jax.random.split(key)
    w = jax.random.normal(kw, (din, dout), jnp.float32) / math.sqrt(din)
    b = 0.01 * jax.random.normal(kb, (dout,), jnp.float32)
    return w, b


def init_encoder(key):
    acc = {k: [] for k in ["wqkv", "bqkv", "wo", "bo",
                           "w1", "b1", "w2", "b2", "lns"]}
    for k in jax.random.split(key, N_LAYERS):
        kq, kk, kv, ko, kf1, kf2 = jax.random.split(k, 6)
        wq, bq = _init_linear(kq, D, D)
        wk, bk = _init_linear(kk, D, D)
        wv, bv = _init_linear(kv, D, D)
        wo, bo = _init_linear(ko, D, D)
        w1, b1 = _init_linear(kf1, D, DFF)
        w2, b2 = _init_linear(kf2, DFF, D)
        acc["wqkv"].append(jnp.concatenate([wq, wk, wv], axis=1))       # (D, 3D)
        acc["bqkv"].append(jnp.concatenate([bq, bk, bv])[None, :])      # (1, 3D)
        acc["wo"].append(wo); acc["bo"].append(bo[None, :])
        acc["w1"].append(w1); acc["b1"].append(b1[None, :])
        acc["w2"].append(w2); acc["b2"].append(b2[None, :])
        acc["lns"].append(jnp.stack([jnp.ones((D,)), jnp.zeros((D,)),
                                     jnp.ones((D,)), jnp.zeros((D,))]))
    p = {k: jnp.stack(v) for k, v in acc.items()}
    for k in ["wqkv", "wo", "w1", "w2"]:            # MXU-native bf16 weights
        p[k] = p[k].astype(jnp.bfloat16)
    p["fnorm"] = jnp.stack([jnp.ones((D,)), jnp.zeros((D,))])
    return p


def init_decoder(key):
    names = ["sa_wqkv", "sa_bqkv", "sa_wo", "sa_bo",
             "ca_wq", "ca_bq", "ca_wkv", "ca_bkv", "ca_wo", "ca_bo",
             "w1", "b1", "w2", "b2", "lns"]
    acc = {k: [] for k in names}
    for k in jax.random.split(key, N_LAYERS):
        ks = jax.random.split(k, 10)
        wq, bq = _init_linear(ks[0], D, D)
        wk, bk = _init_linear(ks[1], D, D)
        wv, bv = _init_linear(ks[2], D, D)
        wo, bo = _init_linear(ks[3], D, D)
        cwq, cbq = _init_linear(ks[4], D, D)
        cwk, cbk = _init_linear(ks[5], D, D)
        cwv, cbv = _init_linear(ks[6], D, D)
        cwo, cbo = _init_linear(ks[7], D, D)
        w1, b1 = _init_linear(ks[8], D, DFF)
        w2, b2 = _init_linear(ks[9], DFF, D)
        acc["sa_wqkv"].append(jnp.concatenate([wq, wk, wv], axis=1))
        acc["sa_bqkv"].append(jnp.concatenate([bq, bk, bv])[None, :])
        acc["sa_wo"].append(wo); acc["sa_bo"].append(bo[None, :])
        acc["ca_wq"].append(cwq); acc["ca_bq"].append(cbq[None, :])
        acc["ca_wkv"].append(jnp.concatenate([cwk, cwv], axis=1))       # (D, 2D)
        acc["ca_bkv"].append(jnp.concatenate([cbk, cbv])[None, :])      # (1, 2D)
        acc["ca_wo"].append(cwo); acc["ca_bo"].append(cbo[None, :])
        acc["w1"].append(w1); acc["b1"].append(b1[None, :])
        acc["w2"].append(w2); acc["b2"].append(b2[None, :])
        acc["lns"].append(jnp.stack([jnp.ones((D,)), jnp.zeros((D,)),
                                     jnp.ones((D,)), jnp.zeros((D,)),
                                     jnp.ones((D,)), jnp.zeros((D,))]))
    p = {k: jnp.stack(v) for k, v in acc.items()}
    for k in ["sa_wqkv", "sa_wo", "ca_wq", "ca_wkv", "ca_wo", "w1", "w2"]:
        p[k] = p[k].astype(jnp.bfloat16)
    p["fnorm"] = jnp.stack([jnp.ones((D,)), jnp.zeros((D,))])
    return p


def make_pe(max_len, d_model):
    pos = jnp.arange(max_len, dtype=jnp.float32)[:, None]
    div = jnp.exp(jnp.arange(0, d_model, 2, dtype=jnp.float32)
                  * (-math.log(10000.0) / d_model))
    pe = jnp.zeros((max_len, d_model), jnp.float32)
    pe = pe.at[:, 0::2].set(jnp.sin(pos * div))
    pe = pe.at[:, 1::2].set(jnp.cos(pos * div))
    return pe


def init_embed(key):
    return {"lut": 0.02 * jax.random.normal(key, (VOCAB, D), jnp.float32),
            "pe": make_pe(64, D)}


# ----------------------------- main --------------------------------------------

if __name__ == "__main__":
    root = jax.random.PRNGKey(0)
    ks = jax.random.split(root, 9)
    params = {
        "user_encoder": init_encoder(ks[0]),
        "user_encoder_embed": init_embed(ks[1]),
        "user_decoder": init_decoder(ks[2]),
        "user_decoder_embed": init_embed(ks[3]),
        "item_encoder": init_encoder(ks[4]),
        "item_encoder_embed": init_embed(ks[5]),
    }

    user = jax.random.randint(ks[6], (B, S), 0, VOCAB)
    item = jax.random.randint(ks[7], (B, S), 0, VOCAB)
    item_y = jax.random.randint(ks[8], (B, S), 0, VOCAB)

    def pad_mask(lengths):
        return (jnp.arange(S)[None, :]
                < jnp.asarray(lengths)[:, None])[:, None, :]   # (B, 1, S) bool

    user_mask = pad_mask([S, 6])
    item_mask = pad_mask([S, 7])
    item_mask_y = pad_mask([S, 5])

    fwd = jax.jit(three_tower_forward)
    user_dec_out, item_enc_out = fwd(params, user, user_mask, item, item_mask,
                                     item_y, item_mask_y)
    jax.block_until_ready((user_dec_out, item_enc_out))

    assert user_dec_out.shape == (B, S, D)
    assert item_enc_out.shape == (B, S, D)
    assert bool(jnp.all(jnp.isfinite(user_dec_out)))
    assert bool(jnp.all(jnp.isfinite(item_enc_out)))
    print("KERNEL_OK")
</pallas_src>

<mosaic_0001>
module attributes {stable_mosaic.version = 11 : i64} {
  func.func @_three_tower_kernel(%arg0: i32, %arg1: memref<1x16x32xf32, #tpu.memory_space<vmem>>, %arg2: memref<1x64x16xf32, #tpu.memory_space<vmem>>, %arg3: memref<1x2x32x96xbf16, #tpu.memory_space<vmem>>, %arg4: memref<1x2x1x96xf32, #tpu.memory_space<vmem>>, %arg5: memref<1x2x32x32xbf16, #tpu.memory_space<vmem>>, %arg6: memref<1x2x1x32xf32, #tpu.memory_space<vmem>>, %arg7: memref<1x2x32x64xbf16, #tpu.memory_space<vmem>>, %arg8: memref<1x2x1x64xf32, #tpu.memory_space<vmem>>, %arg9: memref<1x2x64x32xbf16, #tpu.memory_space<vmem>>, %arg10: memref<1x2x1x32xf32, #tpu.memory_space<vmem>>, %arg11: memref<1x2x4x32xf32, #tpu.memory_space<vmem>>, %arg12: memref<1x2x32xf32, #tpu.memory_space<vmem>>, %arg13: memref<64x32xf32, #tpu.memory_space<vmem>>, %arg14: memref<16x32xf32, #tpu.memory_space<vmem>>, %arg15: memref<64x16xf32, #tpu.memory_space<vmem>>, %arg16: memref<64x16xf32, #tpu.memory_space<vmem>>, %arg17: memref<2x32x96xbf16, #tpu.memory_space<vmem>>, %arg18: memref<2x1x96xf32, #tpu.memory_space<vmem>>, %arg19: memref<2x32x32xbf16, #tpu.memory_space<vmem>>, %arg20: memref<2x1x32xf32, #tpu.memory_space<vmem>>, %arg21: memref<2x32x32xbf16, #tpu.memory_space<vmem>>, %arg22: memref<2x1x32xf32, #tpu.memory_space<vmem>>, %arg23: memref<2x32x64xbf16, #tpu.memory_space<vmem>>, %arg24: memref<2x1x64xf32, #tpu.memory_space<vmem>>, %arg25: memref<2x32x32xbf16, #tpu.memory_space<vmem>>, %arg26: memref<2x1x32xf32, #tpu.memory_space<vmem>>, %arg27: memref<2x32x64xbf16, #tpu.memory_space<vmem>>, %arg28: memref<2x1x64xf32, #tpu.memory_space<vmem>>, %arg29: memref<2x64x32xbf16, #tpu.memory_space<vmem>>, %arg30: memref<2x1x32xf32, #tpu.memory_space<vmem>>, %arg31: memref<2x6x32xf32, #tpu.memory_space<vmem>>, %arg32: memref<2x32xf32, #tpu.memory_space<vmem>>, %arg33: memref<1x16x32xf32, #tpu.memory_space<vmem>>) attributes {dimension_semantics = [#tpu.dimension_semantics<parallel>], iteration_bounds = array<i64: 2>, scalar_prefetch = 0 : i64, scratch_operands = 0 : i64, tpu.core_type = #tpu.core_type<tc>, window_params = [{transform_indices = @transform_0, window_bounds = array<i64: 1, 16, 32>}, {transform_indices = @transform_1, window_bounds = array<i64: 1, 64, 16>}, {transform_indices = @transform_2, window_bounds = array<i64: 1, 2, 32, 96>}, {transform_indices = @transform_3, window_bounds = array<i64: 1, 2, 1, 96>}, {transform_indices = @transform_4, window_bounds = array<i64: 1, 2, 32, 32>}, {transform_indices = @transform_5, window_bounds = array<i64: 1, 2, 1, 32>}, {transform_indices = @transform_6, window_bounds = array<i64: 1, 2, 32, 64>}, {transform_indices = @transform_7, window_bounds = array<i64: 1, 2, 1, 64>}, {transform_indices = @transform_8, window_bounds = array<i64: 1, 2, 64, 32>}, {transform_indices = @transform_9, window_bounds = array<i64: 1, 2, 1, 32>}, {transform_indices = @transform_10, window_bounds = array<i64: 1, 2, 4, 32>}, {transform_indices = @transform_11, window_bounds = array<i64: 1, 2, 32>}, {pipeline_mode = #tpu.pipeline_mode<synchronous>, transform_indices = @transform_12, window_bounds = array<i64: 64, 32>}, {pipeline_mode = #tpu.pipeline_mode<synchronous>, transform_indices = @transform_13, window_bounds = array<i64: 16, 32>}, {pipeline_mode = #tpu.pipeline_mode<synchronous>, transform_indices = @transform_14, window_bounds = array<i64: 64, 16>}, {pipeline_mode = #tpu.pipeline_mode<synchronous>, transform_indices = @transform_15, window_bounds = array<i64: 64, 16>}, {pipeline_mode = #tpu.pipeline_mode<synchronous>, transform_indices = @transform_16, window_bounds = array<i64: 2, 32, 96>}, {pipeline_mode = #tpu.pipeline_mode<synchronous>, transform_indices = @transform_17, window_bounds = array<i64: 2, 1, 96>}, {pipeline_mode = #tpu.pipeline_mode<synchronous>, transform_indices = @transform_18, window_bounds = array<i64: 2, 32, 32>}, {pipeline_mode = #tpu.pipeline_mode<synchronous>, transform_indices = @transform_19, window_bounds = array<i64: 2, 1, 32>}, {pipeline_mode = #tpu.pipeline_mode<synchronous>, transform_indices = @transform_20, window_bounds = array<i64: 2, 32, 32>}, {pipeline_mode = #tpu.pipeline_mode<synchronous>, transform_indices = @transform_21, window_bounds = array<i64: 2, 1, 32>}, {pipeline_mode = #tpu.pipeline_mode<synchronous>, transform_indices = @transform_22, window_bounds = array<i64: 2, 32, 64>}, {pipeline_mode = #tpu.pipeline_mode<synchronous>, transform_indices = @transform_23, window_bounds = array<i64: 2, 1, 64>}, {pipeline_mode = #tpu.pipeline_mode<synchronous>, transform_indices = @transform_24, window_bounds = array<i64: 2, 32, 32>}, {pipeline_mode = #tpu.pipeline_mode<synchronous>, transform_indices = @transform_25, window_bounds = array<i64: 2, 1, 32>}, {pipeline_mode = #tpu.pipeline_mode<synchronous>, transform_indices = @transform_26, window_bounds = array<i64: 2, 32, 64>}, {pipeline_mode = #tpu.pipeline_mode<synchronous>, transform_indices = @transform_27, window_bounds = array<i64: 2, 1, 64>}, {pipeline_mode = #tpu.pipeline_mode<synchronous>, transform_indices = @transform_28, window_bounds = array<i64: 2, 64, 32>}, {pipeline_mode = #tpu.pipeline_mode<synchronous>, transform_indices = @transform_29, window_bounds = array<i64: 2, 1, 32>}, {pipeline_mode = #tpu.pipeline_mode<synchronous>, transform_indices = @transform_30, window_bounds = array<i64: 2, 6, 32>}, {pipeline_mode = #tpu.pipeline_mode<synchronous>, transform_indices = @transform_31, window_bounds = array<i64: 2, 32>}, {transform_indices = @transform_32, window_bounds = array<i64: 1, 16, 32>}]} {
    %c0 = arith.constant 0 : index
    %c0_0 = arith.constant 0 : index
    %0 = vector.load %arg13[%c0, %c0_0] : memref<64x32xf32, #tpu.memory_space<vmem>>, vector<64x32xf32>
    %c0_1 = arith.constant 0 : index
    %c0_2 = arith.constant 0 : index
    %c0_3 = arith.constant 0 : index
    %1 = vector.load %arg1[%c0_1, %c0_2, %c0_3] : memref<1x16x32xf32, #tpu.memory_space<vmem>>, vector<1x16x32xf32>
    %2 = vector.shape_cast %1 : vector<1x16x32xf32> to vector<16x32xf32>
    %c0_4 = arith.constant 0 : index
    %c0_5 = arith.constant 0 : index
    %c0_6 = arith.constant 0 : index
    %3 = vector.load %arg2[%c0_4, %c0_5, %c0_6] : memref<1x64x16xf32, #tpu.memory_space<vmem>>, vector<1x64x16xf32>
    %4 = vector.shape_cast %3 : vector<1x64x16xf32> to vector<64x16xf32>
    %c0_7 = arith.constant 0 : index
    %c0_8 = arith.constant 0 : index
    %c0_9 = arith.constant 0 : index
    %c0_10 = arith.constant 0 : index
    %5 = vector.load %arg11[%c0_7, %c0_8, %c0_9, %c0_10] : memref<1x2x4x32xf32, #tpu.memory_space<vmem>>, vector<1x1x4x32xf32>
    %6 = vector.shape_cast %5 : vector<1x1x4x32xf32> to vector<4x32xf32>
    %7 = vector.extract_strided_slice %6 {offsets = [0, 0], sizes = [1, 32], strides = [1, 1]} : vector<4x32xf32> to vector<1x32xf32>
    %8 = vector.extract_strided_slice %6 {offsets = [1, 0], sizes = [1, 32], strides = [1, 1]} : vector<4x32xf32> to vector<1x32xf32>
    %cst = arith.constant dense<0.000000e+00> : vector<16xf32>
    %9 = vector.multi_reduction <add>, %2, %cst [1] : vector<16x32xf32> to vector<16xf32>
    %10 = vector.shape_cast %9 : vector<16xf32> to vector<16x1xf32>
    %cst_11 = arith.constant 3.200000e+01 : f32
    %11 = vector.broadcast %cst_11 : f32 to vector<16x1xf32>
    %12 = arith.divf %10, %11 : vector<16x1xf32>
    %13 = vector.broadcast %12 : vector<16x1xf32> to vector<16x32xf32>
    %14 = arith.subf %2, %13 : vector<16x32xf32>
    %15 = arith.mulf %14, %14 : vector<16x32xf32>
    %cst_12 = arith.constant dense<0.000000e+00> : vector<16xf32>
    %16 = vector.multi_reduction <add>, %15, %cst_12 [1] : vector<16x32xf32> to vector<16xf32>
    %17 = vector.shape_cast %16 : vector<16xf32> to vector<16x1xf32>
    %cst_13 = arith.constant 0.0322580636 : f32
    %18 = vector.broadcast %cst_13 : f32 to vector<16x1xf32>
    %19 = arith.mulf %17, %18 : vector<16x1xf32>
    %20 = math.sqrt %19 : vector<16x1xf32>
    %cst_14 = arith.constant 9.99999997E-7 : f32
    %21 = vector.broadcast %cst_14 : f32 to vector<16x1xf32>
    %22 = arith.addf %20, %21 : vector<16x1xf32>
    %23 = tpu.reciprocal %22 {approx = true} : vector<16x1xf32> -> vector<16x1xf32>
    %24 = vector.broadcast %7 : vector<1x32xf32> to vector<16x32xf32>
    %25 = arith.mulf %24, %14 : vector<16x32xf32>
    %26 = vector.broadcast %23 : vector<16x1xf32> to vector<16x32xf32>
    %27 = arith.mulf %25, %26 : vector<16x32xf32>
    %28 = vector.broadcast %8 : vector<1x32xf32> to vector<16x32xf32>
    %29 = arith.addf %27, %28 : vector<16x32xf32>
    %30 = arith.truncf %29 : vector<16x32xf32> to vector<16x32xbf16>
    %c0_15 = arith.constant 0 : index
    %c0_16 = arith.constant 0 : index
    %c0_17 = arith.constant 0 : index
    %c0_18 = arith.constant 0 : index
    %31 = vector.load %arg3[%c0_15, %c0_16, %c0_17, %c0_18] : memref<1x2x32x96xbf16, #tpu.memory_space<vmem>>, vector<1x1x32x96xbf16>
    %32 = vector.shape_cast %31 : vector<1x1x32x96xbf16> to vector<32x96xbf16>
    %cst_19 = arith.constant dense<0.000000e+00> : vector<16x96xf32>
    %33 = tpu.matmul %30, %32, %cst_19 {dimension_numbers = #tpu.dot_dimension_numbers<[1], [0], [0], [1], [0, 0, 1, 1], [], []>} : vector<16x32xbf16>, vector<32x96xbf16>, vector<16x96xf32> -> vector<16x96xf32>
    %c0_20 = arith.constant 0 : index
    %c0_21 = arith.constant 0 : index
    %c0_22 = arith.constant 0 : index
    %c0_23 = arith.constant 0 : index
    %34 = vector.load %arg4[%c0_20, %c0_21, %c0_22, %c0_23] : memref<1x2x1x96xf32, #tpu.memory_space<vmem>>, vector<1x1x1x96xf32>
    %35 = vector.shape_cast %34 : vector<1x1x1x96xf32> to vector<1x96xf32>
    %36 = vector.broadcast %35 : vector<1x96xf32> to vector<16x96xf32>
    %37 = arith.addf %33, %36 : vector<16x96xf32>
    %38 = vector.extract_strided_slice %37 {offsets = [0, 0], sizes = [16, 32], strides = [1, 1]} : vector<16x96xf32> to vector<16x32xf32>
    %39 = vector.extract_strided_slice %37 {offsets = [0, 32], sizes = [16, 32], strides = [1, 1]} : vector<16x96xf32> to vector<16x32xf32>
    %40 = vector.extract_strided_slice %37 {offsets = [0, 64], sizes = [16, 32], strides = [1, 1]} : vector<16x96xf32> to vector<16x32xf32>
    %c0_24 = arith.constant 0 : index
    %c0_25 = arith.constant 0 : index
    %c0_26 = arith.constant 0 : index
    %c0_27 = arith.constant 0 : index
    %41 = vector.load %arg5[%c0_24, %c0_25, %c0_26, %c0_27] : memref<1x2x32x32xbf16, #tpu.memory_space<vmem>>, vector<1x1x32x32xbf16>
    %42 = vector.shape_cast %41 : vector<1x1x32x32xbf16> to vector<32x32xbf16>
    %c0_28 = arith.constant 0 : index
    %c0_29 = arith.constant 0 : index
    %c0_30 = arith.constant 0 : index
    %c0_31 = arith.constant 0 : index
    %43 = vector.load %arg6[%c0_28, %c0_29, %c0_30, %c0_31] : memref<1x2x1x32xf32, #tpu.memory_space<vmem>>, vector<1x1x1x32xf32>
    %44 = vector.shape_cast %43 : vector<1x1x1x32xf32> to vector<1x32xf32>
    %45 = tpu.concatenate %38, %38, %38, %38 in 0 : vector<16x32xf32>, vector<16x32xf32>, vector<16x32xf32>, vector<16x32xf32> -> vector<64x32xf32>
    %46 = arith.mulf %45, %0 : vector<64x32xf32>
    %47 = arith.truncf %46 : vector<64x32xf32> to vector<64x32xbf16>
    %48 = arith.truncf %39 : vector<16x32xf32> to vector<16x32xbf16>
    "tpu.trace_start"() <{level = 10 : i32, message = "qd,kd->qk"}> : () -> ()
    %cst_32 = arith.constant dense<0.000000e+00> : vector<64x16xf32>
    %49 = tpu.matmul %47, %48, %cst_32 {dimension_numbers = #tpu.dot_dimension_numbers<[1], [1], [0], [0], [0, 0, 1, 0], [], []>} : vector<64x32xbf16>, vector<16x32xbf16>, vector<64x16xf32> -> vector<64x16xf32>
    "tpu.trace_stop"() : () -> ()
    %cst_33 = arith.constant 0.353553385 : f32
    %50 = vector.broadcast %cst_33 : f32 to vector<64x16xf32>
    %51 = arith.mulf %49, %50 : vector<64x16xf32>
    %52 = arith.addf %51, %4 : vector<64x16xf32>
    %cst_34 = arith.constant dense<0xFF800000> : vector<64xf32>
    %53 = vector.multi_reduction <maximumf>, %52, %cst_34 [1] : vector<64x16xf32> to vector<64xf32>
    %54 = vector.shape_cast %53 : vector<64xf32> to vector<64x1xf32>
    %55 = vector.broadcast %54 : vector<64x1xf32> to vector<64x16xf32>
    %56 = arith.subf %52, %55 : vector<64x16xf32>
    %57 = math.exp %56 : vector<64x16xf32>
    %cst_35 = arith.constant dense<0.000000e+00> : vector<64xf32>
    %58 = vector.multi_reduction <add>, %57, %cst_35 [1] : vector<64x16xf32> to vector<64xf32>
    %59 = vector.shape_cast %58 : vector<64xf32> to vector<64x1xf32>
    %60 = tpu.reciprocal %59 {approx = true} : vector<64x1xf32> -> vector<64x1xf32>
    %61 = vector.broadcast %60 : vector<64x1xf32> to vector<64x16xf32>
    %62 = arith.mulf %57, %61 : vector<64x16xf32>
    %63 = arith.truncf %62 : vector<64x16xf32> to vector<64x16xbf16>
    %64 = arith.truncf %40 : vector<16x32xf32> to vector<16x32xbf16>
    %cst_36 = arith.constant dense<0.000000e+00> : vector<64x32xf32>
    %65 = tpu.matmul %63, %64, %cst_36 {dimension_numbers = #tpu.dot_dimension_numbers<[1], [0], [0], [1], [0, 0, 1, 1], [], []>} : vector<64x16xbf16>, vector<16x32xbf16>, vector<64x32xf32> -> vector<64x32xf32>
    %66 = arith.mulf %65, %0 : vector<64x32xf32>
    %67 = vector.extract_strided_slice %66 {offsets = [0, 0], sizes = [16, 32], strides = [1, 1]} : vector<64x32xf32> to vector<16x32xf32>
    %68 = vector.extract_strided_slice %66 {offsets = [16, 0], sizes = [16, 32], strides = [1, 1]} : vector<64x32xf32> to vector<16x32xf32>
    %69 = arith.addf %67, %68 : vector<16x32xf32>
    %70 = vector.extract_strided_slice %66 {offsets = [32, 0], sizes = [16, 32], strides = [1, 1]} : vector<64x32xf32> to vector<16x32xf32>
    %71 = arith.addf %69, %70 : vector<16x32xf32>
    %72 = vector.extract_strided_slice %66 {offsets = [48, 0], sizes = [16, 32], strides = [1, 1]} : vector<64x32xf32> to vector<16x32xf32>
    %73 = arith.addf %71, %72 : vector<16x32xf32>
    %74 = arith.truncf %73 : vector<16x32xf32> to vector<16x32xbf16>
    %cst_37 = arith.constant dense<0.000000e+00> : vector<16x32xf32>
    %75 = tpu.matmul %74, %42, %cst_37 {dimension_numbers = #tpu.dot_dimension_numbers<[1], [0], [0], [1], [0, 0, 1, 1], [], []>} : vector<16x32xbf16>, vector<32x32xbf16>, vector<16x32xf32> -> vector<16x32xf32>
    %76 = vector.broadcast %44 : vector<1x32xf32> to vector<16x32xf32>
    %77 = arith.addf %75, %76 : vector<16x32xf32>
    %78 = arith.addf %2, %77 : vector<16x32xf32>
    %79 = vector.extract_strided_slice %6 {offsets = [2, 0], sizes = [1, 32], strides = [1, 1]} : vector<4x32xf32> to vector<1x32xf32>
    %80 = vector.extract_strided_slice %6 {offsets = [3, 0], sizes = [1, 32], strides = [1, 1]} : vector<4x32xf32> to vector<1x32xf32>
    %cst_38 = arith.constant dense<0.000000e+00> : vector<16xf32>
    %81 = vector.multi_reduction <add>, %78, %cst_38 [1] : vector<16x32xf32> to vector<16xf32>
    %82 = vector.shape_cast %81 : vector<16xf32> to vector<16x1xf32>
    %cst_39 = arith.constant 3.200000e+01 : f32
    %83 = vector.broadcast %cst_39 : f32 to vector<16x1xf32>
    %84 = arith.divf %82, %83 : vector<16x1xf32>
    %85 = vector.broadcast %84 : vector<16x1xf32> to vector<16x32xf32>
    %86 = arith.subf %78, %85 : vector<16x32xf32>
    %87 = arith.mulf %86, %86 : vector<16x32xf32>
    %cst_40 = arith.constant dense<0.000000e+00> : vector<16xf32>
    %88 = vector.multi_reduction <add>, %87, %cst_40 [1] : vector<16x32xf32> to vector<16xf32>
    %89 = vector.shape_cast %88 : vector<16xf32> to vector<16x1xf32>
    %cst_41 = arith.constant 0.0322580636 : f32
    %90 = vector.broadcast %cst_41 : f32 to vector<16x1xf32>
    %91 = arith.mulf %89, %90 : vector<16x1xf32>
    %92 = math.sqrt %91 : vector<16x1xf32>
    %cst_42 = arith.constant 9.99999997E-7 : f32
    %93 = vector.broadcast %cst_42 : f32 to vector<16x1xf32>
    %94 = arith.addf %92, %93 : vector<16x1xf32>
    %95 = tpu.reciprocal %94 {approx = true} : vector<16x1xf32> -> vector<16x1xf32>
    %96 = vector.broadcast %79 : vector<1x32xf32> to vector<16x32xf32>
    %97 = arith.mulf %96, %86 : vector<16x32xf32>
    %98 = vector.broadcast %95 : vector<16x1xf32> to vector<16x32xf32>
    %99 = arith.mulf %97, %98 : vector<16x32xf32>
    %100 = vector.broadcast %80 : vector<1x32xf32> to vector<16x32xf32>
    %101 = arith.addf %99, %100 : vector<16x32xf32>
    %102 = arith.truncf %101 : vector<16x32xf32> to vector<16x32xbf16>
    %c0_43 = arith.constant 0 : index
    %c0_44 = arith.constant 0 : index
    %c0_45 = arith.constant 0 : index
    %c0_46 = arith.constant 0 : index
    %103 = vector.load %arg7[%c0_43, %c0_44, %c0_45, %c0_46] : memref<1x2x32x64xbf16, #tpu.memory_space<vmem>>, vector<1x1x32x64xbf16>
    %104 = vector.shape_cast %103 : vector<1x1x32x64xbf16> to vector<32x64xbf16>
    %cst_47 = arith.constant dense<0.000000e+00> : vector<16x64xf32>
    %105 = tpu.matmul %102, %104, %cst_47 {dimension_numbers = #tpu.dot_dimension_numbers<[1], [0], [0], [1], [0, 0, 1, 1], [], []>} : vector<16x32xbf16>, vector<32x64xbf16>, vector<16x64xf32> -> vector<16x64xf32>
    %c0_48 = arith.constant 0 : index
    %c0_49 = arith.constant 0 : index
    %c0_50 = arith.constant 0 : index
    %c0_51 = arith.constant 0 : index
    %106 = vector.load %arg8[%c0_48, %c0_49, %c0_50, %c0_51] : memref<1x2x1x64xf32, #tpu.memory_space<vmem>>, vector<1x1x1x64xf32>
    %107 = vector.shape_cast %106 : vector<1x1x1x64xf32> to vector<1x64xf32>
    %108 = vector.broadcast %107 : vector<1x64xf32> to vector<16x64xf32>
    %109 = arith.addf %105, %108 : vector<16x64xf32>
    %cst_52 = arith.constant 0.000000e+00 : f32
    %110 = vector.broadcast %cst_52 : f32 to vector<16x64xf32>
    %111 = arith.maximumf %109, %110 : vector<16x64xf32>
    %112 = arith.truncf %111 : vector<16x64xf32> to vector<16x64xbf16>
    %c0_53 = arith.constant 0 : index
    %c0_54 = arith.constant 0 : index
    %c0_55 = arith.constant 0 : index
    %c0_56 = arith.constant 0 : index
    %113 = vector.load %arg9[%c0_53, %c0_54, %c0_55, %c0_56] : memref<1x2x64x32xbf16, #tpu.memory_space<vmem>>, vector<1x1x64x32xbf16>
    %114 = vector.shape_cast %113 : vector<1x1x64x32xbf16> to vector<64x32xbf16>
    %cst_57 = arith.constant dense<0.000000e+00> : vector<16x32xf32>
    %115 = tpu.matmul %112, %114, %cst_57 {dimension_numbers = #tpu.dot_dimension_numbers<[1], [0], [0], [1], [0, 0, 1, 1], [], []>} : vector<16x64xbf16>, vector<64x32xbf16>, vector<16x32xf32> -> vector<16x32xf32>
    %116 = arith.addf %78, %115 : vector<16x32xf32>
    %c0_58 = arith.constant 0 : index
    %c0_59 = arith.constant 0 : index
    %c0_60 = arith.constant 0 : index
    %c0_61 = arith.constant 0 : index
    %117 = vector.load %arg10[%c0_58, %c0_59, %c0_60, %c0_61] : memref<1x2x1x32xf32, #tpu.memory_space<vmem>>, vector<1x1x1x32xf32>
    %118 = vector.shape_cast %117 : vector<1x1x1x32xf32> to vector<1x32xf32>
    %119 = vector.broadcast %118 : vector<1x32xf32> to vector<16x32xf32>
    %120 = arith.addf %116, %119 : vector<16x32xf32>
    %c0_62 = arith.constant 0 : index
    %c1 = arith.constant 1 : index
    %c0_63 = arith.constant 0 : index
    %c0_64 = arith.constant 0 : index
    %121 = vector.load %arg11[%c0_62, %c1, %c0_63, %c0_64] : memref<1x2x4x32xf32, #tpu.memory_space<vmem>>, vector<1x1x4x32xf32>
    %122 = vector.shape_cast %121 : vector<1x1x4x32xf32> to vector<4x32xf32>
    %123 = vector.extract_strided_slice %122 {offsets = [0, 0], sizes = [1, 32], strides = [1, 1]} : vector<4x32xf32> to vector<1x32xf32>
    %124 = vector.extract_strided_slice %122 {offsets = [1, 0], sizes = [1, 32], strides = [1, 1]} : vector<4x32xf32> to vector<1x32xf32>
    %cst_65 = arith.constant dense<0.000000e+00> : vector<16xf32>
    %125 = vector.multi_reduction <add>, %120, %cst_65 [1] : vector<16x32xf32> to vector<16xf32>
    %126 = vector.shape_cast %125 : vector<16xf32> to vector<16x1xf32>
    %cst_66 = arith.constant 3.200000e+01 : f32
    %127 = vector.broadcast %cst_66 : f32 to vector<16x1xf32>
    %128 = arith.divf %126, %127 : vector<16x1xf32>
    %129 = vector.broadcast %128 : vector<16x1xf32> to vector<16x32xf32>
    %130 = arith.subf %120, %129 : vector<16x32xf32>
    %131 = arith.mulf %130, %130 : vector<16x32xf32>
    %cst_67 = arith.constant dense<0.000000e+00> : vector<16xf32>
    %132 = vector.multi_reduction <add>, %131, %cst_67 [1] : vector<16x32xf32> to vector<16xf32>
    %133 = vector.shape_cast %132 : vector<16xf32> to vector<16x1xf32>
    %cst_68 = arith.constant 0.0322580636 : f32
    %134 = vector.broadcast %cst_68 : f32 to vector<16x1xf32>
    %135 = arith.mulf %133, %134 : vector<16x1xf32>
    %136 = math.sqrt %135 : vector<16x1xf32>
    %cst_69 = arith.constant 9.99999997E-7 : f32
    %137 = vector.broadcast %cst_69 : f32 to vector<16x1xf32>
    %138 = arith.addf %136, %137 : vector<16x1xf32>
    %139 = tpu.reciprocal %138 {approx = true} : vector<16x1xf32> -> vector<16x1xf32>
    %140 = vector.broadcast %123 : vector<1x32xf32> to vector<16x32xf32>
    %141 = arith.mulf %140, %130 : vector<16x32xf32>
    %142 = vector.broadcast %139 : vector<16x1xf32> to vector<16x32xf32>
    %143 = arith.mulf %141, %142 : vector<16x32xf32>
    %144 = vector.broadcast %124 : vector<1x32xf32> to vector<16x32xf32>
    %145 = arith.addf %143, %144 : vector<16x32xf32>
    %146 = arith.truncf %145 : vector<16x32xf32> to vector<16x32xbf16>
    %c0_70 = arith.constant 0 : index
    %c1_71 = arith.constant 1 : index
    %c0_72 = arith.constant 0 : index
    %c0_73 = arith.constant 0 : index
    %147 = vector.load %arg3[%c0_70, %c1_71, %c0_72, %c0_73] : memref<1x2x32x96xbf16, #tpu.memory_space<vmem>>, vector<1x1x32x96xbf16>
    %148 = vector.shape_cast %147 : vector<1x1x32x96xbf16> to vector<32x96xbf16>
    %cst_74 = arith.constant dense<0.000000e+00> : vector<16x96xf32>
    %149 = tpu.matmul %146, %148, %cst_74 {dimension_numbers = #tpu.dot_dimension_numbers<[1], [0], [0], [1], [0, 0, 1, 1], [], []>} : vector<16x32xbf16>, vector<32x96xbf16>, vector<16x96xf32> -> vector<16x96xf32>
    %c0_75 = arith.constant 0 : index
    %c1_76 = arith.constant 1 : index
    %c0_77 = arith.constant 0 : index
    %c0_78 = arith.constant 0 : index
    %150 = vector.load %arg4[%c0_75, %c1_76, %c0_77, %c0_78] : memref<1x2x1x96xf32, #tpu.memory_space<vmem>>, vector<1x1x1x96xf32>
    %151 = vector.shape_cast %150 : vector<1x1x1x96xf32> to vector<1x96xf32>
    %152 = vector.broadcast %151 : vector<1x96xf32> to vector<16x96xf32>
    %153 = arith.addf %149, %152 : vector<16x96xf32>
    %154 = vector.extract_strided_slice %153 {offsets = [0, 0], sizes = [16, 32], strides = [1, 1]} : vector<16x96xf32> to vector<16x32xf32>
    %155 = vector.extract_strided_slice %153 {offsets = [0, 32], sizes = [16, 32], strides = [1, 1]} : vector<16x96xf32> to vector<16x32xf32>
    %156 = vector.extract_strided_slice %153 {offsets = [0, 64], sizes = [16, 32], strides = [1, 1]} : vector<16x96xf32> to vector<16x32xf32>
    %c0_79 = arith.constant 0 : index
    %c1_80 = arith.constant 1 : index
    %c0_81 = arith.constant 0 : index
    %c0_82 = arith.constant 0 : index
    %157 = vector.load %arg5[%c0_79, %c1_80, %c0_81, %c0_82] : memref<1x2x32x32xbf16, #tpu.memory_space<vmem>>, vector<1x1x32x32xbf16>
    %158 = vector.shape_cast %157 : vector<1x1x32x32xbf16> to vector<32x32xbf16>
    %c0_83 = arith.constant 0 : index
    %c1_84 = arith.constant 1 : index
    %c0_85 = arith.constant 0 : index
    %c0_86 = arith.constant 0 : index
    %159 = vector.load %arg6[%c0_83, %c1_84, %c0_85, %c0_86] : memref<1x2x1x32xf32, #tpu.memory_space<vmem>>, vector<1x1x1x32xf32>
    %160 = vector.shape_cast %159 : vector<1x1x1x32xf32> to vector<1x32xf32>
    %161 = tpu.concatenate %154, %154, %154, %154 in 0 : vector<16x32xf32>, vector<16x32xf32>, vector<16x32xf32>, vector<16x32xf32> -> vector<64x32xf32>
    %162 = arith.mulf %161, %0 : vector<64x32xf32>
    %163 = arith.truncf %162 : vector<64x32xf32> to vector<64x32xbf16>
    %164 = arith.truncf %155 : vector<16x32xf32> to vector<16x32xbf16>
    "tpu.trace_start"() <{level = 10 : i32, message = "qd,kd->qk"}> : () -> ()
    %cst_87 = arith.constant dense<0.000000e+00> : vector<64x16xf32>
    %165 = tpu.matmul %163, %164, %cst_87 {dimension_numbers = #tpu.dot_dimension_numbers<[1], [1], [0], [0], [0, 0, 1, 0], [], []>} : vector<64x32xbf16>, vector<16x32xbf16>, vector<64x16xf32> -> vector<64x16xf32>
    "tpu.trace_stop"() : () -> ()
    %cst_88 = arith.constant 0.353553385 : f32
    %166 = vector.broadcast %cst_88 : f32 to vector<64x16xf32>
    %167 = arith.mulf %165, %166 : vector<64x16xf32>
    %168 = arith.addf %167, %4 : vector<64x16xf32>
    %cst_89 = arith.constant dense<0xFF800000> : vector<64xf32>
    %169 = vector.multi_reduction <maximumf>, %168, %cst_89 [1] : vector<64x16xf32> to vector<64xf32>
    %170 = vector.shape_cast %169 : vector<64xf32> to vector<64x1xf32>
    %171 = vector.broadcast %170 : vector<64x1xf32> to vector<64x16xf32>
    %172 = arith.subf %168, %171 : vector<64x16xf32>
    %173 = math.exp %172 : vector<64x16xf32>
    %cst_90 = arith.constant dense<0.000000e+00> : vector<64xf32>
    %174 = vector.multi_reduction <add>, %173, %cst_90 [1] : vector<64x16xf32> to vector<64xf32>
    %175 = vector.shape_cast %174 : vector<64xf32> to vector<64x1xf32>
    %176 = tpu.reciprocal %175 {approx = true} : vector<64x1xf32> -> vector<64x1xf32>
    %177 = vector.broadcast %176 : vector<64x1xf32> to vector<64x16xf32>
    %178 = arith.mulf %173, %177 : vector<64x16xf32>
    %179 = arith.truncf %178 : vector<64x16xf32> to vector<64x16xbf16>
    %180 = arith.truncf %156 : vector<16x32xf32> to vector<16x32xbf16>
    %cst_91 = arith.constant dense<0.000000e+00> : vector<64x32xf32>
    %181 = tpu.matmul %179, %180, %cst_91 {dimension_numbers = #tpu.dot_dimension_numbers<[1], [0], [0], [1], [0, 0, 1, 1], [], []>} : vector<64x16xbf16>, vector<16x32xbf16>, vector<64x32xf32> -> vector<64x32xf32>
    %182 = arith.mulf %181, %0 : vector<64x32xf32>
    %183 = vector.extract_strided_slice %182 {offsets = [0, 0], sizes = [16, 32], strides = [1, 1]} : vector<64x32xf32> to vector<16x32xf32>
    %184 = vector.extract_strided_slice %182 {offsets = [16, 0], sizes = [16, 32], strides = [1, 1]} : vector<64x32xf32> to vector<16x32xf32>
    %185 = arith.addf %183, %184 : vector<16x32xf32>
    %186 = vector.extract_strided_slice %182 {offsets = [32, 0], sizes = [16, 32], strides = [1, 1]} : vector<64x32xf32> to vector<16x32xf32>
    %187 = arith.addf %185, %186 : vector<16x32xf32>
    %188 = vector.extract_strided_slice %182 {offsets = [48, 0], sizes = [16, 32], strides = [1, 1]} : vector<64x32xf32> to vector<16x32xf32>
    %189 = arith.addf %187, %188 : vector<16x32xf32>
    %190 = arith.truncf %189 : vector<16x32xf32> to vector<16x32xbf16>
    %cst_92 = arith.constant dense<0.000000e+00> : vector<16x32xf32>
    %191 = tpu.matmul %190, %158, %cst_92 {dimension_numbers = #tpu.dot_dimension_numbers<[1], [0], [0], [1], [0, 0, 1, 1], [], []>} : vector<16x32xbf16>, vector<32x32xbf16>, vector<16x32xf32> -> vector<16x32xf32>
    %192 = vector.broadcast %160 : vector<1x32xf32> to vector<16x32xf32>
    %193 = arith.addf %191, %192 : vector<16x32xf32>
    %194 = arith.addf %120, %193 : vector<16x32xf32>
    %195 = vector.extract_strided_slice %122 {offsets = [2, 0], sizes = [1, 32], strides = [1, 1]} : vector<4x32xf32> to vector<1x32xf32>
    %196 = vector.extract_strided_slice %122 {offsets = [3, 0], sizes = [1, 32], strides = [1, 1]} : vector<4x32xf32> to vector<1x32xf32>
    %cst_93 = arith.constant dense<0.000000e+00> : vector<16xf32>
    %197 = vector.multi_reduction <add>, %194, %cst_93 [1] : vector<16x32xf32> to vector<16xf32>
    %198 = vector.shape_cast %197 : vector<16xf32> to vector<16x1xf32>
    %cst_94 = arith.constant 3.200000e+01 : f32
    %199 = vector.broadcast %cst_94 : f32 to vector<16x1xf32>
    %200 = arith.divf %198, %199 : vector<16x1xf32>
    %201 = vector.broadcast %200 : vector<16x1xf32> to vector<16x32xf32>
    %202 = arith.subf %194, %201 : vector<16x32xf32>
    %203 = arith.mulf %202, %202 : vector<16x32xf32>
    %cst_95 = arith.constant dense<0.000000e+00> : vector<16xf32>
    %204 = vector.multi_reduction <add>, %203, %cst_95 [1] : vector<16x32xf32> to vector<16xf32>
    %205 = vector.shape_cast %204 : vector<16xf32> to vector<16x1xf32>
    %cst_96 = arith.constant 0.0322580636 : f32
    %206 = vector.broadcast %cst_96 : f32 to vector<16x1xf32>
    %207 = arith.mulf %205, %206 : vector<16x1xf32>
    %208 = math.sqrt %207 : vector<16x1xf32>
    %cst_97 = arith.constant 9.99999997E-7 : f32
    %209 = vector.broadcast %cst_97 : f32 to vector<16x1xf32>
    %210 = arith.addf %208, %209 : vector<16x1xf32>
    %211 = tpu.reciprocal %210 {approx = true} : vector<16x1xf32> -> vector<16x1xf32>
    %212 = vector.broadcast %195 : vector<1x32xf32> to vector<16x32xf32>
    %213 = arith.mulf %212, %202 : vector<16x32xf32>
    %214 = vector.broadcast %211 : vector<16x1xf32> to vector<16x32xf32>
    %215 = arith.mulf %213, %214 : vector<16x32xf32>
    %216 = vector.broadcast %196 : vector<1x32xf32> to vector<16x32xf32>
    %217 = arith.addf %215, %216 : vector<16x32xf32>
    %218 = arith.truncf %217 : vector<16x32xf32> to vector<16x32xbf16>
    %c0_98 = arith.constant 0 : index
    %c1_99 = arith.constant 1 : index
    %c0_100 = arith.constant 0 : index
    %c0_101 = arith.constant 0 : index
    %219 = vector.load %arg7[%c0_98, %c1_99, %c0_100, %c0_101] : memref<1x2x32x64xbf16, #tpu.memory_space<vmem>>, vector<1x1x32x64xbf16>
    %220 = vector.shape_cast %219 : vector<1x1x32x64xbf16> to vector<32x64xbf16>
    %cst_102 = arith.constant dense<0.000000e+00> : vector<16x64xf32>
    %221 = tpu.matmul %218, %220, %cst_102 {dimension_numbers = #tpu.dot_dimension_numbers<[1], [0], [0], [1], [0, 0, 1, 1], [], []>} : vector<16x32xbf16>, vector<32x64xbf16>, vector<16x64xf32> -> vector<16x64xf32>
    %c0_103 = arith.constant 0 : index
    %c1_104 = arith.constant 1 : index
    %c0_105 = arith.constant 0 : index
    %c0_106 = arith.constant 0 : index
    %222 = vector.load %arg8[%c0_103, %c1_104, %c0_105, %c0_106] : memref<1x2x1x64xf32, #tpu.memory_space<vmem>>, vector<1x1x1x64xf32>
    %223 = vector.shape_cast %222 : vector<1x1x1x64xf32> to vector<1x64xf32>
    %224 = vector.broadcast %223 : vector<1x64xf32> to vector<16x64xf32>
    %225 = arith.addf %221, %224 : vector<16x64xf32>
    %cst_107 = arith.constant 0.000000e+00 : f32
    %226 = vector.broadcast %cst_107 : f32 to vector<16x64xf32>
    %227 = arith.maximumf %225, %226 : vector<16x64xf32>
    %228 = arith.truncf %227 : vector<16x64xf32> to vector<16x64xbf16>
    %c0_108 = arith.constant 0 : index
    %c1_109 = arith.constant 1 : index
    %c0_110 = arith.constant 0 : index
    %c0_111 = arith.constant 0 : index
    %229 = vector.load %arg9[%c0_108, %c1_109, %c0_110, %c0_111] : memref<1x2x64x32xbf16, #tpu.memory_space<vmem>>, vector<1x1x64x32xbf16>
    %230 = vector.shape_cast %229 : vector<1x1x64x32xbf16> to vector<64x32xbf16>
    %cst_112 = arith.constant dense<0.000000e+00> : vector<16x32xf32>
    %231 = tpu.matmul %228, %230, %cst_112 {dimension_numbers = #tpu.dot_dimension_numbers<[1], [0], [0], [1], [0, 0, 1, 1], [], []>} : vector<16x64xbf16>, vector<64x32xbf16>, vector<16x32xf32> -> vector<16x32xf32>
    %232 = arith.addf %194, %231 : vector<16x32xf32>
    %c0_113 = arith.constant 0 : index
    %c1_114 = arith.constant 1 : index
    %c0_115 = arith.constant 0 : index
    %c0_116 = arith.constant 0 : index
    %233 = vector.load %arg10[%c0_113, %c1_114, %c0_115, %c0_116] : memref<1x2x1x32xf32, #tpu.memory_space<vmem>>, vector<1x1x1x32xf32>
    %234 = vector.shape_cast %233 : vector<1x1x1x32xf32> to vector<1x32xf32>
    %235 = vector.broadcast %234 : vector<1x32xf32> to vector<16x32xf32>
    %236 = arith.addf %232, %235 : vector<16x32xf32>
    %c0_117 = arith.constant 0 : index
    %c0_118 = arith.constant 0 : index
    %c0_119 = arith.constant 0 : index
    %237 = vector.load %arg12[%c0_117, %c0_118, %c0_119] : memref<1x2x32xf32, #tpu.memory_space<vmem>>, vector<1x2x32xf32>
    %238 = vector.shape_cast %237 : vector<1x2x32xf32> to vector<2x32xf32>
    %239 = vector.extract_strided_slice %238 {offsets = [0, 0], sizes = [1, 32], strides = [1, 1]} : vector<2x32xf32> to vector<1x32xf32>
    %240 = vector.extract_strided_slice %238 {offsets = [1, 0], sizes = [1, 32], strides = [1, 1]} : vector<2x32xf32> to vector<1x32xf32>
    %cst_120 = arith.constant dense<0.000000e+00> : vector<16xf32>
    %241 = vector.multi_reduction <add>, %236, %cst_120 [1] : vector<16x32xf32> to vector<16xf32>
    %242 = vector.shape_cast %241 : vector<16xf32> to vector<16x1xf32>
    %cst_121 = arith.constant 3.200000e+01 : f32
    %243 = vector.broadcast %cst_121 : f32 to vector<16x1xf32>
    %244 = arith.divf %242, %243 : vector<16x1xf32>
    %245 = vector.broadcast %244 : vector<16x1xf32> to vector<16x32xf32>
    %246 = arith.subf %236, %245 : vector<16x32xf32>
    %247 = arith.mulf %246, %246 : vector<16x32xf32>
    %cst_122 = arith.constant dense<0.000000e+00> : vector<16xf32>
    %248 = vector.multi_reduction <add>, %247, %cst_122 [1] : vector<16x32xf32> to vector<16xf32>
    %249 = vector.shape_cast %248 : vector<16xf32> to vector<16x1xf32>
    %cst_123 = arith.constant 0.0322580636 : f32
    %250 = vector.broadcast %cst_123 : f32 to vector<16x1xf32>
    %251 = arith.mulf %249, %250 : vector<16x1xf32>
    %252 = math.sqrt %251 : vector<16x1xf32>
    %cst_124 = arith.constant 9.99999997E-7 : f32
    %253 = vector.broadcast %cst_124 : f32 to vector<16x1xf32>
    %254 = arith.addf %252, %253 : vector<16x1xf32>
    %255 = tpu.reciprocal %254 {approx = true} : vector<16x1xf32> -> vector<16x1xf32>
    %256 = vector.broadcast %239 : vector<1x32xf32> to vector<16x32xf32>
    %257 = arith.mulf %256, %246 : vector<16x32xf32>
    %258 = vector.broadcast %255 : vector<16x1xf32> to vector<16x32xf32>
    %259 = arith.mulf %257, %258 : vector<16x32xf32>
    %260 = vector.broadcast %240 : vector<1x32xf32> to vector<16x32xf32>
    %261 = arith.addf %259, %260 : vector<16x32xf32>
    %c1_i32 = arith.constant 1 : i32
    %262 = arith.cmpi eq, %arg0, %c1_i32 : i32
    %263 = arith.extui %262 : i1 to i32
    %c0_i32 = arith.constant 0 : i32
    %264 = arith.cmpi ne, %263, %c0_i32 : i32
    scf.if %264 {
      %c0_127 = arith.constant 0 : index
      %c0_128 = arith.constant 0 : index
      %c0_129 = arith.constant 0 : index
      %268 = vector.load %arg33[%c0_127, %c0_128, %c0_129] : memref<1x16x32xf32, #tpu.memory_space<vmem>>, vector<1x16x32xf32>
      %269 = vector.shape_cast %268 : vector<1x16x32xf32> to vector<16x32xf32>
      %270 = vector.shape_cast %261 : vector<16x32xf32> to vector<1x16x32xf32>
      tpu.vector_store %arg33[%c0_127, %c0_128, %c0_129], %270 {strides = array<i32>} : memref<1x16x32xf32, #tpu.memory_space<vmem>>, vector<1x16x32xf32>,
    } else {
    }
    %c0_i32_125 = arith.constant 0 : i32
    %265 = arith.cmpi eq, %arg0, %c0_i32_125 : i32
    %266 = arith.extui %265 : i1 to i32
    %c0_i32_126 = arith.constant 0 : i32
    %267 = arith.cmpi ne, %266, %c0_i32_126 : i32
    scf.if %267 {
      %268 = arith.truncf %261 : vector<16x32xf32> to vector<16x32xbf16>
      %c0_127 = arith.constant 0 : index
      %c0_128 = arith.constant 0 : index
      %269 = vector.load %arg14[%c0_127, %c0_128] : memref<16x32xf32, #tpu.memory_space<vmem>>, vector<16x32xf32>
      %c0_129 = arith.constant 0 : index
      %c0_130 = arith.constant 0 : index
      %270 = vector.load %arg15[%c0_129, %c0_130] : memref<64x16xf32, #tpu.memory_space<vmem>>, vector<64x16xf32>
      %c0_131 = arith.constant 0 : index
      %c0_132 = arith.constant 0 : index
      %271 = vector.load %arg16[%c0_131, %c0_132] : memref<64x16xf32, #tpu.memory_space<vmem>>, vector<64x16xf32>
      %c0_133 = arith.constant 0 : index
      %c0_134 = arith.constant 0 : index
      %c0_135 = arith.constant 0 : index
      %272 = vector.load %arg31[%c0_133, %c0_134, %c0_135] : memref<2x6x32xf32, #tpu.memory_space<vmem>>, vector<1x6x32xf32>
      %273 = vector.shape_cast %272 : vector<1x6x32xf32> to vector<6x32xf32>
      %274 = vector.extract_strided_slice %273 {offsets = [0, 0], sizes = [1, 32], strides = [1, 1]} : vector<6x32xf32> to vector<1x32xf32>
      %275 = vector.extract_strided_slice %273 {offsets = [1, 0], sizes = [1, 32], strides = [1, 1]} : vector<6x32xf32> to vector<1x32xf32>
      %cst_136 = arith.constant dense<0.000000e+00> : vector<16xf32>
      %276 = vector.multi_reduction <add>, %269, %cst_136 [1] : vector<16x32xf32> to vector<16xf32>
      %277 = vector.shape_cast %276 : vector<16xf32> to vector<16x1xf32>
      %cst_137 = arith.constant 3.200000e+01 : f32
      %278 = vector.broadcast %cst_137 : f32 to vector<16x1xf32>
      %279 = arith.divf %277, %278 : vector<16x1xf32>
      %280 = vector.broadcast %279 : vector<16x1xf32> to vector<16x32xf32>
      %281 = arith.subf %269, %280 : vector<16x32xf32>
      %282 = arith.mulf %281, %281 : vector<16x32xf32>
      %cst_138 = arith.constant dense<0.000000e+00> : vector<16xf32>
      %283 = vector.multi_reduction <add>, %282, %cst_138 [1] : vector<16x32xf32> to vector<16xf32>
      %284 = vector.shape_cast %283 : vector<16xf32> to vector<16x1xf32>
      %cst_139 = arith.constant 0.0322580636 : f32
      %285 = vector.broadcast %cst_139 : f32 to vector<16x1xf32>
      %286 = arith.mulf %284, %285 : vector<16x1xf32>
      %287 = math.sqrt %286 : vector<16x1xf32>
      %cst_140 = arith.constant 9.99999997E-7 : f32
      %288 = vector.broadcast %cst_140 : f32 to vector<16x1xf32>
      %289 = arith.addf %287, %288 : vector<16x1xf32>
      %290 = tpu.reciprocal %289 {approx = true} : vector<16x1xf32> -> vector<16x1xf32>
      %291 = vector.broadcast %274 : vector<1x32xf32> to vector<16x32xf32>
      %292 = arith.mulf %291, %281 : vector<16x32xf32>
      %293 = vector.broadcast %290 : vector<16x1xf32> to vector<16x32xf32>
      %294 = arith.mulf %292, %293 : vector<16x32xf32>
      %295 = vector.broadcast %275 : vector<1x32xf32> to vector<16x32xf32>
      %296 = arith.addf %294, %295 : vector<16x32xf32>
      %297 = arith.truncf %296 : vector<16x32xf32> to vector<16x32xbf16>
      %c0_141 = arith.constant 0 : index
      %c0_142 = arith.constant 0 : index
      %c0_143 = arith.constant 0 : index
      %298 = vector.load %arg17[%c0_141, %c0_142, %c0_143] : memref<2x32x96xbf16, #tpu.memory_space<vmem>>, vector<1x32x96xbf16>
      %299 = vector.shape_cast %298 : vector<1x32x96xbf16> to vector<32x96xbf16>
      %cst_144 = arith.constant dense<0.000000e+00> : vector<16x96xf32>
      %300 = tpu.matmul %297, %299, %cst_144 {dimension_numbers = #tpu.dot_dimension_numbers<[1], [0], [0], [1], [0, 0, 1, 1], [], []>} : vector<16x32xbf16>, vector<32x96xbf16>, vector<16x96xf32> -> vector<16x96xf32>
      %c0_145 = arith.constant 0 : index
      %c0_146 = arith.constant 0 : index
      %c0_147 = arith.constant 0 : index
      %301 = vector.load %arg18[%c0_145, %c0_146, %c0_147] : memref<2x1x96xf32, #tpu.memory_space<vmem>>, vector<1x1x96xf32>
      %302 = vector.shape_cast %301 : vector<1x1x96xf32> to vector<1x96xf32>
      %303 = vector.broadcast %302 : vector<1x96xf32> to vector<16x96xf32>
      %304 = arith.addf %300, %303 : vector<16x96xf32>
      %305 = vector.extract_strided_slice %304 {offsets = [0, 0], sizes = [16, 32], strides = [1, 1]} : vector<16x96xf32> to vector<16x32xf32>
      %306 = vector.extract_strided_slice %304 {offsets = [0, 32], sizes = [16, 32], strides = [1, 1]} : vector<16x96xf32> to vector<16x32xf32>
      %307 = vector.extract_strided_slice %304 {offsets = [0, 64], sizes = [16, 32], strides = [1, 1]} : vector<16x96xf32> to vector<16x32xf32>
      %c0_148 = arith.constant 0 : index
      %c0_149 = arith.constant 0 : index
      %c0_150 = arith.constant 0 : index
      %308 = vector.load %arg19[%c0_148, %c0_149, %c0_150] : memref<2x32x32xbf16, #tpu.memory_space<vmem>>, vector<1x32x32xbf16>
      %309 = vector.shape_cast %308 : vector<1x32x32xbf16> to vector<32x32xbf16>
      %c0_151 = arith.constant 0 : index
      %c0_152 = arith.constant 0 : index
      %c0_153 = arith.constant 0 : index
      %310 = vector.load %arg20[%c0_151, %c0_152, %c0_153] : memref<2x1x32xf32, #tpu.memory_space<vmem>>, vector<1x1x32xf32>
      %311 = vector.shape_cast %310 : vector<1x1x32xf32> to vector<1x32xf32>
      %312 = tpu.concatenate %305, %305, %305, %305 in 0 : vector<16x32xf32>, vector<16x32xf32>, vector<16x32xf32>, vector<16x32xf32> -> vector<64x32xf32>
      %313 = arith.mulf %312, %0 : vector<64x32xf32>
      %314 = arith.truncf %313 : vector<64x32xf32> to vector<64x32xbf16>
      %315 = arith.truncf %306 : vector<16x32xf32> to vector<16x32xbf16>
      "tpu.trace_start"() <{level = 10 : i32, message = "qd,kd->qk"}> : () -> ()
      %cst_154 = arith.constant dense<0.000000e+00> : vector<64x16xf32>
      %316 = tpu.matmul %314, %315, %cst_154 {dimension_numbers = #tpu.dot_dimension_numbers<[1], [1], [0], [0], [0, 0, 1, 0], [], []>} : vector<64x32xbf16>, vector<16x32xbf16>, vector<64x16xf32> -> vector<64x16xf32>
      "tpu.trace_stop"() : () -> ()
      %cst_155 = arith.constant 0.353553385 : f32
      %317 = vector.broadcast %cst_155 : f32 to vector<64x16xf32>
      %318 = arith.mulf %316, %317 : vector<64x16xf32>
      %319 = arith.addf %318, %270 : vector<64x16xf32>
      %cst_156 = arith.constant dense<0xFF800000> : vector<64xf32>
      %320 = vector.multi_reduction <maximumf>, %319, %cst_156 [1] : vector<64x16xf32> to vector<64xf32>
      %321 = vector.shape_cast %320 : vector<64xf32> to vector<64x1xf32>
      %322 = vector.broadcast %321 : vector<64x1xf32> to vector<64x16xf32>
      %323 = arith.subf %319, %322 : vector<64x16xf32>
      %324 = math.exp %323 : vector<64x16xf32>
      %cst_157 = arith.constant dense<0.000000e+00> : vector<64xf32>
      %325 = vector.multi_reduction <add>, %324, %cst_157 [1] : vector<64x16xf32> to vector<64xf32>
      %326 = vector.shape_cast %325 : vector<64xf32> to vector<64x1xf32>
      %327 = tpu.reciprocal %326 {approx = true} : vector<64x1xf32> -> vector<64x1xf32>
      %328 = vector.broadcast %327 : vector<64x1xf32> to vector<64x16xf32>
      %329 = arith.mulf %324, %328 : vector<64x16xf32>
      %330 = arith.truncf %329 : vector<64x16xf32> to vector<64x16xbf16>
      %331 = arith.truncf %307 : vector<16x32xf32> to vector<16x32xbf16>
      %cst_158 = arith.constant dense<0.000000e+00> : vector<64x32xf32>
      %332 = tpu.matmul %330, %331, %cst_158 {dimension_numbers = #tpu.dot_dimension_numbers<[1], [0], [0], [1], [0, 0, 1, 1], [], []>} : vector<64x16xbf16>, vector<16x32xbf16>, vector<64x32xf32> -> vector<64x32xf32>
      %333 = arith.mulf %332, %0 : vector<64x32xf32>
      %334 = vector.extract_strided_slice %333 {offsets = [0, 0], sizes = [16, 32], strides = [1, 1]} : vector<64x32xf32> to vector<16x32xf32>
      %335 = vector.extract_strided_slice %333 {offsets = [16, 0], sizes = [16, 32], strides = [1, 1]} : vector<64x32xf32> to vector<16x32xf32>
      %336 = arith.addf %334, %335 : vector<16x32xf32>
      %337 = vector.extract_strided_slice %333 {offsets = [32, 0], sizes = [16, 32], strides = [1, 1]} : vector<64x32xf32> to vector<16x32xf32>
      %338 = arith.addf %336, %337 : vector<16x32xf32>
      %339 = vector.extract_strided_slice %333 {offsets = [48, 0], sizes = [16, 32], strides = [1, 1]} : vector<64x32xf32> to vector<16x32xf32>
      %340 = arith.addf %338, %339 : vector<16x32xf32>
      %341 = arith.truncf %340 : vector<16x32xf32> to vector<16x32xbf16>
      %cst_159 = arith.constant dense<0.000000e+00> : vector<16x32xf32>
      %342 = tpu.matmul %341, %309, %cst_159 {dimension_numbers = #tpu.dot_dimension_numbers<[1], [0], [0], [1], [0, 0, 1, 1], [], []>} : vector<16x32xbf16>, vector<32x32xbf16>, vector<16x32xf32> -> vector<16x32xf32>
      %343 = vector.broadcast %311 : vector<1x32xf32> to vector<16x32xf32>
      %344 = arith.addf %342, %343 : vector<16x32xf32>
      %345 = arith.addf %269, %344 : vector<16x32xf32>
      %346 = vector.extract_strided_slice %273 {offsets = [2, 0], sizes = [1, 32], strides = [1, 1]} : vector<6x32xf32> to vector<1x32xf32>
      %347 = vector.extract_strided_slice %273 {offsets = [3, 0], sizes = [1, 32], strides = [1, 1]} : vector<6x32xf32> to vector<1x32xf32>
      %cst_160 = arith.constant dense<0.000000e+00> : vector<16xf32>
      %348 = vector.multi_reduction <add>, %345, %cst_160 [1] : vector<16x32xf32> to vector<16xf32>
      %349 = vector.shape_cast %348 : vector<16xf32> to vector<16x1xf32>
      %cst_161 = arith.constant 3.200000e+01 : f32
      %350 = vector.broadcast %cst_161 : f32 to vector<16x1xf32>
      %351 = arith.divf %349, %350 : vector<16x1xf32>
      %352 = vector.broadcast %351 : vector<16x1xf32> to vector<16x32xf32>
      %353 = arith.subf %345, %352 : vector<16x32xf32>
      %354 = arith.mulf %353, %353 : vector<16x32xf32>
      %cst_162 = arith.constant dense<0.000000e+00> : vector<16xf32>
      %355 = vector.multi_reduction <add>, %354, %cst_162 [1] : vector<16x32xf32> to vector<16xf32>
      %356 = vector.shape_cast %355 : vector<16xf32> to vector<16x1xf32>
      %cst_163 = arith.constant 0.0322580636 : f32
      %357 = vector.broadcast %cst_163 : f32 to vector<16x1xf32>
      %358 = arith.mulf %356, %357 : vector<16x1xf32>
      %359 = math.sqrt %358 : vector<16x1xf32>
      %cst_164 = arith.constant 9.99999997E-7 : f32
      %360 = vector.broadcast %cst_164 : f32 to vector<16x1xf32>
      %361 = arith.addf %359, %360 : vector<16x1xf32>
      %362 = tpu.reciprocal %361 {approx = true} : vector<16x1xf32> -> vector<16x1xf32>
      %363 = vector.broadcast %346 : vector<1x32xf32> to vector<16x32xf32>
      %364 = arith.mulf %363, %353 : vector<16x32xf32>
      %365 = vector.broadcast %362 : vector<16x1xf32> to vector<16x32xf32>
      %366 = arith.mulf %364, %365 : vector<16x32xf32>
      %367 = vector.broadcast %347 : vector<1x32xf32> to vector<16x32xf32>
      %368 = arith.addf %366, %367 : vector<16x32xf32>
      %369 = arith.truncf %368 : vector<16x32xf32> to vector<16x32xbf16>
      %c0_165 = arith.constant 0 : index
      %c0_166 = arith.constant 0 : index
      %c0_167 = arith.constant 0 : index
      %370 = vector.load %arg21[%c0_165, %c0_166, %c0_167] : memref<2x32x32xbf16, #tpu.memory_space<vmem>>, vector<1x32x32xbf16>
      %371 = vector.shape_cast %370 : vector<1x32x32xbf16> to vector<32x32xbf16>
      %cst_168 = arith.constant dense<0.000000e+00> : vector<16x32xf32>
      %372 = tpu.matmul %369, %371, %cst_168 {dimension_numbers = #tpu.dot_dimension_numbers<[1], [0], [0], [1], [0, 0, 1, 1], [], []>} : vector<16x32xbf16>, vector<32x32xbf16>, vector<16x32xf32> -> vector<16x32xf32>
      %c0_169 = arith.constant 0 : index
      %c0_170 = arith.constant 0 : index
      %c0_171 = arith.constant 0 : index
      %373 = vector.load %arg22[%c0_169, %c0_170, %c0_171] : memref<2x1x32xf32, #tpu.memory_space<vmem>>, vector<1x1x32xf32>
      %374 = vector.shape_cast %373 : vector<1x1x32xf32> to vector<1x32xf32>
      %375 = vector.broadcast %374 : vector<1x32xf32> to vector<16x32xf32>
      %376 = arith.addf %372, %375 : vector<16x32xf32>
      %c0_172 = arith.constant 0 : index
      %c0_173 = arith.constant 0 : index
      %c0_174 = arith.constant 0 : index
      %377 = vector.load %arg23[%c0_172, %c0_173, %c0_174] : memref<2x32x64xbf16, #tpu.memory_space<vmem>>, vector<1x32x64xbf16>
      %378 = vector.shape_cast %377 : vector<1x32x64xbf16> to vector<32x64xbf16>
      %cst_175 = arith.constant dense<0.000000e+00> : vector<16x64xf32>
      %379 = tpu.matmul %268, %378, %cst_175 {dimension_numbers = #tpu.dot_dimension_numbers<[1], [0], [0], [1], [0, 0, 1, 1], [], []>} : vector<16x32xbf16>, vector<32x64xbf16>, vector<16x64xf32> -> vector<16x64xf32>
      %c0_176 = arith.constant 0 : index
      %c0_177 = arith.constant 0 : index
      %c0_178 = arith.constant 0 : index
      %380 = vector.load %arg24[%c0_176, %c0_177, %c0_178] : memref<2x1x64xf32, #tpu.memory_space<vmem>>, vector<1x1x64xf32>
      %381 = vector.shape_cast %380 : vector<1x1x64xf32> to vector<1x64xf32>
      %382 = vector.broadcast %381 : vector<1x64xf32> to vector<16x64xf32>
      %383 = arith.addf %379, %382 : vector<16x64xf32>
      %384 = vector.extract_strided_slice %383 {offsets = [0, 0], sizes = [16, 32], strides = [1, 1]} : vector<16x64xf32> to vector<16x32xf32>
      %385 = vector.extract_strided_slice %383 {offsets = [0, 32], sizes = [16, 32], strides = [1, 1]} : vector<16x64xf32> to vector<16x32xf32>
      %c0_179 = arith.constant 0 : index
      %c0_180 = arith.constant 0 : index
      %c0_181 = arith.constant 0 : index
      %386 = vector.load %arg25[%c0_179, %c0_180, %c0_181] : memref<2x32x32xbf16, #tpu.memory_space<vmem>>, vector<1x32x32xbf16>
      %387 = vector.shape_cast %386 : vector<1x32x32xbf16> to vector<32x32xbf16>
      %c0_182 = arith.constant 0 : index
      %c0_183 = arith.constant 0 : index
      %c0_184 = arith.constant 0 : index
      %388 = vector.load %arg26[%c0_182, %c0_183, %c0_184] : memref<2x1x32xf32, #tpu.memory_space<vmem>>, vector<1x1x32xf32>
      %389 = vector.shape_cast %388 : vector<1x1x32xf32> to vector<1x32xf32>
      %390 = tpu.concatenate %376, %376, %376, %376 in 0 : vector<16x32xf32>, vector<16x32xf32>, vector<16x32xf32>, vector<16x32xf32> -> vector<64x32xf32>
      %391 = arith.mulf %390, %0 : vector<64x32xf32>
      %392 = arith.truncf %391 : vector<64x32xf32> to vector<64x32xbf16>
      %393 = arith.truncf %384 : vector<16x32xf32> to vector<16x32xbf16>
      "tpu.trace_start"() <{level = 10 : i32, message = "qd,kd->qk"}> : () -> ()
      %cst_185 = arith.constant dense<0.000000e+00> : vector<64x16xf32>
      %394 = tpu.matmul %392, %393, %cst_185 {dimension_numbers = #tpu.dot_dimension_numbers<[1], [1], [0], [0], [0, 0, 1, 0], [], []>} : vector<64x32xbf16>, vector<16x32xbf16>, vector<64x16xf32> -> vector<64x16xf32>
      "tpu.trace_stop"() : () -> ()
      %cst_186 = arith.constant 0.353553385 : f32
      %395 = vector.broadcast %cst_186 : f32 to vector<64x16xf32>
      %396 = arith.mulf %394, %395 : vector<64x16xf32>
      %397 = arith.addf %396, %271 : vector<64x16xf32>
      %cst_187 = arith.constant dense<0xFF800000> : vector<64xf32>
      %398 = vector.multi_reduction <maximumf>, %397, %cst_187 [1] : vector<64x16xf32> to vector<64xf32>
      %399 = vector.shape_cast %398 : vector<64xf32> to vector<64x1xf32>
      %400 = vector.broadcast %399 : vector<64x1xf32> to vector<64x16xf32>
      %401 = arith.subf %397, %400 : vector<64x16xf32>
      %402 = math.exp %401 : vector<64x16xf32>
      %cst_188 = arith.constant dense<0.000000e+00> : vector<64xf32>
      %403 = vector.multi_reduction <add>, %402, %cst_188 [1] : vector<64x16xf32> to vector<64xf32>
      %404 = vector.shape_cast %403 : vector<64xf32> to vector<64x1xf32>
      %405 = tpu.reciprocal %404 {approx = true} : vector<64x1xf32> -> vector<64x1xf32>
      %406 = vector.broadcast %405 : vector<64x1xf32> to vector<64x16xf32>
      %407 = arith.mulf %402, %406 : vector<64x16xf32>
      %408 = arith.truncf %407 : vector<64x16xf32> to vector<64x16xbf16>
      %409 = arith.truncf %385 : vector<16x32xf32> to vector<16x32xbf16>
      %cst_189 = arith.constant dense<0.000000e+00> : vector<64x32xf32>
      %410 = tpu.matmul %408, %409, %cst_189 {dimension_numbers = #tpu.dot_dimension_numbers<[1], [0], [0], [1], [0, 0, 1, 1], [], []>} : vector<64x16xbf16>, vector<16x32xbf16>, vector<64x32xf32> -> vector<64x32xf32>
      %411 = arith.mulf %410, %0 : vector<64x32xf32>
      %412 = vector.extract_strided_slice %411 {offsets = [0, 0], sizes = [16, 32], strides = [1, 1]} : vector<64x32xf32> to vector<16x32xf32>
      %413 = vector.extract_strided_slice %411 {offsets = [16, 0], sizes = [16, 32], strides = [1, 1]} : vector<64x32xf32> to vector<16x32xf32>
      %414 = arith.addf %412, %413 : vector<16x32xf32>
      %415 = vector.extract_strided_slice %411 {offsets = [32, 0], sizes = [16, 32], strides = [1, 1]} : vector<64x32xf32> to vector<16x32xf32>
      %416 = arith.addf %414, %415 : vector<16x32xf32>
      %417 = vector.extract_strided_slice %411 {offsets = [48, 0], sizes = [16, 32], strides = [1, 1]} : vector<64x32xf32> to vector<16x32xf32>
      %418 = arith.addf %416, %417 : vector<16x32xf32>
      %419 = arith.truncf %418 : vector<16x32xf32> to vector<16x32xbf16>
      %cst_190 = arith.constant dense<0.000000e+00> : vector<16x32xf32>
      %420 = tpu.matmul %419, %387, %cst_190 {dimension_numbers = #tpu.dot_dimension_numbers<[1], [0], [0], [1], [0, 0, 1, 1], [], []>} : vector<16x32xbf16>, vector<32x32xbf16>, vector<16x32xf32> -> vector<16x32xf32>
      %421 = vector.broadcast %389 : vector<1x32xf32> to vector<16x32xf32>
      %422 = arith.addf %420, %421 : vector<16x32xf32>
      %423 = arith.addf %345, %422 : vector<16x32xf32>
      %424 = vector.extract_strided_slice %273 {offsets = [4, 0], sizes = [1, 32], strides = [1, 1]} : vector<6x32xf32> to vector<1x32xf32>
      %425 = vector.extract_strided_slice %273 {offsets = [5, 0], sizes = [1, 32], strides = [1, 1]} : vector<6x32xf32> to vector<1x32xf32>
      %cst_191 = arith.constant dense<0.000000e+00> : vector<16xf32>
      %426 = vector.multi_reduction <add>, %423, %cst_191 [1] : vector<16x32xf32> to vector<16xf32>
      %427 = vector.shape_cast %426 : vector<16xf32> to vector<16x1xf32>
      %cst_192 = arith.constant 3.200000e+01 : f32
      %428 = vector.broadcast %cst_192 : f32 to vector<16x1xf32>
      %429 = arith.divf %427, %428 : vector<16x1xf32>
      %430 = vector.broadcast %429 : vector<16x1xf32> to vector<16x32xf32>
      %431 = arith.subf %423, %430 : vector<16x32xf32>
      %432 = arith.mulf %431, %431 : vector<16x32xf32>
      %cst_193 = arith.constant dense<0.000000e+00> : vector<16xf32>
      %433 = vector.multi_reduction <add>, %432, %cst_193 [1] : vector<16x32xf32> to vector<16xf32>
      %434 = vector.shape_cast %433 : vector<16xf32> to vector<16x1xf32>
      %cst_194 = arith.constant 0.0322580636 : f32
      %435 = vector.broadcast %cst_194 : f32 to vector<16x1xf32>
      %436 = arith.mulf %434, %435 : vector<16x1xf32>
      %437 = math.sqrt %436 : vector<16x1xf32>
      %cst_195 = arith.constant 9.99999997E-7 : f32
      %438 = vector.broadcast %cst_195 : f32 to vector<16x1xf32>
      %439 = arith.addf %437, %438 : vector<16x1xf32>
      %440 = tpu.reciprocal %439 {approx = true} : vector<16x1xf32> -> vector<16x1xf32>
      %441 = vector.broadcast %424 : vector<1x32xf32> to vector<16x32xf32>
      %442 = arith.mulf %441, %431 : vector<16x32xf32>
      %443 = vector.broadcast %440 : vector<16x1xf32> to vector<16x32xf32>
      %444 = arith.mulf %442, %443 : vector<16x32xf32>
      %445 = vector.broadcast %425 : vector<1x32xf32> to vector<16x32xf32>
      %446 = arith.addf %444, %445 : vector<16x32xf32>
      %447 = arith.truncf %446 : vector<16x32xf32> to vector<16x32xbf16>
      %c0_196 = arith.constant 0 : index
      %c0_197 = arith.constant 0 : index
      %c0_198 = arith.constant 0 : index
      %448 = vector.load %arg27[%c0_196, %c0_197, %c0_198] : memref<2x32x64xbf16, #tpu.memory_space<vmem>>, vector<1x32x64xbf16>
      %449 = vector.shape_cast %448 : vector<1x32x64xbf16> to vector<32x64xbf16>
      %cst_199 = arith.constant dense<0.000000e+00> : vector<16x64xf32>
      %450 = tpu.matmul %447, %449, %cst_199 {dimension_numbers = #tpu.dot_dimension_numbers<[1], [0], [0], [1], [0, 0, 1, 1], [], []>} : vector<16x32xbf16>, vector<32x64xbf16>, vector<16x64xf32> -> vector<16x64xf32>
      %c0_200 = arith.constant 0 : index
      %c0_201 = arith.constant 0 : index
      %c0_202 = arith.constant 0 : index
      %451 = vector.load %arg28[%c0_200, %c0_201, %c0_202] : memref<2x1x64xf32, #tpu.memory_space<vmem>>, vector<1x1x64xf32>
      %452 = vector.shape_cast %451 : vector<1x1x64xf32> to vector<1x64xf32>
      %453 = vector.broadcast %452 : vector<1x64xf32> to vector<16x64xf32>
      %454 = arith.addf %450, %453 : vector<16x64xf32>
      %cst_203 = arith.constant 0.000000e+00 : f32
      %455 = vector.broadcast %cst_203 : f32 to vector<16x64xf32>
      %456 = arith.maximumf %454, %455 : vector<16x64xf32>
      %457 = arith.truncf %456 : vector<16x64xf32> to vector<16x64xbf16>
      %c0_204 = arith.constant 0 : index
      %c0_205 = arith.constant 0 : index
      %c0_206 = arith.constant 0 : index
      %458 = vector.load %arg29[%c0_204, %c0_205, %c0_206] : memref<2x64x32xbf16, #tpu.memory_space<vmem>>, vector<1x64x32xbf16>
      %459 = vector.shape_cast %458 : vector<1x64x32xbf16> to vector<64x32xbf16>
      %cst_207 = arith.constant dense<0.000000e+00> : vector<16x32xf32>
      %460 = tpu.matmul %457, %459, %cst_207 {dimension_numbers = #tpu.dot_dimension_numbers<[1], [0], [0], [1], [0, 0, 1, 1], [], []>} : vector<16x64xbf16>, vector<64x32xbf16>, vector<16x32xf32> -> vector<16x32xf32>
      %461 = arith.addf %423, %460 : vector<16x32xf32>
      %c0_208 = arith.constant 0 : index
      %c0_209 = arith.constant 0 : index
      %c0_210 = arith.constant 0 : index
      %462 = vector.load %arg30[%c0_208, %c0_209, %c0_210] : memref<2x1x32xf32, #tpu.memory_space<vmem>>, vector<1x1x32xf32>
      %463 = vector.shape_cast %462 : vector<1x1x32xf32> to vector<1x32xf32>
      %464 = vector.broadcast %463 : vector<1x32xf32> to vector<16x32xf32>
      %465 = arith.addf %461, %464 : vector<16x32xf32>
      %c1_211 = arith.constant 1 : index
      %c0_212 = arith.constant 0 : index
      %c0_213 = arith.constant 0 : index
      %466 = vector.load %arg31[%c1_211, %c0_212, %c0_213] : memref<2x6x32xf32, #tpu.memory_space<vmem>>, vector<1x6x32xf32>
      %467 = vector.shape_cast %466 : vector<1x6x32xf32> to vector<6x32xf32>
      %468 = vector.extract_strided_slice %467 {offsets = [0, 0], sizes = [1, 32], strides = [1, 1]} : vector<6x32xf32> to vector<1x32xf32>
      %469 = vector.extract_strided_slice %467 {offsets = [1, 0], sizes = [1, 32], strides = [1, 1]} : vector<6x32xf32> to vector<1x32xf32>
      %cst_214 = arith.constant dense<0.000000e+00> : vector<16xf32>
      %470 = vector.multi_reduction <add>, %465, %cst_214 [1] : vector<16x32xf32> to vector<16xf32>
      %471 = vector.shape_cast %470 : vector<16xf32> to vector<16x1xf32>
      %cst_215 = arith.constant 3.200000e+01 : f32
      %472 = vector.broadcast %cst_215 : f32 to vector<16x1xf32>
      %473 = arith.divf %471, %472 : vector<16x1xf32>
      %474 = vector.broadcast %473 : vector<16x1xf32> to vector<16x32xf32>
      %475 = arith.subf %465, %474 : vector<16x32xf32>
      %476 = arith.mulf %475, %475 : vector<16x32xf32>
      %cst_216 = arith.constant dense<0.000000e+00> : vector<16xf32>
      %477 = vector.multi_reduction <add>, %476, %cst_216 [1] : vector<16x32xf32> to vector<16xf32>
      %478 = vector.shape_cast %477 : vector<16xf32> to vector<16x1xf32>
      %cst_217 = arith.constant 0.0322580636 : f32
      %479 = vector.broadcast %cst_217 : f32 to vector<16x1xf32>
      %480 = arith.mulf %478, %479 : vector<16x1xf32>
      %481 = math.sqrt %480 : vector<16x1xf32>
      %cst_218 = arith.constant 9.99999997E-7 : f32
      %482 = vector.broadcast %cst_218 : f32 to vector<16x1xf32>
      %483 = arith.addf %481, %482 : vector<16x1xf32>
      %484 = tpu.reciprocal %483 {approx = true} : vector<16x1xf32> -> vector<16x1xf32>
      %485 = vector.broadcast %468 : vector<1x32xf32> to vector<16x32xf32>
      %486 = arith.mulf %485, %475 : vector<16x32xf32>
      %487 = vector.broadcast %484 : vector<16x1xf32> to vector<16x32xf32>
      %488 = arith.mulf %486, %487 : vector<16x32xf32>
      %489 = vector.broadcast %469 : vector<1x32xf32> to vector<16x32xf32>
      %490 = arith.addf %488, %489 : vector<16x32xf32>
      %491 = arith.truncf %490 : vector<16x32xf32> to vector<16x32xbf16>
      %c1_219 = arith.constant 1 : index
      %c0_220 = arith.constant 0 : index
      %c0_221 = arith.constant 0 : index
      %492 = vector.load %arg17[%c1_219, %c0_220, %c0_221] : memref<2x32x96xbf16, #tpu.memory_space<vmem>>, vector<1x32x96xbf16>
      %493 = vector.shape_cast %492 : vector<1x32x96xbf16> to vector<32x96xbf16>
      %cst_222 = arith.constant dense<0.000000e+00> : vector<16x96xf32>
      %494 = tpu.matmul %491, %493, %cst_222 {dimension_numbers = #tpu.dot_dimension_numbers<[1], [0], [0], [1], [0, 0, 1, 1], [], []>} : vector<16x32xbf16>, vector<32x96xbf16>, vector<16x96xf32> -> vector<16x96xf32>
      %c1_223 = arith.constant 1 : index
      %c0_224 = arith.constant 0 : index
      %c0_225 = arith.constant 0 : index
      %495 = vector.load %arg18[%c1_223, %c0_224, %c0_225] : memref<2x1x96xf32, #tpu.memory_space<vmem>>, vector<1x1x96xf32>
      %496 = vector.shape_cast %495 : vector<1x1x96xf32> to vector<1x96xf32>
      %497 = vector.broadcast %496 : vector<1x96xf32> to vector<16x96xf32>
      %498 = arith.addf %494, %497 : vector<16x96xf32>
      %499 = vector.extract_strided_slice %498 {offsets = [0, 0], sizes = [16, 32], strides = [1, 1]} : vector<16x96xf32> to vector<16x32xf32>
      %500 = vector.extract_strided_slice %498 {offsets = [0, 32], sizes = [16, 32], strides = [1, 1]} : vector<16x96xf32> to vector<16x32xf32>
      %501 = vector.extract_strided_slice %498 {offsets = [0, 64], sizes = [16, 32], strides = [1, 1]} : vector<16x96xf32> to vector<16x32xf32>
      %c1_226 = arith.constant 1 : index
      %c0_227 = arith.constant 0 : index
      %c0_228 = arith.constant 0 : index
      %502 = vector.load %arg19[%c1_226, %c0_227, %c0_228] : memref<2x32x32xbf16, #tpu.memory_space<vmem>>, vector<1x32x32xbf16>
      %503 = vector.shape_cast %502 : vector<1x32x32xbf16> to vector<32x32xbf16>
      %c1_229 = arith.constant 1 : index
      %c0_230 = arith.constant 0 : index
      %c0_231 = arith.constant 0 : index
      %504 = vector.load %arg20[%c1_229, %c0_230, %c0_231] : memref<2x1x32xf32, #tpu.memory_space<vmem>>, vector<1x1x32xf32>
      %505 = vector.shape_cast %504 : vector<1x1x32xf32> to vector<1x32xf32>
      %506 = tpu.concatenate %499, %499, %499, %499 in 0 : vector<16x32xf32>, vector<16x32xf32>, vector<16x32xf32>, vector<16x32xf32> -> vector<64x32xf32>
      %507 = arith.mulf %506, %0 : vector<64x32xf32>
      %508 = arith.truncf %507 : vector<64x32xf32> to vector<64x32xbf16>
      %509 = arith.truncf %500 : vector<16x32xf32> to vector<16x32xbf16>
      "tpu.trace_start"() <{level = 10 : i32, message = "qd,kd->qk"}> : () -> ()
      %cst_232 = arith.constant dense<0.000000e+00> : vector<64x16xf32>
      %510 = tpu.matmul %508, %509, %cst_232 {dimension_numbers = #tpu.dot_dimension_numbers<[1], [1], [0], [0], [0, 0, 1, 0], [], []>} : vector<64x32xbf16>, vector<16x32xbf16>, vector<64x16xf32> -> vector<64x16xf32>
      "tpu.trace_stop"() : () -> ()
      %cst_233 = arith.constant 0.353553385 : f32
      %511 = vector.broadcast %cst_233 : f32 to vector<64x16xf32>
      %512 = arith.mulf %510, %511 : vector<64x16xf32>
      %513 = arith.addf %512, %270 : vector<64x16xf32>
      %cst_234 = arith.constant dense<0xFF800000> : vector<64xf32>
      %514 = vector.multi_reduction <maximumf>, %513, %cst_234 [1] : vector<64x16xf32> to vector<64xf32>
      %515 = vector.shape_cast %514 : vector<64xf32> to vector<64x1xf32>
      %516 = vector.broadcast %515 : vector<64x1xf32> to vector<64x16xf32>
      %517 = arith.subf %513, %516 : vector<64x16xf32>
      %518 = math.exp %517 : vector<64x16xf32>
      %cst_235 = arith.constant dense<0.000000e+00> : vector<64xf32>
      %519 = vector.multi_reduction <add>, %518, %cst_235 [1] : vector<64x16xf32> to vector<64xf32>
      %520 = vector.shape_cast %519 : vector<64xf32> to vector<64x1xf32>
      %521 = tpu.reciprocal %520 {approx = true} : vector<64x1xf32> -> vector<64x1xf32>
      %522 = vector.broadcast %521 : vector<64x1xf32> to vector<64x16xf32>
      %523 = arith.mulf %518, %522 : vector<64x16xf32>
      %524 = arith.truncf %523 : vector<64x16xf32> to vector<64x16xbf16>
      %525 = arith.truncf %501 : vector<16x32xf32> to vector<16x32xbf16>
      %cst_236 = arith.constant dense<0.000000e+00> : vector<64x32xf32>
      %526 = tpu.matmul %524, %525, %cst_236 {dimension_numbers = #tpu.dot_dimension_numbers<[1], [0], [0], [1], [0, 0, 1, 1], [], []>} : vector<64x16xbf16>, vector<16x32xbf16>, vector<64x32xf32> -> vector<64x32xf32>
      %527 = arith.mulf %526, %0 : vector<64x32xf32>
      %528 = vector.extract_strided_slice %527 {offsets = [0, 0], sizes = [16, 32], strides = [1, 1]} : vector<64x32xf32> to vector<16x32xf32>
      %529 = vector.extract_strided_slice %527 {offsets = [16, 0], sizes = [16, 32], strides = [1, 1]} : vector<64x32xf32> to vector<16x32xf32>
      %530 = arith.addf %528, %529 : vector<16x32xf32>
      %531 = vector.extract_strided_slice %527 {offsets = [32, 0], sizes = [16, 32], strides = [1, 1]} : vector<64x32xf32> to vector<16x32xf32>
      %532 = arith.addf %530, %531 : vector<16x32xf32>
      %533 = vector.extract_strided_slice %527 {offsets = [48, 0], sizes = [16, 32], strides = [1, 1]} : vector<64x32xf32> to vector<16x32xf32>
      %534 = arith.addf %532, %533 : vector<16x32xf32>
      %535 = arith.truncf %534 : vector<16x32xf32> to vector<16x32xbf16>
      %cst_237 = arith.constant dense<0.000000e+00> : vector<16x32xf32>
      %536 = tpu.matmul %535, %503, %cst_237 {dimension_numbers = #tpu.dot_dimension_numbers<[1], [0], [0], [1], [0, 0, 1, 1], [], []>} : vector<16x32xbf16>, vector<32x32xbf16>, vector<16x32xf32> -> vector<16x32xf32>
      %537 = vector.broadcast %505 : vector<1x32xf32> to vector<16x32xf32>
      %538 = arith.addf %536, %537 : vector<16x32xf32>
      %539 = arith.addf %465, %538 : vector<16x32xf32>
      %540 = vector.extract_strided_slice %467 {offsets = [2, 0], sizes = [1, 32], strides = [1, 1]} : vector<6x32xf32> to vector<1x32xf32>
      %541 = vector.extract_strided_slice %467 {offsets = [3, 0], sizes = [1, 32], strides = [1, 1]} : vector<6x32xf32> to vector<1x32xf32>
      %cst_238 = arith.constant dense<0.000000e+00> : vector<16xf32>
      %542 = vector.multi_reduction <add>, %539, %cst_238 [1] : vector<16x32xf32> to vector<16xf32>
      %543 = vector.shape_cast %542 : vector<16xf32> to vector<16x1xf32>
      %cst_239 = arith.constant 3.200000e+01 : f32
      %544 = vector.broadcast %cst_239 : f32 to vector<16x1xf32>
      %545 = arith.divf %543, %544 : vector<16x1xf32>
      %546 = vector.broadcast %545 : vector<16x1xf32> to vector<16x32xf32>
      %547 = arith.subf %539, %546 : vector<16x32xf32>
      %548 = arith.mulf %547, %547 : vector<16x32xf32>
      %cst_240 = arith.constant dense<0.000000e+00> : vector<16xf32>
      %549 = vector.multi_reduction <add>, %548, %cst_240 [1] : vector<16x32xf32> to vector<16xf32>
      %550 = vector.shape_cast %549 : vector<16xf32> to vector<16x1xf32>
      %cst_241 = arith.constant 0.0322580636 : f32
      %551 = vector.broadcast %cst_241 : f32 to vector<16x1xf32>
      %552 = arith.mulf %550, %551 : vector<16x1xf32>
      %553 = math.sqrt %552 : vector<16x1xf32>
      %cst_242 = arith.constant 9.99999997E-7 : f32
      %554 = vector.broadcast %cst_242 : f32 to vector<16x1xf32>
      %555 = arith.addf %553, %554 : vector<16x1xf32>
      %556 = tpu.reciprocal %555 {approx = true} : vector<16x1xf32> -> vector<16x1xf32>
      %557 = vector.broadcast %540 : vector<1x32xf32> to vector<16x32xf32>
      %558 = arith.mulf %557, %547 : vector<16x32xf32>
      %559 = vector.broadcast %556 : vector<16x1xf32> to vector<16x32xf32>
      %560 = arith.mulf %558, %559 : vector<16x32xf32>
      %561 = vector.broadcast %541 : vector<1x32xf32> to vector<16x32xf32>
      %562 = arith.addf %560, %561 : vector<16x32xf32>
      %563 = arith.truncf %562 : vector<16x32xf32> to vector<16x32xbf16>
      %c1_243 = arith.constant 1 : index
      %c0_244 = arith.constant 0 : index
      %c0_245 = arith.constant 0 : index
      %564 = vector.load %arg21[%c1_243, %c0_244, %c0_245] : memref<2x32x32xbf16, #tpu.memory_space<vmem>>, vector<1x32x32xbf16>
      %565 = vector.shape_cast %564 : vector<1x32x32xbf16> to vector<32x32xbf16>
      %cst_246 = arith.constant dense<0.000000e+00> : vector<16x32xf32>
      %566 = tpu.matmul %563, %565, %cst_246 {dimension_numbers = #tpu.dot_dimension_numbers<[1], [0], [0], [1], [0, 0, 1, 1], [], []>} : vector<16x32xbf16>, vector<32x32xbf16>, vector<16x32xf32> -> vector<16x32xf32>
      %c1_247 = arith.constant 1 : index
      %c0_248 = arith.constant 0 : index
      %c0_249 = arith.constant 0 : index
      %567 = vector.load %arg22[%c1_247, %c0_248, %c0_249] : memref<2x1x32xf32, #tpu.memory_space<vmem>>, vector<1x1x32xf32>
      %568 = vector.shape_cast %567 : vector<1x1x32xf32> to vector<1x32xf32>
      %569 = vector.broadcast %568 : vector<1x32xf32> to vector<16x32xf32>
      %570 = arith.addf %566, %569 : vector<16x32xf32>
      %c1_250 = arith.constant 1 : index
      %c0_251 = arith.constant 0 : index
      %c0_252 = arith.constant 0 : index
      %571 = vector.load %arg23[%c1_250, %c0_251, %c0_252] : memref<2x32x64xbf16, #tpu.memory_space<vmem>>, vector<1x32x64xbf16>
      %572 = vector.shape_cast %571 : vector<1x32x64xbf16> to vector<32x64xbf16>
      %cst_253 = arith.constant dense<0.000000e+00> : vector<16x64xf32>
      %573 = tpu.matmul %268, %572, %cst_253 {dimension_numbers = #tpu.dot_dimension_numbers<[1], [0], [0], [1], [0, 0, 1, 1], [], []>} : vector<16x32xbf16>, vector<32x64xbf16>, vector<16x64xf32> -> vector<16x64xf32>
      %c1_254 = arith.constant 1 : index
      %c0_255 = arith.constant 0 : index
      %c0_256 = arith.constant 0 : index
      %574 = vector.load %arg24[%c1_254, %c0_255, %c0_256] : memref<2x1x64xf32, #tpu.memory_space<vmem>>, vector<1x1x64xf32>
      %575 = vector.shape_cast %574 : vector<1x1x64xf32> to vector<1x64xf32>
      %576 = vector.broadcast %575 : vector<1x64xf32> to vector<16x64xf32>
      %577 = arith.addf %573, %576 : vector<16x64xf32>
      %578 = vector.extract_strided_slice %577 {offsets = [0, 0], sizes = [16, 32], strides = [1, 1]} : vector<16x64xf32> to vector<16x32xf32>
      %579 = vector.extract_strided_slice %577 {offsets = [0, 32], sizes = [16, 32], strides = [1, 1]} : vector<16x64xf32> to vector<16x32xf32>
      %c1_257 = arith.constant 1 : index
      %c0_258 = arith.constant 0 : index
      %c0_259 = arith.constant 0 : index
      %580 = vector.load %arg25[%c1_257, %c0_258, %c0_259] : memref<2x32x32xbf16, #tpu.memory_space<vmem>>, vector<1x32x32xbf16>
      %581 = vector.shape_cast %580 : vector<1x32x32xbf16> to vector<32x32xbf16>
      %c1_260 = arith.constant 1 : index
      %c0_261 = arith.constant 0 : index
      %c0_262 = arith.constant 0 : index
      %582 = vector.load %arg26[%c1_260, %c0_261, %c0_262] : memref<2x1x32xf32, #tpu.memory_space<vmem>>, vector<1x1x32xf32>
      %583 = vector.shape_cast %582 : vector<1x1x32xf32> to vector<1x32xf32>
      %584 = tpu.concatenate %570, %570, %570, %570 in 0 : vector<16x32xf32>, vector<16x32xf32>, vector<16x32xf32>, vector<16x32xf32> -> vector<64x32xf32>
      %585 = arith.mulf %584, %0 : vector<64x32xf32>
      %586 = arith.truncf %585 : vector<64x32xf32> to vector<64x32xbf16>
      %587 = arith.truncf %578 : vector<16x32xf32> to vector<16x32xbf16>
      "tpu.trace_start"() <{level = 10 : i32, message = "qd,kd->qk"}> : () -> ()
      %cst_263 = arith.constant dense<0.000000e+00> : vector<64x16xf32>
      %588 = tpu.matmul %586, %587, %cst_263 {dimension_numbers = #tpu.dot_dimension_numbers<[1], [1], [0], [0], [0, 0, 1, 0], [], []>} : vector<64x32xbf16>, vector<16x32xbf16>, vector<64x16xf32> -> vector<64x16xf32>
      "tpu.trace_stop"() : () -> ()
      %cst_264 = arith.constant 0.353553385 : f32
      %589 = vector.broadcast %cst_264 : f32 to vector<64x16xf32>
      %590 = arith.mulf %588, %589 : vector<64x16xf32>
      %591 = arith.addf %590, %271 : vector<64x16xf32>
      %cst_265 = arith.constant dense<0xFF800000> : vector<64xf32>
      %592 = vector.multi_reduction <maximumf>, %591, %cst_265 [1] : vector<64x16xf32> to vector<64xf32>
      %593 = vector.shape_cast %592 : vector<64xf32> to vector<64x1xf32>
      %594 = vector.broadcast %593 : vector<64x1xf32> to vector<64x16xf32>
      %595 = arith.subf %591, %594 : vector<64x16xf32>
      %596 = math.exp %595 : vector<64x16xf32>
      %cst_266 = arith.constant dense<0.000000e+00> : vector<64xf32>
      %597 = vector.multi_reduction <add>, %596, %cst_266 [1] : vector<64x16xf32> to vector<64xf32>
      %598 = vector.shape_cast %597 : vector<64xf32> to vector<64x1xf32>
      %599 = tpu.reciprocal %598 {approx = true} : vector<64x1xf32> -> vector<64x1xf32>
      %600 = vector.broadcast %599 : vector<64x1xf32> to vector<64x16xf32>
      %601 = arith.mulf %596, %600 : vector<64x16xf32>
      %602 = arith.truncf %601 : vector<64x16xf32> to vector<64x16xbf16>
      %603 = arith.truncf %579 : vector<16x32xf32> to vector<16x32xbf16>
      %cst_267 = arith.constant dense<0.000000e+00> : vector<64x32xf32>
      %604 = tpu.matmul %602, %603, %cst_267 {dimension_numbers = #tpu.dot_dimension_numbers<[1], [0], [0], [1], [0, 0, 1, 1], [], []>} : vector<64x16xbf16>, vector<16x32xbf16>, vector<64x32xf32> -> vector<64x32xf32>
      %605 = arith.mulf %604, %0 : vector<64x32xf32>
      %606 = vector.extract_strided_slice %605 {offsets = [0, 0], sizes = [16, 32], strides = [1, 1]} : vector<64x32xf32> to vector<16x32xf32>
      %607 = vector.extract_strided_slice %605 {offsets = [16, 0], sizes = [16, 32], strides = [1, 1]} : vector<64x32xf32> to vector<16x32xf32>
      %608 = arith.addf %606, %607 : vector<16x32xf32>
      %609 = vector.extract_strided_slice %605 {offsets = [32, 0], sizes = [16, 32], strides = [1, 1]} : vector<64x32xf32> to vector<16x32xf32>
      %610 = arith.addf %608, %609 : vector<16x32xf32>
      %611 = vector.extract_strided_slice %605 {offsets = [48, 0], sizes = [16, 32], strides = [1, 1]} : vector<64x32xf32> to vector<16x32xf32>
      %612 = arith.addf %610, %611 : vector<16x32xf32>
      %613 = arith.truncf %612 : vector<16x32xf32> to vector<16x32xbf16>
      %cst_268 = arith.constant dense<0.000000e+00> : vector<16x32xf32>
      %614 = tpu.matmul %613, %581, %cst_268 {dimension_numbers = #tpu.dot_dimension_numbers<[1], [0], [0], [1], [0, 0, 1, 1], [], []>} : vector<16x32xbf16>, vector<32x32xbf16>, vector<16x32xf32> -> vector<16x32xf32>
      %615 = vector.broadcast %583 : vector<1x32xf32> to vector<16x32xf32>
      %616 = arith.addf %614, %615 : vector<16x32xf32>
      %617 = arith.addf %539, %616 : vector<16x32xf32>
      %618 = vector.extract_strided_slice %467 {offsets = [4, 0], sizes = [1, 32], strides = [1, 1]} : vector<6x32xf32> to vector<1x32xf32>
      %619 = vector.extract_strided_slice %467 {offsets = [5, 0], sizes = [1, 32], strides = [1, 1]} : vector<6x32xf32> to vector<1x32xf32>
      %cst_269 = arith.constant dense<0.000000e+00> : vector<16xf32>
      %620 = vector.multi_reduction <add>, %617, %cst_269 [1] : vector<16x32xf32> to vector<16xf32>
      %621 = vector.shape_cast %620 : vector<16xf32> to vector<16x1xf32>
      %cst_270 = arith.constant 3.200000e+01 : f32
      %622 = vector.broadcast %cst_270 : f32 to vector<16x1xf32>
      %623 = arith.divf %621, %622 : vector<16x1xf32>
      %624 = vector.broadcast %623 : vector<16x1xf32> to vector<16x32xf32>
      %625 = arith.subf %617, %624 : vector<16x32xf32>
      %626 = arith.mulf %625, %625 : vector<16x32xf32>
      %cst_271 = arith.constant dense<0.000000e+00> : vector<16xf32>
      %627 = vector.multi_reduction <add>, %626, %cst_271 [1] : vector<16x32xf32> to vector<16xf32>
      %628 = vector.shape_cast %627 : vector<16xf32> to vector<16x1xf32>
      %cst_272 = arith.constant 0.0322580636 : f32
      %629 = vector.broadcast %cst_272 : f32 to vector<16x1xf32>
      %630 = arith.mulf %628, %629 : vector<16x1xf32>
      %631 = math.sqrt %630 : vector<16x1xf32>
      %cst_273 = arith.constant 9.99999997E-7 : f32
      %632 = vector.broadcast %cst_273 : f32 to vector<16x1xf32>
      %633 = arith.addf %631, %632 : vector<16x1xf32>
      %634 = tpu.reciprocal %633 {approx = true} : vector<16x1xf32> -> vector<16x1xf32>
      %635 = vector.broadcast %618 : vector<1x32xf32> to vector<16x32xf32>
      %636 = arith.mulf %635, %625 : vector<16x32xf32>
      %637 = vector.broadcast %634 : vector<16x1xf32> to vector<16x32xf32>
      %638 = arith.mulf %636, %637 : vector<16x32xf32>
      %639 = vector.broadcast %619 : vector<1x32xf32> to vector<16x32xf32>
      %640 = arith.addf %638, %639 : vector<16x32xf32>
      %641 = arith.truncf %640 : vector<16x32xf32> to vector<16x32xbf16>
      %c1_274 = arith.constant 1 : index
      %c0_275 = arith.constant 0 : index
      %c0_276 = arith.constant 0 : index
      %642 = vector.load %arg27[%c1_274, %c0_275, %c0_276] : memref<2x32x64xbf16, #tpu.memory_space<vmem>>, vector<1x32x64xbf16>
      %643 = vector.shape_cast %642 : vector<1x32x64xbf16> to vector<32x64xbf16>
      %cst_277 = arith.constant dense<0.000000e+00> : vector<16x64xf32>
      %644 = tpu.matmul %641, %643, %cst_277 {dimension_numbers = #tpu.dot_dimension_numbers<[1], [0], [0], [1], [0, 0, 1, 1], [], []>} : vector<16x32xbf16>, vector<32x64xbf16>, vector<16x64xf32> -> vector<16x64xf32>
      %c1_278 = arith.constant 1 : index
      %c0_279 = arith.constant 0 : index
      %c0_280 = arith.constant 0 : index
      %645 = vector.load %arg28[%c1_278, %c0_279, %c0_280] : memref<2x1x64xf32, #tpu.memory_space<vmem>>, vector<1x1x64xf32>
      %646 = vector.shape_cast %645 : vector<1x1x64xf32> to vector<1x64xf32>
      %647 = vector.broadcast %646 : vector<1x64xf32> to vector<16x64xf32>
      %648 = arith.addf %644, %647 : vector<16x64xf32>
      %cst_281 = arith.constant 0.000000e+00 : f32
      %649 = vector.broadcast %cst_281 : f32 to vector<16x64xf32>
      %650 = arith.maximumf %648, %649 : vector<16x64xf32>
      %651 = arith.truncf %650 : vector<16x64xf32> to vector<16x64xbf16>
      %c1_282 = arith.constant 1 : index
      %c0_283 = arith.constant 0 : index
      %c0_284 = arith.constant 0 : index
      %652 = vector.load %arg29[%c1_282, %c0_283, %c0_284] : memref<2x64x32xbf16, #tpu.memory_space<vmem>>, vector<1x64x32xbf16>
      %653 = vector.shape_cast %652 : vector<1x64x32xbf16> to vector<64x32xbf16>
      %cst_285 = arith.constant dense<0.000000e+00> : vector<16x32xf32>
      %654 = tpu.matmul %651, %653, %cst_285 {dimension_numbers = #tpu.dot_dimension_numbers<[1], [0], [0], [1], [0, 0, 1, 1], [], []>} : vector<16x64xbf16>, vector<64x32xbf16>, vector<16x32xf32> -> vector<16x32xf32>
      %655 = arith.addf %617, %654 : vector<16x32xf32>
      %c1_286 = arith.constant 1 : index
      %c0_287 = arith.constant 0 : index
      %c0_288 = arith.constant 0 : index
      %656 = vector.load %arg30[%c1_286, %c0_287, %c0_288] : memref<2x1x32xf32, #tpu.memory_space<vmem>>, vector<1x1x32xf32>
      %657 = vector.shape_cast %656 : vector<1x1x32xf32> to vector<1x32xf32>
      %658 = vector.broadcast %657 : vector<1x32xf32> to vector<16x32xf32>
      %659 = arith.addf %655, %658 : vector<16x32xf32>
      %c0_289 = arith.constant 0 : index
      %c0_290 = arith.constant 0 : index
      %660 = vector.load %arg32[%c0_289, %c0_290] : memref<2x32xf32, #tpu.memory_space<vmem>>, vector<2x32xf32>
      %661 = vector.extract_strided_slice %660 {offsets = [0, 0], sizes = [1, 32], strides = [1, 1]} : vector<2x32xf32> to vector<1x32xf32>
      %662 = vector.extract_strided_slice %660 {offsets = [1, 0], sizes = [1, 32], strides = [1, 1]} : vector<2x32xf32> to vector<1x32xf32>
      %cst_291 = arith.constant dense<0.000000e+00> : vector<16xf32>
      %663 = vector.multi_reduction <add>, %659, %cst_291 [1] : vector<16x32xf32> to vector<16xf32>
      %664 = vector.shape_cast %663 : vector<16xf32> to vector<16x1xf32>
      %cst_292 = arith.constant 3.200000e+01 : f32
      %665 = vector.broadcast %cst_292 : f32 to vector<16x1xf32>
      %666 = arith.divf %664, %665 : vector<16x1xf32>
      %667 = vector.broadcast %666 : vector<16x1xf32> to vector<16x32xf32>
      %668 = arith.subf %659, %667 : vector<16x32xf32>
      %669 = arith.mulf %668, %668 : vector<16x32xf32>
      %cst_293 = arith.constant dense<0.000000e+00> : vector<16xf32>
      %670 = vector.multi_reduction <add>, %669, %cst_293 [1] : vector<16x32xf32> to vector<16xf32>
      %671 = vector.shape_cast %670 : vector<16xf32> to vector<16x1xf32>
      %cst_294 = arith.constant 0.0322580636 : f32
      %672 = vector.broadcast %cst_294 : f32 to vector<16x1xf32>
      %673 = arith.mulf %671, %672 : vector<16x1xf32>
      %674 = math.sqrt %673 : vector<16x1xf32>
      %cst_295 = arith.constant 9.99999997E-7 : f32
      %675 = vector.broadcast %cst_295 : f32 to vector<16x1xf32>
      %676 = arith.addf %674, %675 : vector<16x1xf32>
      %677 = tpu.reciprocal %676 {approx = true} : vector<16x1xf32> -> vector<16x1xf32>
      %678 = vector.broadcast %661 : vector<1x32xf32> to vector<16x32xf32>
      %679 = arith.mulf %678, %668 : vector<16x32xf32>
      %680 = vector.broadcast %677 : vector<16x1xf32> to vector<16x32xf32>
      %681 = arith.mulf %679, %680 : vector<16x32xf32>
      %682 = vector.broadcast %662 : vector<1x32xf32> to vector<16x32xf32>
      %683 = arith.addf %681, %682 : vector<16x32xf32>
      %c0_296 = arith.constant 0 : index
      %c0_297 = arith.constant 0 : index
      %c0_298 = arith.constant 0 : index
      %684 = vector.load %arg33[%c0_296, %c0_297, %c0_298] : memref<1x16x32xf32, #tpu.memory_space<vmem>>, vector<1x16x32xf32>
      %685 = vector.shape_cast %684 : vector<1x16x32xf32> to vector<16x32xf32>
      %686 = vector.shape_cast %683 : vector<16x32xf32> to vector<1x16x32xf32>
      tpu.vector_store %arg33[%c0_296, %c0_297, %c0_298], %686 {strides = array<i32>} : memref<1x16x32xf32, #tpu.memory_space<vmem>>, vector<1x16x32xf32>,
    } else {
    }
    return
  }
  func.func @transform_0(%arg0: i32) -> (i32, i32, i32) {
    %c0_i32 = arith.constant 0 : i32
    %c0_i32_0 = arith.constant 0 : i32
    %c0_i32_1 = arith.constant 0 : i32
    return %arg0, %c0_i32, %c0_i32_0 : i32, i32, i32
  }
  func.func @transform_1(%arg0: i32) -> (i32, i32, i32) {
    %c0_i32 = arith.constant 0 : i32
    %c0_i32_0 = arith.constant 0 : i32
    %c0_i32_1 = arith.constant 0 : i32
    return %arg0, %c0_i32, %c0_i32_0 : i32, i32, i32
  }
  func.func @transform_2(%arg0: i32) -> (i32, i32, i32, i32) {
    %c0_i32 = arith.constant 0 : i32
    %c0_i32_0 = arith.constant 0 : i32
    %c0_i32_1 = arith.constant 0 : i32
    %c0_i32_2 = arith.constant 0 : i32
    return %arg0, %c0_i32, %c0_i32_0, %c0_i32_1 : i32, i32, i32, i32
  }
  func.func @transform_3(%arg0: i32) -> (i32, i32, i32, i32) {
    %c0_i32 = arith.constant 0 : i32
    %c0_i32_0 = arith.constant 0 : i32
    %c0_i32_1 = arith.constant 0 : i32
    %c0_i32_2 = arith.constant 0 : i32
    return %arg0, %c0_i32, %c0_i32_0, %c0_i32_1 : i32, i32, i32, i32
  }
  func.func @transform_4(%arg0: i32) -> (i32, i32, i32, i32) {
    %c0_i32 = arith.constant 0 : i32
    %c0_i32_0 = arith.constant 0 : i32
    %c0_i32_1 = arith.constant 0 : i32
    %c0_i32_2 = arith.constant 0 : i32
    return %arg0, %c0_i32, %c0_i32_0, %c0_i32_1 : i32, i32, i32, i32
  }
  func.func @transform_5(%arg0: i32) -> (i32, i32, i32, i32) {
    %c0_i32 = arith.constant 0 : i32
    %c0_i32_0 = arith.constant 0 : i32
    %c0_i32_1 = arith.constant 0 : i32
    %c0_i32_2 = arith.constant 0 : i32
    return %arg0, %c0_i32, %c0_i32_0, %c0_i32_1 : i32, i32, i32, i32
  }
  func.func @transform_6(%arg0: i32) -> (i32, i32, i32, i32) {
    %c0_i32 = arith.constant 0 : i32
    %c0_i32_0 = arith.constant 0 : i32
    %c0_i32_1 = arith.constant 0 : i32
    %c0_i32_2 = arith.constant 0 : i32
    return %arg0, %c0_i32, %c0_i32_0, %c0_i32_1 : i32, i32, i32, i32
  }
  func.func @transform_7(%arg0: i32) -> (i32, i32, i32, i32) {
    %c0_i32 = arith.constant 0 : i32
    %c0_i32_0 = arith.constant 0 : i32
    %c0_i32_1 = arith.constant 0 : i32
    %c0_i32_2 = arith.constant 0 : i32
    return %arg0, %c0_i32, %c0_i32_0, %c0_i32_1 : i32, i32, i32, i32
  }
  func.func @transform_8(%arg0: i32) -> (i32, i32, i32, i32) {
    %c0_i32 = arith.constant 0 : i32
    %c0_i32_0 = arith.constant 0 : i32
    %c0_i32_1 = arith.constant 0 : i32
    %c0_i32_2 = arith.constant 0 : i32
    return %arg0, %c0_i32, %c0_i32_0, %c0_i32_1 : i32, i32, i32, i32
  }
  func.func @transform_9(%arg0: i32) -> (i32, i32, i32, i32) {
    %c0_i32 = arith.constant 0 : i32
    %c0_i32_0 = arith.constant 0 : i32
    %c0_i32_1 = arith.constant 0 : i32
    %c0_i32_2 = arith.constant 0 : i32
    return %arg0, %c0_i32, %c0_i32_0, %c0_i32_1 : i32, i32, i32, i32
  }
  func.func @transform_10(%arg0: i32) -> (i32, i32, i32, i32) {
    %c0_i32 = arith.constant 0 : i32
    %c0_i32_0 = arith.constant 0 : i32
    %c0_i32_1 = arith.constant 0 : i32
    %c0_i32_2 = arith.constant 0 : i32
    return %arg0, %c0_i32, %c0_i32_0, %c0_i32_1 : i32, i32, i32, i32
  }
  func.func @transform_11(%arg0: i32) -> (i32, i32, i32) {
    %c0_i32 = arith.constant 0 : i32
    %c0_i32_0 = arith.constant 0 : i32
    %c0_i32_1 = arith.constant 0 : i32
    return %arg0, %c0_i32, %c0_i32_0 : i32, i32, i32
  }
  func.func @transform_12(%arg0: i32) -> (i32, i32) {
    %c0_i32 = arith.constant 0 : i32
    %c0_i32_0 = arith.constant 0 : i32
    %c0_i32_1 = arith.constant 0 : i32
    return %c0_i32, %c0_i32_0 : i32, i32
  }
  func.func @transform_13(%arg0: i32) -> (i32, i32) {
    %c0_i32 = arith.constant 0 : i32
    %c0_i32_0 = arith.constant 0 : i32
    %c0_i32_1 = arith.constant 0 : i32
    return %c0_i32, %c0_i32_0 : i32, i32
  }
  func.func @transform_14(%arg0: i32) -> (i32, i32) {
    %c0_i32 = arith.constant 0 : i32
    %c0_i32_0 = arith.constant 0 : i32
    %c0_i32_1 = arith.constant 0 : i32
    return %c0_i32, %c0_i32_0 : i32, i32
  }
  func.func @transform_15(%arg0: i32) -> (i32, i32) {
    %c0_i32 = arith.constant 0 : i32
    %c0_i32_0 = arith.constant 0 : i32
    %c0_i32_1 = arith.constant 0 : i32
    return %c0_i32, %c0_i32_0 : i32, i32
  }
  func.func @transform_16(%arg0: i32) -> (i32, i32, i32) {
    %c0_i32 = arith.constant 0 : i32
    %c0_i32_0 = arith.constant 0 : i32
    %c0_i32_1 = arith.constant 0 : i32
    %c0_i32_2 = arith.constant 0 : i32
    return %c0_i32, %c0_i32_0, %c0_i32_1 : i32, i32, i32
  }
  func.func @transform_17(%arg0: i32) -> (i32, i32, i32) {
    %c0_i32 = arith.constant 0 : i32
    %c0_i32_0 = arith.constant 0 : i32
    %c0_i32_1 = arith.constant 0 : i32
    %c0_i32_2 = arith.constant 0 : i32
    return %c0_i32, %c0_i32_0, %c0_i32_1 : i32, i32, i32
  }
  func.func @transform_18(%arg0: i32) -> (i32, i32, i32) {
    %c0_i32 = arith.constant 0 : i32
    %c0_i32_0 = arith.constant 0 : i32
    %c0_i32_1 = arith.constant 0 : i32
    %c0_i32_2 = arith.constant 0 : i32
    return %c0_i32, %c0_i32_0, %c0_i32_1 : i32, i32, i32
  }
  func.func @transform_19(%arg0: i32) -> (i32, i32, i32) {
    %c0_i32 = arith.constant 0 : i32
    %c0_i32_0 = arith.constant 0 : i32
    %c0_i32_1 = arith.constant 0 : i32
    %c0_i32_2 = arith.constant 0 : i32
    return %c0_i32, %c0_i32_0, %c0_i32_1 : i32, i32, i32
  }
  func.func @transform_20(%arg0: i32) -> (i32, i32, i32) {
    %c0_i32 = arith.constant 0 : i32
    %c0_i32_0 = arith.constant 0 : i32
    %c0_i32_1 = arith.constant 0 : i32
    %c0_i32_2 = arith.constant 0 : i32
    return %c0_i32, %c0_i32_0, %c0_i32_1 : i32, i32, i32
  }
  func.func @transform_21(%arg0: i32) -> (i32, i32, i32) {
    %c0_i32 = arith.constant 0 : i32
    %c0_i32_0 = arith.constant 0 : i32
    %c0_i32_1 = arith.constant 0 : i32
    %c0_i32_2 = arith.constant 0 : i32
    return %c0_i32, %c0_i32_0, %c0_i32_1 : i32, i32, i32
  }
  func.func @transform_22(%arg0: i32) -> (i32, i32, i32) {
    %c0_i32 = arith.constant 0 : i32
    %c0_i32_0 = arith.constant 0 : i32
    %c0_i32_1 = arith.constant 0 : i32
    %c0_i32_2 = arith.constant 0 : i32
    return %c0_i32, %c0_i32_0, %c0_i32_1 : i32, i32, i32
  }
  func.func @transform_23(%arg0: i32) -> (i32, i32, i32) {
    %c0_i32 = arith.constant 0 : i32
    %c0_i32_0 = arith.constant 0 : i32
    %c0_i32_1 = arith.constant 0 : i32
    %c0_i32_2 = arith.constant 0 : i32
    return %c0_i32, %c0_i32_0, %c0_i32_1 : i32, i32, i32
  }
  func.func @transform_24(%arg0: i32) -> (i32, i32, i32) {
    %c0_i32 = arith.constant 0 : i32
    %c0_i32_0 = arith.constant 0 : i32
    %c0_i32_1 = arith.constant 0 : i32
    %c0_i32_2 = arith.constant 0 : i32
    return %c0_i32, %c0_i32_0, %c0_i32_1 : i32, i32, i32
  }
  func.func @transform_25(%arg0: i32) -> (i32, i32, i32) {
    %c0_i32 = arith.constant 0 : i32
    %c0_i32_0 = arith.constant 0 : i32
    %c0_i32_1 = arith.constant 0 : i32
    %c0_i32_2 = arith.constant 0 : i32
    return %c0_i32, %c0_i32_0, %c0_i32_1 : i32, i32, i32
  }
  func.func @transform_26(%arg0: i32) -> (i32, i32, i32) {
    %c0_i32 = arith.constant 0 : i32
    %c0_i32_0 = arith.constant 0 : i32
    %c0_i32_1 = arith.constant 0 : i32
    %c0_i32_2 = arith.constant 0 : i32
    return %c0_i32, %c0_i32_0, %c0_i32_1 : i32, i32, i32
  }
  func.func @transform_27(%arg0: i32) -> (i32, i32, i32) {
    %c0_i32 = arith.constant 0 : i32
    %c0_i32_0 = arith.constant 0 : i32
    %c0_i32_1 = arith.constant 0 : i32
    %c0_i32_2 = arith.constant 0 : i32
    return %c0_i32, %c0_i32_0, %c0_i32_1 : i32, i32, i32
  }
  func.func @transform_28(%arg0: i32) -> (i32, i32, i32) {
    %c0_i32 = arith.constant 0 : i32
    %c0_i32_0 = arith.constant 0 : i32
    %c0_i32_1 = arith.constant 0 : i32
    %c0_i32_2 = arith.constant 0 : i32
    return %c0_i32, %c0_i32_0, %c0_i32_1 : i32, i32, i32
  }
  func.func @transform_29(%arg0: i32) -> (i32, i32, i32) {
    %c0_i32 = arith.constant 0 : i32
    %c0_i32_0 = arith.constant 0 : i32
    %c0_i32_1 = arith.constant 0 : i32
    %c0_i32_2 = arith.constant 0 : i32
    return %c0_i32, %c0_i32_0, %c0_i32_1 : i32, i32, i32
  }
  func.func @transform_30(%arg0: i32) -> (i32, i32, i32) {
    %c0_i32 = arith.constant 0 : i32
    %c0_i32_0 = arith.constant 0 : i32
    %c0_i32_1 = arith.constant 0 : i32
    %c0_i32_2 = arith.constant 0 : i32
    return %c0_i32, %c0_i32_0, %c0_i32_1 : i32, i32, i32
  }
  func.func @transform_31(%arg0: i32) -> (i32, i32) {
    %c0_i32 = arith.constant 0 : i32
    %c0_i32_0 = arith.constant 0 : i32
    %c0_i32_1 = arith.constant 0 : i32
    return %c0_i32, %c0_i32_0 : i32, i32
  }
  func.func @transform_32(%arg0: i32) -> (i32, i32, i32) {
    %c0_i32 = arith.constant 0 : i32
    %c0_i32_0 = arith.constant 0 : i32
    %c0_i32_1 = arith.constant 0 : i32
    return %arg0, %c0_i32, %c0_i32_0 : i32, i32, i32
  }
}

</mosaic_0001>

<bundles_post_ra>
// kernel: three_tower_forward.1
= control target key start
LH: loop header
LB: loop body
LE: loop exit
PB: predicated region body
PF: predicated region fallthrough
CT: control target
= control target key end

     0   :  { %s5280_s6 = smov 1   ;;  %s5281_s10 = smov 2   ;;  %s6261_s0 = inlined_call_operand.smem [shape: u32[33], index: -1, kind: input, shape index: {}] }
   0x1   :  { %s5325_s5 = sld [smem:[%s6261_s0]]   ;;  %s5282_s14 = smov 3  }
   0x2   :  { %s5330_s9 = sld [smem:[%s6261_s0 + %s5280_s6]]   ;;  %s5283_s18 = smov 4  }
   0x3   :  { %s5335_s13 = sld [smem:[%s6261_s0 + %s5281_s10]]   ;;  %s5284_s22 = smov 5  }
   0x4   :  { %s5340_s17 = sld [smem:[%s6261_s0 + %s5282_s14]]   ;;  %s5285_s26 = smov 6  }
   0x5   :  { %s5345_s21 = sld [smem:[%s6261_s0 + %s5283_s18]]   ;;  %s5286_s30 = smov 7  }
   0x6   :  { %s5350_s25 = sld [smem:[%s6261_s0 + %s5284_s22]]   ;;  %s5287_s4 = smov 8  }
   0x7   :  { %6285 = sst [smem:[#allocation2_spill]] %s5325_s5  ;;  %s5288_s10 = smov 9  }
   0x8   :  { %6286 = sst [smem:[#allocation3_spill]] %s5330_s9  ;;  %s5289_s15 = smov 10  }
   0x9   :  { %s5355_s29 = sld [smem:[%s6261_s0 + %s5285_s26]]   ;;  %s5290_s20 = smov 11  }
   0xa   :  { %s5360_s3 = sld [smem:[%s6261_s0 + %s5286_s30]]   ;;  %s5291_s26 = smov 12  }
   0xb   :  { %s5365_s8 = sld [smem:[%s6261_s0 + %s5287_s4]]   ;;  %s5292_s1 = smov 13  }
   0xc   :  { %s5370_s14 = sld [smem:[%s6261_s0 + %s5288_s10]]   ;;  %s5293_s7 = smov 14  }
   0xd   :  { %s5375_s19 = sld [smem:[%s6261_s0 + %s5289_s15]]   ;;  %s5294_s15 = smov 15  }
   0xe   :  { %s5380_s24 = sld [smem:[%s6261_s0 + %s5290_s20]]   ;;  %s5295_s22 = smov 16  }
   0xf   :  { %s5385_s30 = sld [smem:[%s6261_s0 + %s5291_s26]]   ;;  %s5296_s28 = smov 17  }
  0x10   :  { %6287 = sst [smem:[#allocation4_spill]] %s5360_s3 }
  0x11   :  { %6288 = sst [smem:[#allocation5_spill]] %s5365_s8 }
  0x12   :  { %s5390_s6 = sld [smem:[%s6261_s0 + %s5292_s1]]  }
  0x13   :  { %s5395_s12 = sld [smem:[%s6261_s0 + %s5293_s7]]   ;;  %s5297_s7 = smov 18  }
  0x14   :  { %s5400_s20 = sld [smem:[%s6261_s0 + %s5294_s15]]   ;;  %s5298_s15 = smov 19  }
  0x15   :  { %s5405_s27 = sld [smem:[%s6261_s0 + %s5295_s22]]   ;;  %s5299_s22 = smov 20  }
  0x16   :  { %s5410_s4 = sld [smem:[%s6261_s0 + %s5296_s28]]   ;;  %s5300_s28 = smov 21  }
  0x18   :  { %6289 = sst [smem:[#allocation6_spill]] %s5390_s6 }
  0x19   :  { %6290 = sst [smem:[#allocation7_spill]] %s5395_s12 }
  0x1a   :  { %6291 = sst [smem:[#allocation8_spill]] %s5400_s20 }
  0x1b   :  { %6292 = sst [smem:[#allocation9_spill]] %s5405_s27 }
  0x1c   :  { %6293 = sst [smem:[#allocation10_spill]] %s5410_s4 }
  0x1d   :  { %s5415_s12 = sld [smem:[%s6261_s0 + %s5297_s7]]   ;;  %s5301_s7 = smov 22  }
  0x1e   :  { %s5420_s20 = sld [smem:[%s6261_s0 + %s5298_s15]]   ;;  %s5302_s15 = smov 23  }
  0x1f   :  { %s5425_s27 = sld [smem:[%s6261_s0 + %s5299_s22]]   ;;  %s5303_s22 = smov 24  }
  0x20   :  { %s5430_s4 = sld [smem:[%s6261_s0 + %s5300_s28]]   ;;  %s5304_s28 = smov 25  }
  0x23   :  { %6294 = sst [smem:[#allocation11_spill]] %s5415_s12 }
  0x24   :  { %6295 = sst [smem:[#allocation12_spill]] %s5420_s20 }
  0x25   :  { %6296 = sst [smem:[#allocation13_spill]] %s5425_s27 }
  0x26   :  { %6297 = sst [smem:[#allocation14_spill]] %s5430_s4 }
  0x27   :  { %s5435_s12 = sld [smem:[%s6261_s0 + %s5301_s7]]   ;;  %s5305_s7 = smov 26  }
  0x28   :  { %s5440_s20 = sld [smem:[%s6261_s0 + %s5302_s15]]   ;;  %s5306_s15 = smov 27  }
  0x29   :  { %s5445_s27 = sld [smem:[%s6261_s0 + %s5303_s22]]   ;;  %s5307_s22 = smov 28  }
  0x2a   :  { %s5450_s4 = sld [smem:[%s6261_s0 + %s5304_s28]]   ;;  %s5308_s28 = smov 29  }
  0x2d   :  { %6298 = sst [smem:[#allocation15_spill]] %s5435_s12 }
  0x2e   :  { %6299 = sst [smem:[#allocation16_spill]] %s5440_s20 }
  0x2f   :  { %6300 = sst [smem:[#allocation17_spill]] %s5445_s27 }
  0x30   :  { %6301 = sst [smem:[#allocation18_spill]] %s5450_s4 }
  0x31   :  { %s5455_s12 = sld [smem:[%s6261_s0 + %s5305_s7]]   ;;  %s5309_s7 = smov 30  }
  0x32   :  { %s5460_s20 = sld [smem:[%s6261_s0 + %s5306_s15]]   ;;  %s5310_s15 = smov 31  }
  0x33   :  { %s5465_s27 = sld [smem:[%s6261_s0 + %s5307_s22]]   ;;  %s5311_s22 = smov 32  }
  0x34   :  { %s5470_s4 = sld [smem:[%s6261_s0 + %s5308_s28]]   ;;  %s5487_s28 = smov 0  }
  0x37   :  { %6302 = sst [smem:[#allocation19_spill]] %s5455_s12 }
  0x38   :  { %6303 = sst [smem:[#allocation20_spill]] %s5460_s20 }
  0x39   :  { %6304 = sst [smem:[#allocation21_spill]] %s5465_s27 }
  0x3a   :  { %s5475_s12 = sld [smem:[%s6261_s0 + %s5309_s7]]  }
  0x3b   :  { %s5480_s20 = sld [smem:[%s6261_s0 + %s5310_s15]]  }
  0x3c   :  { %s5485_s27 = sld [smem:[%s6261_s0 + %s5311_s22]]  }
  0x3d LB: > { %s6305_s6 = sld [smem:[#allocation6_spill]]  ;;  %s5493_s1 = sadd.s32 4294967295, %s5278_s28   ;;  %s5278_s28 = sphi %s5487_s28, %s75_s28  }
  0x3e   : > { %p4460_p0 = scmp.ge.s32.totalorder %s5278_s28, 1  ;;  %p1000_p1 = scmp.lt.s32.totalorder %s5278_s28, 3 }
  0x40   : > { %p1001_p2 = pnand %p4460_p0, %p1000_p1 }
  0x41   : > { %s6306_s5 = sld [smem:[#allocation2_spill]] (!%p1001_p2)  ;;  %p1132_p3 = scmp.lt.s32.totalorder (!%p1001_p2), %s5493_s1, 1 }
  0x42   : > { %1004 = sbr.rel (%p1001_p2) target bundleno = 10272 (0x2820), region = 148  ;;  %s6307_s9 = sld [smem:[#allocation3_spill]] (!%p1001_p2) }
  0x43   : > { %s6278_s26 = smov (!%p1001_p2), 96   ;;  %s6308_s3 = sld [smem:[#allocation4_spill]] (!%p1001_p2) }
  0x44   : > { %s6309_s8 = sld [smem:[#allocation5_spill]] (!%p1001_p2)  ;;  %p4611_p4 = scmp.ne.s32.totalorder (!%p1001_p2), %s5493_s1, 1 }
  0x47   : > { %s5499_s0 = scalar_select %p1132_p3, %s5493_s1, 1  ;;  %vm1212_vm0 = vcmask 261120   ;;  %v5312_v4 = vmov 32.0   ;;  %vm1395_vm6 = vcmask 130048   ;;  %vm1710_vm11 = vcmask 523264  }
  0x48   : > { %4942 = vrcp.f32 %v5312_v4  ;;  %v5556_v4 = vld [vmem:[%s5385_s30 + $0x20] sm:$0xff] }
  0x49   : > { %s4829_s2 = sshll.u32 %s5499_s0, 4  ;;  %s5523_s11 = sshll.u32 %s5499_s0, 1 }
  0x4a   : > { %s1136_s7 = scalar_lea.vmem %s6306_s5, %s4829_s2  ;;  %s5504_s10 = scalar_lea.vmem %s5485_s27, %s4829_s2 }
  0x4b   : > { %v5506_v0 = vld [vmem:[%s1136_s7] sm:$0xff]  ;;  %v5510_v2 = vld [vmem:[%s1136_s7 + $0x8] sm:$0xff]  ;;  %s5527_s15 = scalar_lea.vmem %s5340_s17, %s5523_s11  ;;  %s5530_s16 = sshll.u32 %s5499_s0, 5 }
  0x4c   : > { %v1213_v1 = vsel %vm1212_vm0, %v5506_v0, 0.0  ;;  %v1216_v3 = vsel %vm1212_vm0, %v5510_v2, 0.0  ;;  %s5534_s18 = scalar_lea.vmem %s5335_s13, %s5530_s16  ;;  %s4835_s22 = sshll.u32 %s5499_s0, 3  ;;  %v4934_v62 = vld [vmem:[%s5527_s15] ss:$0 sm:$0xff] }
  0x4d   : > { %1214 = vadd.xlane.f32.xlu0 %v1213_v1  ;;  %v4838_v21 = vld [vmem:[%s5534_s18 + $0x8] sm:$0xff]  ;;  %v4837_v22 = vld [vmem:[%s5534_s18] sm:$0xff]  ;;  %s5540_s23 = scalar_lea.vmem %s5375_s19, %s4835_s22  ;;  %s6279_s2 = sshll.u32 %s5499_s0, 6 }
  0x4e   : > { %v4943_v5 = vpop.eup %4942  ;;  %1306 = vmatpush.bf16.msra.mxu1 %v4838_v21  ;;  %v5543_v46 = vld [vmem:[%s5540_s23] sm:$0xf]  ;;  %s5594_s7 = scalar_lea.vmem %s6307_s9, %s6279_s2  ;;  %s6277_s22 = smov 64  }
  0x4f   : > { %v1220_v6 = vmul.f32 32.0, %v4943_v5  ;;  %vm1224_vm1 = vweird.f32 %v4943_v5  ;;  %v1268_v50 = vperm.slane %v5543_v46, 0  ;;  %v1273_v55 = vperm.slane %v5543_v46, 1  ;;  %v5550_v1 = vld [vmem:[%s5385_s30] sm:$0xff]  ;;  %s5692_s2 = scalar_lea.vmem %s5355_s29, %s5530_s16 }
  0x51   : > { %v1221_v7 = vsub.f32 1.0, %v1220_v6  ;;  %v5559_v6 = vld [vmem:[%s5385_s30 + $0x8] sm:$0xff] }
  0x52   : > { %1307 = vmatpush.bf16.msra.mxu1 %v4837_v22 }
  0x53   : > { %v1222_v8 = vmul.f32 %v4943_v5, %v1221_v7  ;;  %v5562_v7 = vld [vmem:[%s5385_s30 + $0x18] sm:$0xff] }
  0x55   : > { %1217 = vadd.xlane.f32.xlu0 %v1216_v3  ;;  %v1223_v9 = vadd.f32 %v4943_v5, %v1222_v8  ;;  %v5553_v3 = vld [vmem:[%s5385_s30 + $0x10] sm:$0xff]  ;;  %v5565_v8 = vld [vmem:[%s5385_s30 + $0x28] sm:$0xff] }
  0x57   : > { %v5514_v10 = vsel %vm1224_vm1, %v4943_v5, %v1223_v9 }
  0xc0   : > { %v1215_v11 = vpop.xlane.xlu0 %1214 }
  0xc1   : > { %v1226_v12 = vmul.f32 %v5514_v10, %v1215_v11  ;;  %v5568_v11 = vld [vmem:[%s5385_s30 + $0x30] sm:$0xff] }
  0xc3   : > { %v1228_v13 = vsub.f32 %v5506_v0, %v1226_v12  ;;  %v5571_v12 = vld [vmem:[%s5385_s30 + $0x38] sm:$0xff] }
  0xc5   : > { %v1230_v14 = vmul.f32 %v1228_v13, %v1228_v13  ;;  %v1269_v52 = vmul.f32 %v1268_v50, %v1228_v13 }
  0xc7   : > { %v1232_v15 = vsel %vm1212_vm0, %v1230_v14, 0.0 }
  0xc8   : > { %1233 = vadd.xlane.f32.xlu1 %v1232_v15  ;;  %v1218_v16 = vpop.xlane.xlu0 %1217 }
  0xc9   : > { %v1227_v17 = vmul.f32 %v5514_v10, %v1218_v16 }
  0xcb   : > { %v1229_v18 = vsub.f32 %v5510_v2, %v1227_v17 }
  0xcd   : > { %v1231_v19 = vmul.f32 %v1229_v18, %v1229_v18  ;;  %v1270_v53 = vmul.f32 %v1268_v50, %v1229_v18  ;;  %v5617_v50 = vld [vmem:[%s5594_s7 + $0x20] sm:$0xff] }
  0xcf   : > { %v1235_v20 = vsel %vm1212_vm0, %v1231_v19, 0.0 }
  0xd0   : > { %1236 = vadd.xlane.f32.xlu1 %v1235_v20 }
 0x13b   : > { %v1234_v23 = vpop.xlane.xlu1 %1233 }
 0x13c   : > { %v1238_v24 = vmul.f32 0.032258064, %v1234_v23 }
 0x13e   : > { %4944 = vrsqrt.f32 %v1238_v24  ;;  %vm1247_vm2 = vcmp.eq.f32.partialorder %v1238_v24, inf  ;;  %v1250_v37 = vand.u32 2147483648, %v1238_v24  ;;  %vm1249_vm3 = vcmp.eq.f32.partialorder %v1238_v24, 0.0 }
 0x143   : > { %v1237_v25 = vpop.xlane.xlu1 %1236 }
 0x144   : > { %v4945_v26 = vpop.eup %4944  ;;  %v1239_v27 = vmul.f32 0.032258064, %v1237_v25 }
 0x145   : > { %v1241_v28 = vmul.f32 %v4945_v26, %v1238_v24 }
 0x146   : > { %4946 = vrsqrt.f32 %v1239_v27  ;;  %vm1259_vm4 = vcmp.eq.f32.partialorder %v1239_v27, inf  ;;  %v1262_v45 = vand.u32 2147483648, %v1239_v27  ;;  %vm1261_vm5 = vcmp.eq.f32.partialorder %v1239_v27, 0.0 }
 0x147   : > { %v1242_v29 = vmul.f32 %v4945_v26, %v1241_v28 }
 0x149   : > { %v1243_v30 = vmul.f32 0.5, %v1242_v29  ;;  %v5597_v29 = vld [vmem:[%s5594_s7] sm:$0xff] }
 0x14b   : > { %v1244_v31 = vsub.f32 1.5, %v1243_v30 }
 0x14c   : > { %v4947_v32 = vpop.eup %4946 }
 0x14d   : > { %v1253_v33 = vmul.f32 %v4947_v32, %v1239_v27  ;;  %v1245_v34 = vmul.f32 %v4945_v26, %v1244_v31 }
 0x14f   : > { %v1254_v35 = vmul.f32 %v4947_v32, %v1253_v33  ;;  %v1246_v36 = vmul.f32 %v1245_v34, %v1238_v24  ;;  %v5602_v34 = vld [vmem:[%s5594_s7 + $0x8] sm:$0xff] }
 0x151   : > { %v1248_v38 = vsel %vm1247_vm2, %v1238_v24, %v1246_v36  ;;  %v1255_v39 = vmul.f32 0.5, %v1254_v35 }
 0x152   : > { %v1251_v40 = vsel %vm1249_vm3, %v1250_v37, %v1248_v38 }
 0x153   : > { %v1256_v41 = vsub.f32 1.5, %v1255_v39  ;;  %v1264_v43 = vadd.f32 1e-06, %v1251_v40  ;;  %v5607_v39 = vld [vmem:[%s5594_s7 + $0x10] sm:$0xff] }
 0x155   : > { %v1257_v42 = vmul.f32 %v4947_v32, %v1256_v41  ;;  %4948 = vrcp.f32 %v1264_v43 }
 0x157   : > { %v1258_v44 = vmul.f32 %v1257_v42, %v1239_v27 }
 0x159   : > { %v1260_v47 = vsel %vm1259_vm4, %v1239_v27, %v1258_v44  ;;  %v5612_v44 = vld [vmem:[%s5594_s7 + $0x18] sm:$0xff] }
 0x15a   : > { %v1263_v48 = vsel %vm1261_vm5, %v1262_v45, %v1260_v47 }
 0x15b   : > { %v1265_v49 = vadd.f32 1e-06, %v1263_v48  ;;  %v4949_v51 = vpop.eup %4948 }
 0x15c   : > { %v1271_v54 = vmul.f32 %v4949_v51, %v1269_v52 }
 0x15d   : > { %4950 = vrcp.f32 %v1265_v49 }
 0x15e   : > { %v1274_v58 = vadd.f32 %v1273_v55, %v1271_v54 }
 0x163   : > { %v4951_v56 = vpop.eup %4950 }
 0x164   : > { %v1272_v57 = vmul.f32 %v4951_v56, %v1270_v53 }
 0x166   : > { %v1275_v59 = vadd.f32 %v1273_v55, %v1272_v57  ;;  %v5622_v55 = vld [vmem:[%s5594_s7 + $0x28] sm:$0xff] }
 0x168   : > { %v1276_v60 = vpack.c.bf16 %v1275_v59, %v1274_v58 }
 0x16a   : > { %4490 = vmatmul.msk.bf16.vlgmr.msra.gmra.mxu1 %vm1212_vm0, %v1276_v60  ;;  %v5627_v60 = vld [vmem:[%s5594_s7 + $0x30] sm:$0xff] }
 0x1e7   : > { %v1309_v61 = vpop.f32.mrf.mxu1 }
 0x1e8   : > { %v1310_v63 = vadd.f32 %v4934_v62, %v1309_v61 }
 0x1ea   : > { %v1319_v13 = vmul.f32 %v1310_v63, %v5550_v1  ;;  %v1321_v14 = vmul.f32 %v1310_v63, %v5553_v3  ;;  %v1323_v15 = vmul.f32 %v1310_v63, %v5556_v4  ;;  %v1325_v20 = vmul.f32 %v1310_v63, %v5568_v11 }
 0x1ef   : > { %v1311_v5 = vpop.f32.mrf.mxu1 }
 0x1f0   : > { %v1312_v9 = vadd.f32 %v4934_v62, %v1311_v5 }
 0x1f2   : > { %v5576_v16 = vpack.c.bf16 %v1312_v9, %v1310_v63  ;;  %v1320_v17 = vmul.f32 %v1312_v9, %v5559_v6  ;;  %v1322_v18 = vmul.f32 %v1312_v9, %v5562_v7  ;;  %v1324_v19 = vmul.f32 %v1312_v9, %v5565_v8 }
 0x1f3   : > { %v1326_v21 = vmul.f32 %v1312_v9, %v5571_v12  ;;  %v5632_v9 = vld [vmem:[%s5594_s7 + $0x38] sm:$0xff]  ;;  %s5652_s7 = scalar_lea.vmem %s5350_s25, %s5523_s11 }
 0x1f4   : > { %1333 = vrot.lane.b32.xlu2 %v5576_v16, %s6278_s26  ;;  %v1327_v22 = vpack.c.bf16 %v1320_v17, %v1319_v13  ;;  %v1328_v23 = vpack.c.bf16 %v1322_v18, %v1321_v14  ;;  %v1329_v24 = vpack.c.bf16 %v1324_v19, %v1323_v15  ;;  %s5688_s26 = scalar_lea.vmem %s6308_s3, %s5523_s11  ;;  %s6310_s3 = sshll.u32 %s5499_s0, 6 }
 0x1f5   : > { %v1330_v25 = vpack.c.bf16 %v1326_v21, %v1325_v20  ;;  %s5706_s5 = scalar_lea.vmem %s6309_s8, %s6310_s3  ;;  %s6311_s3 = smov 96  }
 0x1f6   : > { %s6312_s0 = smov 64  }
 0x24e   : > { %v1334_v26 = vpop.permute.xlu2 %1333 }
 0x24f   : > { %v1348_v27 = vsel %vm1212_vm0, %v1334_v26, 0 }
 0x250   : > { %1357 = vmatpush.bf16.xpose.msrb.mxu1 %v1348_v27 }
 0x257   : > { %4491 = vmatmul.msk.bf16.vlgmr.msrb.gmra.mxu1 %vm1212_vm0, %v1327_v22 }
 0x267   : > { %4492 = vmatmul.msk.bf16.gmra.mxu1 %vm1212_vm0, %v1328_v23 }
 0x277   : > { %4493 = vmatmul.msk.bf16.gmra.mxu1 %vm1212_vm0, %v1329_v24 }
 0x287   : > { %4494 = vmatmul.msk.bf16.gmra.mxu1 %vm1212_vm0, %v1330_v25 }
 0x2d4   : > { %v1359_v28 = vpop.f32.mrf.mxu1 }
 0x2d5   : > { %v1379_v30 = vmul.f32 0.35355338, %v1359_v28 }
 0x2d7   : > { %v1387_v31 = vadd.f32 %v1379_v30, %v5597_v29 }
 0x2d9   : > { %v1396_v32 = vsel %vm1395_vm6, %v1387_v31, -inf }
 0x2da   : > { %1397 = vmax.xlane.f32.xlu2 %v1396_v32 }
 0x2dc   : > { %v1361_v33 = vpop.f32.mrf.mxu1 }
 0x2dd   : > { %v1380_v35 = vmul.f32 0.35355338, %v1361_v33 }
 0x2df   : > { %v1388_v36 = vadd.f32 %v1380_v35, %v5602_v34 }
 0x2e1   : > { %v1399_v37 = vsel %vm1395_vm6, %v1388_v36, -inf }
 0x2e2   : > { %1400 = vmax.xlane.f32.xlu0 %v1399_v37 }
 0x2e4   : > { %v1364_v38 = vpop.f32.mrf.mxu1 }
 0x2e5   : > { %v1381_v40 = vmul.f32 0.35355338, %v1364_v38 }
 0x2e7   : > { %v1389_v41 = vadd.f32 %v1381_v40, %v5607_v39 }
 0x2e9   : > { %v1402_v42 = vsel %vm1395_vm6, %v1389_v41, -inf }
 0x2ea   : > { %1403 = vmax.xlane.f32.xlu1 %v1402_v42 }
 0x2ec   : > { %v1366_v43 = vpop.f32.mrf.mxu1 }
 0x2ed   : > { %v1382_v45 = vmul.f32 0.35355338, %v1366_v43 }
 0x2ef   : > { %v1390_v47 = vadd.f32 %v1382_v45, %v5612_v44 }
 0x2f1   : > { %v1405_v48 = vsel %vm1395_vm6, %v1390_v47, -inf }
 0x2f2   : > { %1406 = vmax.xlane.f32.xlu0 %v1405_v48 }
 0x2f4   : > { %v1369_v49 = vpop.f32.mrf.mxu1 }
 0x2f5   : > { %v1383_v51 = vmul.f32 0.35355338, %v1369_v49 }
 0x2f7   : > { %v1391_v52 = vadd.f32 %v1383_v51, %v5617_v50 }
 0x2f9   : > { %v1408_v53 = vsel %vm1395_vm6, %v1391_v52, -inf }
 0x2fa   : > { %1409 = vmax.xlane.f32.xlu1 %v1408_v53 }
 0x2fc   : > { %v1371_v54 = vpop.f32.mrf.mxu1 }
 0x2fd   : > { %v1384_v56 = vmul.f32 0.35355338, %v1371_v54 }
 0x2ff   : > { %v1392_v57 = vadd.f32 %v1384_v56, %v5622_v55 }
 0x301   : > { %v1411_v58 = vsel %vm1395_vm6, %v1392_v57, -inf }
 0x302   : > { %1412 = vmax.xlane.f32.xlu0 %v1411_v58 }
 0x304   : > { %v1374_v59 = vpop.f32.mrf.mxu1 }
 0x305   : > { %v1385_v61 = vmul.f32 0.35355338, %v1374_v59 }
 0x307   : > { %v1393_v62 = vadd.f32 %v1385_v61, %v5627_v60 }
 0x309   : > { %v1414_v63 = vsel %vm1395_vm6, %v1393_v62, -inf }
 0x30a   : > { %1415 = vmax.xlane.f32.xlu1 %v1414_v63 }
 0x30c   : > { %v1376_v5 = vpop.f32.mrf.mxu1 }
 0x30d   : > { %v1386_v13 = vmul.f32 0.35355338, %v1376_v5 }
 0x30f   : > { %v1394_v14 = vadd.f32 %v1386_v13, %v5632_v9 }
 0x311   : > { %v1417_v15 = vsel %vm1395_vm6, %v1394_v14, -inf }
 0x312   : > { %1418 = vmax.xlane.f32.xlu0 %v1417_v15 }
 0x34d   : > { %v1398_v17 = vpop.xlane.xlu2 %1397 }
 0x34e   : > { %v1420_v18 = vsub.f32 %v1387_v31, %v1398_v17 }
 0x350   : > { %v1428_v19 = vmul.f32 1.442695, %v1420_v18 }
 0x352   : > { %4952 = vpow2.f32 %v1428_v19 }
 0x355   : > { %v1401_v20 = vpop.xlane.xlu0 %1400 }
 0x356   : > { %v1421_v21 = vsub.f32 %v1388_v36, %v1401_v20 }
 0x358   : > { %v4953_v22 = vpop.eup %4952  ;;  %v1430_v23 = vmul.f32 1.442695, %v1421_v21 }
 0x359   : > { %v1444_v24 = vsel %vm1395_vm6, %v4953_v22, 0.0 }
 0x35a   : > { %4954 = vpow2.f32 %v1430_v23  ;;  %1445 = vadd.xlane.f32.xlu1 %v1444_v24 }
 0x35d   : > { %v1404_v25 = vpop.xlane.xlu1 %1403 }
 0x35e   : > { %v1422_v26 = vsub.f32 %v1389_v41, %v1404_v25 }
 0x360   : > { %v4955_v27 = vpop.eup %4954  ;;  %v1432_v28 = vmul.f32 1.442695, %v1422_v26 }
 0x361   : > { %v1447_v30 = vsel %vm1395_vm6, %v4955_v27, 0.0 }
 0x362   : > { %4956 = vpow2.f32 %v1432_v28  ;;  %1448 = vadd.xlane.f32.xlu0 %v1447_v30 }
 0x365   : > { %v1407_v32 = vpop.xlane.xlu0 %1406 }
 0x366   : > { %v1423_v31 = vsub.f32 %v1390_v47, %v1407_v32 }
 0x368   : > { %v4957_v33 = vpop.eup %4956  ;;  %v1434_v35 = vmul.f32 1.442695, %v1423_v31 }
 0x369   : > { %v1450_v36 = vsel %vm1395_vm6, %v4957_v33, 0.0 }
 0x36a   : > { %4958 = vpow2.f32 %v1434_v35  ;;  %1451 = vadd.xlane.f32.xlu2 %v1450_v36 }
 0x36d   : > { %v1410_v37 = vpop.xlane.xlu1 %1409 }
 0x36e   : > { %v1424_v38 = vsub.f32 %v1391_v52, %v1410_v37 }
 0x370   : > { %v4959_v40 = vpop.eup %4958  ;;  %v1436_v42 = vmul.f32 1.442695, %v1424_v38 }
 0x371   : > { %v1453_v41 = vsel %vm1395_vm6, %v4959_v40, 0.0 }
 0x372   : > { %4960 = vpow2.f32 %v1436_v42  ;;  %1454 = vadd.xlane.f32.xlu0 %v1453_v41 }
 0x373   : > { %1488 = vrot.lane.b32.xlu1 %v5576_v16, %s6277_s22  ;;  %s5656_s22 = scalar_lea.vmem %s5345_s21, %s5530_s16  ;;  %s5701_s16 = scalar_lea.vmem %s5370_s14, %s5523_s11 }
 0x375   : > { %v1413_v43 = vpop.xlane.xlu0 %1412 }
 0x376   : > { %v1425_v45 = vsub.f32 %v1392_v57, %v1413_v43 }
 0x378   : > { %v4961_v47 = vpop.eup %4960  ;;  %v1438_v48 = vmul.f32 1.442695, %v1425_v45 }
 0x379   : > { %v1456_v49 = vsel %vm1395_vm6, %v4961_v47, 0.0 }
 0x37a   : > { %4962 = vpow2.f32 %v1438_v48  ;;  %1457 = vadd.xlane.f32.xlu2 %v1456_v49 }
 0x37d   : > { %v1416_v51 = vpop.xlane.xlu1 %1415 }
 0x37e   : > { %v1426_v52 = vsub.f32 %v1393_v62, %v1416_v51  ;;  %v4840_v51 = vld [vmem:[%s5656_s22 + $0x8] sm:$0xff] }
 0x37f   : > { %1571 = vmatpush.bf16.msra.mxu3 %v4840_v51 }
 0x380   : > { %v4963_v53 = vpop.eup %4962  ;;  %v1440_v54 = vmul.f32 1.442695, %v1426_v52 }
 0x381   : > { %v1459_v56 = vsel %vm1395_vm6, %v4963_v53, 0.0 }
 0x382   : > { %4964 = vpow2.f32 %v1440_v54  ;;  %1460 = vadd.xlane.f32.xlu0 %v1459_v56 }
 0x385   : > { %v1419_v58 = vpop.xlane.xlu0 %1418 }
 0x386   : > { %v1427_v59 = vsub.f32 %v1394_v14, %v1419_v58 }
 0x388   : > { %v4965_v61 = vpop.eup %4964  ;;  %v1442_v16 = vmul.f32 1.442695, %v1427_v59 }
 0x389   : > { %v1462_v57 = vsel %vm1395_vm6, %v4965_v61, 0.0 }
 0x38a   : > { %4966 = vpow2.f32 %v1442_v16  ;;  %1463 = vadd.xlane.f32.xlu2 %v1462_v57 }
 0x390   : > { %v4967_v63 = vpop.eup %4966 }
 0x391   : > { %v1465_v5 = vsel %vm1395_vm6, %v4967_v63, 0.0 }
 0x392   : > { %1466 = vadd.xlane.f32.xlu0 %v1465_v5 }
 0x3cd   : > { %v1446_v62 = vpop.xlane.xlu1 %1445 }
 0x3d5   : > { %v1449_v13 = vpop.xlane.xlu0 %1448 }
 0x3d6   : > { %4968 = vrcp.f32 %v1449_v13 }
 0x3d7   : > { %4970 = vrcp.f32 %v1446_v62 }
 0x3dc   : > { %v4969_v15 = vpop.eup %4968 }
 0x3dd   : > { %v4971_v17 = vpop.eup %4970  ;;  %v1477_v18 = vmul.f32 %v4969_v15, %v4955_v27  ;;  %v1452_v23 = vpop.xlane.xlu2 %1451 }
 0x3de   : > { %v1476_v20 = vmul.f32 %v4971_v17, %v4953_v22 }
 0x3e0   : > { %v1484_v21 = vpack.c.bf16 %v1477_v18, %v1476_v20 }
 0x3e5   : > { %v1489_v19 = vpop.permute.xlu1 %1488  ;;  %v1455_v14 = vpop.xlane.xlu0 %1454 }
 0x3e6   : > { %1510 = vmatpush.bf16.msra.mxu2 %v1489_v19  ;;  %4972 = vrcp.f32 %v1455_v14 }
 0x3e7   : > { %4974 = vrcp.f32 %v1452_v23 }
 0x3e9   : > { %4495 = vmatmul.msk.bf16.vlgmr.msra.gmra.mxu2 %vm1395_vm6, %v1484_v21 }
 0x3ec   : > { %v4973_v24 = vpop.eup %4972 }
 0x3ed   : > { %v4975_v25 = vpop.eup %4974  ;;  %v1479_v26 = vmul.f32 %v4973_v24, %v4959_v40  ;;  %v1458_v31 = vpop.xlane.xlu2 %1457  ;;  %v4935_v24 = vld [vmem:[%s5652_s7] ss:$0 sm:$0xff] }
 0x3ee   : > { %v1478_v28 = vmul.f32 %v4975_v25, %v4957_v33 }
 0x3f0   : > { %v1485_v32 = vpack.c.bf16 %v1479_v26, %v1478_v28 }
 0x3f5   : > { %v1461_v30 = vpop.xlane.xlu0 %1460 }
 0x3f6   : > { %4976 = vrcp.f32 %v1461_v30 }
 0x3f7   : > { %4978 = vrcp.f32 %v1458_v31 }
 0x3f9   : > { %4496 = vmatmul.msk.bf16.gmra.mxu2 %vm1395_vm6, %v1485_v32 }
 0x3fc   : > { %v4977_v22 = vpop.eup %4976 }
 0x3fd   : > { %v4979_v27 = vpop.eup %4978  ;;  %v1481_v35 = vmul.f32 %v4977_v22, %v4963_v53  ;;  %v1464_v42 = vpop.xlane.xlu2 %1463  ;;  %v4839_v53 = vld [vmem:[%s5656_s22] sm:$0xff] }
 0x3fe   : > { %v1480_v36 = vmul.f32 %v4979_v27, %v4961_v47  ;;  %1572 = vmatpush.bf16.msra.mxu3 %v4839_v53 }
 0x400   : > { %v1486_v38 = vpack.c.bf16 %v1481_v35, %v1480_v36 }
 0x405   : > { %v1467_v37 = vpop.xlane.xlu0 %1466 }
 0x406   : > { %4980 = vrcp.f32 %v1467_v37 }
 0x407   : > { %4982 = vrcp.f32 %v1464_v42 }
 0x409   : > { %4497 = vmatmul.msk.bf16.gmra.mxu2 %vm1395_vm6, %v1486_v38 }
 0x40c   : > { %v4981_v33 = vpop.eup %4980 }
 0x40d   : > { %v4983_v40 = vpop.eup %4982  ;;  %v1483_v41 = vmul.f32 %v4981_v33, %v4967_v63 }
 0x40e   : > { %v1482_v43 = vmul.f32 %v4983_v40, %v4965_v61 }
 0x410   : > { %v1487_v45 = vpack.c.bf16 %v1483_v41, %v1482_v43  ;;  %v4842_v43 = vld [vmem:[%s5692_s2 + $0x8] sm:$0xff] }
 0x411   : > { %1667 = vmatpush.bf16.msra.mxu0 %v4842_v43 }
 0x419   : > { %4498 = vmatmul.msk.bf16.gmra.mxu2 %vm1395_vm6, %v1487_v45  ;;  %v4841_v45 = vld [vmem:[%s5692_s2] sm:$0xff] }
 0x41a   : > { %1668 = vmatpush.bf16.msra.mxu0 %v4841_v45 }
 0x46c   : > { %v1512_v48 = vpop.f32.mrf.mxu2 }
 0x46d   : > { %v1532_v16 = vmul.f32 %v1512_v48, %v5550_v1 }
 0x474   : > { %v1514_v47 = vpop.f32.mrf.mxu2 }
 0x475   : > { %v1533_v57 = vmul.f32 %v1514_v47, %v5559_v6 }
 0x47c   : > { %v1517_v49 = vpop.f32.mrf.mxu2 }
 0x47d   : > { %v1534_v59 = vmul.f32 %v1517_v49, %v5553_v3 }
 0x47f   : > { %v1540_v13 = vadd.f32 %v1534_v59, %v1532_v16 }
 0x484   : > { %v1519_v52 = vpop.f32.mrf.mxu2 }
 0x485   : > { %v1535_v61 = vmul.f32 %v1519_v52, %v5562_v7 }
 0x487   : > { %v1541_v62 = vadd.f32 %v1535_v61, %v1533_v57 }
 0x48c   : > { %v1522_v54 = vpop.f32.mrf.mxu2 }
 0x48d   : > { %v1536_v63 = vmul.f32 %v1522_v54, %v5556_v4 }
 0x48f   : > { %v1542_v18 = vadd.f32 %v1540_v13, %v1536_v63 }
 0x494   : > { %v1524_v56 = vpop.f32.mrf.mxu2 }
 0x495   : > { %v1537_v5 = vmul.f32 %v1524_v56, %v5565_v8 }
 0x497   : > { %v1543_v19 = vadd.f32 %v1541_v62, %v1537_v5 }
 0x49c   : > { %v1527_v58 = vpop.f32.mrf.mxu2 }
 0x49d   : > { %v1538_v15 = vmul.f32 %v1527_v58, %v5568_v11 }
 0x49f   : > { %v1544_v14 = vadd.f32 %v1542_v18, %v1538_v15 }
 0x4a4   : > { %v1529_v17 = vpop.f32.mrf.mxu2 }
 0x4a5   : > { %v1539_v20 = vmul.f32 %v1529_v17, %v5571_v12 }
 0x4a7   : > { %v1545_v21 = vadd.f32 %v1543_v19, %v1539_v20 }
 0x4a9   : > { %v1546_v23 = vpack.c.bf16 %v1545_v21, %v1544_v14 }
 0x4ab   : > { %4507 = vmatmul.msk.bf16.vlgmr.msra.gmra.mxu3 %vm1212_vm0, %v1546_v23 }
 0x52e   : > { %v1574_v25 = vpop.f32.mrf.mxu3 }
 0x52f   : > { %v1575_v26 = vadd.f32 %v4935_v24, %v1574_v25  ;;  %v1629_v25 = vperm.slane %v5543_v46, 2 }
 0x531   : > { %v5671_v28 = vadd.f32 %v1575_v26, %v5506_v0 }
 0x533   : > { %v1581_v30 = vsel %vm1212_vm0, %v5671_v28, 0.0 }
 0x534   : > { %1582 = vadd.xlane.f32.xlu1 %v1581_v30 }
 0x536   : > { %v1576_v32 = vpop.f32.mrf.mxu3 }
 0x537   : > { %v1577_v31 = vadd.f32 %v4935_v24, %v1576_v32 }
 0x539   : > { %v5676_v22 = vadd.f32 %v1577_v31, %v5510_v2 }
 0x53b   : > { %v1584_v27 = vsel %vm1212_vm0, %v5676_v22, 0.0 }
 0x53c   : > { %1585 = vadd.xlane.f32.xlu2 %v1584_v27  ;;  %v1634_v27 = vperm.slane %v5543_v46, 3  ;;  %v4845_v46 = vld [vmem:[%s5706_s5 + $0x10] sm:$0xff] }
 0x5a7   : > { %v1583_v35 = vpop.xlane.xlu1 %1582 }
 0x5a8   : > { %v1587_v0 = vmul.f32 %v1583_v35, %v5514_v10 }
 0x5aa   : > { %v1589_v36 = vsub.f32 %v5671_v28, %v1587_v0 }
 0x5ac   : > { %v1591_v37 = vmul.f32 %v1589_v36, %v1589_v36  ;;  %v1630_v30 = vmul.f32 %v1629_v25, %v1589_v36  ;;  %v4846_v36 = vld [vmem:[%s5706_s5 + $0x18] sm:$0xff] }
 0x5ad   : > { %1718 = vmatpush.bf16.msrb.mxu3 %v4846_v36 }
 0x5ae   : > { %v1593_v38 = vsel %vm1212_vm0, %v1591_v37, 0.0 }
 0x5af   : > { %v1586_v42 = vpop.xlane.xlu2 %1585  ;;  %1594 = vadd.xlane.f32.xlu0 %v1593_v38 }
 0x5b0   : > { %v1588_v33 = vmul.f32 %v1586_v42, %v5514_v10 }
 0x5b1   : > { %1719 = vmatpush.bf16.msrb.mxu3 %v4845_v46 }
 0x5b2   : > { %v1590_v2 = vsub.f32 %v5676_v22, %v1588_v33  ;;  %v4844_v33 = vld [vmem:[%s5706_s5 + $0x8] sm:$0xff] }
 0x5b4   : > { %v1592_v40 = vmul.f32 %v1590_v2, %v1590_v2  ;;  %v1631_v32 = vmul.f32 %v1629_v25, %v1590_v2  ;;  %v4843_v2 = vld [vmem:[%s5706_s5] sm:$0xff] }
 0x5b5   : > { %1720 = vmatpush.bf16.msrb.mxu3 %v4844_v33 }
 0x5b6   : > { %v1596_v41 = vsel %vm1212_vm0, %v1592_v40, 0.0 }
 0x5b7   : > { %1597 = vadd.xlane.f32.xlu2 %v1596_v41  ;;  %v4936_v41 = vld [vmem:[%s5688_s26] ss:$0 sm:$0xff] }
 0x5b9   : > { %1721 = vmatpush.bf16.msrb.mxu3 %v4843_v2 }
 0x622   : > { %v1595_v48 = vpop.xlane.xlu0 %1594 }
 0x623   : > { %v1599_v47 = vmul.f32 0.032258064, %v1595_v48 }
 0x625   : > { %4984 = vrsqrt.f32 %v1599_v47  ;;  %vm1608_vm7 = vcmp.eq.f32.partialorder %v1599_v47, inf  ;;  %v1611_v5 = vand.u32 2147483648, %v1599_v47  ;;  %vm1610_vm8 = vcmp.eq.f32.partialorder %v1599_v47, 0.0 }
 0x62a   : > { %v1598_v49 = vpop.xlane.xlu2 %1597 }
 0x62b   : > { %v4985_v51 = vpop.eup %4984  ;;  %v1600_v52 = vmul.f32 0.032258064, %v1598_v49 }
 0x62c   : > { %v1602_v53 = vmul.f32 %v4985_v51, %v1599_v47 }
 0x62d   : > { %4986 = vrsqrt.f32 %v1600_v52  ;;  %vm1620_vm9 = vcmp.eq.f32.partialorder %v1600_v52, inf  ;;  %v1623_v14 = vand.u32 2147483648, %v1600_v52  ;;  %vm1622_vm10 = vcmp.eq.f32.partialorder %v1600_v52, 0.0 }
 0x62e   : > { %v1603_v54 = vmul.f32 %v4985_v51, %v1602_v53 }
 0x630   : > { %v1604_v56 = vmul.f32 0.5, %v1603_v54 }
 0x632   : > { %v1605_v58 = vsub.f32 1.5, %v1604_v56 }
 0x633   : > { %v4987_v59 = vpop.eup %4986 }
 0x634   : > { %v1614_v61 = vmul.f32 %v4987_v59, %v1600_v52  ;;  %v1606_v16 = vmul.f32 %v4985_v51, %v1605_v58 }
 0x636   : > { %v1615_v57 = vmul.f32 %v4987_v59, %v1614_v61  ;;  %v1607_v63 = vmul.f32 %v1606_v16, %v1599_v47 }
 0x638   : > { %v1609_v13 = vsel %vm1608_vm7, %v1599_v47, %v1607_v63  ;;  %v1616_v62 = vmul.f32 0.5, %v1615_v57 }
 0x639   : > { %v1612_v15 = vsel %vm1610_vm8, %v1611_v5, %v1609_v13 }
 0x63a   : > { %v1617_v17 = vsub.f32 1.5, %v1616_v62  ;;  %v1625_v19 = vadd.f32 1e-06, %v1612_v15 }
 0x63c   : > { %v1618_v18 = vmul.f32 %v4987_v59, %v1617_v17  ;;  %4988 = vrcp.f32 %v1625_v19 }
 0x63e   : > { %v1619_v20 = vmul.f32 %v1618_v18, %v1600_v52 }
 0x640   : > { %v1621_v21 = vsel %vm1620_vm9, %v1600_v52, %v1619_v20  ;;  %v4937_v52 = vld [vmem:[%s5701_s16] ss:$0 sm:$0xff]  ;;  %v4848_v20 = vld [vmem:[%s5534_s18 + $0x18] sm:$0xff] }
 0x641   : > { %v1624_v23 = vsel %vm1622_vm10, %v1623_v14, %v1621_v21  ;;  %1826 = vmatpush.bf16.msrb.mxu0 %v4848_v20  ;;  %v4847_v14 = vld [vmem:[%s5534_s18 + $0x10] sm:$0xff] }
 0x642   : > { %v1626_v24 = vadd.f32 1e-06, %v1624_v23  ;;  %v4989_v26 = vpop.eup %4988 }
 0x643   : > { %v1632_v31 = vmul.f32 %v4989_v26, %v1630_v30 }
 0x644   : > { %4990 = vrcp.f32 %v1626_v24 }
 0x645   : > { %v1635_v37 = vadd.f32 %v1634_v27, %v1632_v31  ;;  %1827 = vmatpush.bf16.msrb.mxu0 %v4847_v14 }
 0x64a   : > { %v4991_v35 = vpop.eup %4990 }
 0x64b   : > { %v1633_v0 = vmul.f32 %v4991_v35, %v1631_v32 }
 0x64d   : > { %v1636_v38 = vadd.f32 %v1634_v27, %v1633_v0 }
 0x64f   : > { %v1637_v42 = vpack.c.bf16 %v1636_v38, %v1635_v37 }
 0x651   : > { %4516 = vmatmul.msk.bf16.vlgmr.msra.gmra.mxu0 %vm1212_vm0, %v1637_v42 }
 0x6ce   : > { %v1670_v40 = vpop.f32.mrf.mxu0 }
 0x6cf   : > { %v1671_v43 = vadd.f32 %v4936_v41, %v1670_v40 }
 0x6d1   : > { %v1675_v47 = vmax.f32 %v1671_v43, 0.0 }
 0x6d6   : > { %v1672_v45 = vpop.f32.mrf.mxu0 }
 0x6d7   : > { %v1673_v48 = vadd.f32 %v4936_v41, %v1672_v45 }
 0x6d9   : > { %v1676_v49 = vmax.f32 %v1673_v48, 0.0 }
 0x6db   : > { %v1677_v51 = vpack.c.bf16 %v1676_v49, %v1675_v47  ;;  %v5734_v47 = vld [vmem:[%s5540_s23 + $0x4] sm:$0xf] }
 0x6dd   : > { %4533 = vmatmul.msk.bf16.vlgmr.msrb.gmra.mxu3 %vm1710_vm11, %v1677_v51 }
 0x760   : > { %v1723_v53 = vpop.f32.mrf.mxu3 }
 0x761   : > { %v1728_v54 = vadd.f32 %v1723_v53, %v5671_v28  ;;  %v1786_v53 = vperm.slane %v5734_v47, 0 }
 0x763   : > { %v5716_v56 = vadd.f32 %v4937_v52, %v1728_v54 }
 0x765   : > { %v1738_v58 = vsel %vm1212_vm0, %v5716_v56, 0.0 }
 0x766   : > { %1739 = vadd.xlane.f32.xlu0 %v1738_v58 }
 0x768   : > { %v1725_v59 = vpop.f32.mrf.mxu3 }
 0x769   : > { %v1729_v61 = vadd.f32 %v1725_v59, %v5676_v22 }
 0x76b   : > { %v5721_v16 = vadd.f32 %v4937_v52, %v1729_v61 }
 0x76d   : > { %v1741_v57 = vsel %vm1212_vm0, %v5721_v16, 0.0 }
 0x76e   : > { %1742 = vadd.xlane.f32.xlu2 %v1741_v57  ;;  %v1791_v57 = vperm.slane %v5734_v47, 1 }
 0x7d9   : > { %v1740_v63 = vpop.xlane.xlu0 %1739 }
 0x7da   : > { %v1744_v28 = vmul.f32 %v1740_v63, %v5514_v10 }
 0x7dc   : > { %v1746_v5 = vsub.f32 %v5716_v56, %v1744_v28 }
 0x7de   : > { %v1748_v13 = vmul.f32 %v1746_v5, %v1746_v5  ;;  %v1787_v58 = vmul.f32 %v1786_v53, %v1746_v5 }
 0x7e0   : > { %v1750_v62 = vsel %vm1212_vm0, %v1748_v13, 0.0 }
 0x7e1   : > { %1751 = vadd.xlane.f32.xlu0 %v1750_v62  ;;  %v1743_v15 = vpop.xlane.xlu2 %1742 }
 0x7e2   : > { %v1745_v22 = vmul.f32 %v1743_v15, %v5514_v10 }
 0x7e4   : > { %v1747_v17 = vsub.f32 %v5721_v16, %v1745_v22 }
 0x7e6   : > { %v1749_v18 = vmul.f32 %v1747_v17, %v1747_v17  ;;  %v1788_v59 = vmul.f32 %v1786_v53, %v1747_v17 }
 0x7e8   : > { %v1753_v19 = vsel %vm1212_vm0, %v1749_v18, 0.0  ;;  %v4938_v18 = vld [vmem:[%s5527_s15 + $0x1] ss:$0 sm:$0xff] }
 0x7e9   : > { %1754 = vadd.xlane.f32.xlu2 %v1753_v19 }
 0x854   : > { %v1752_v21 = vpop.xlane.xlu0 %1751 }
 0x855   : > { %v1756_v23 = vmul.f32 0.032258064, %v1752_v21 }
 0x857   : > { %4992 = vrsqrt.f32 %v1756_v23  ;;  %vm1765_vm12 = vcmp.eq.f32.partialorder %v1756_v23, inf  ;;  %v1768_v36 = vand.u32 2147483648, %v1756_v23  ;;  %vm1767_vm13 = vcmp.eq.f32.partialorder %v1756_v23, 0.0 }
 0x85c   : > { %v1755_v24 = vpop.xlane.xlu2 %1754 }
 0x85d   : > { %v4993_v25 = vpop.eup %4992  ;;  %v1757_v26 = vmul.f32 0.032258064, %v1755_v24 }
 0x85e   : > { %v1759_v30 = vmul.f32 %v4993_v25, %v1756_v23 }
 0x85f   : > { %4994 = vrsqrt.f32 %v1757_v26  ;;  %vm1777_vm14 = vcmp.eq.f32.partialorder %v1757_v26, inf  ;;  %v1780_v48 = vand.u32 2147483648, %v1757_v26  ;;  %vm1779_vm15 = vcmp.eq.f32.partialorder %v1757_v26, 0.0 }
 0x860   : > { %v1760_v32 = vmul.f32 %v4993_v25, %v1759_v30 }
 0x862   : > { %v1761_v31 = vmul.f32 0.5, %v1760_v32 }
 0x864   : > { %v1762_v27 = vsub.f32 1.5, %v1761_v31 }
 0x865   : > { %v4995_v35 = vpop.eup %4994 }
 0x866   : > { %v1763_v0 = vmul.f32 %v4993_v25, %v1762_v27  ;;  %v1771_v37 = vmul.f32 %v4995_v35, %v1757_v26 }
 0x868   : > { %v1764_v38 = vmul.f32 %v1763_v0, %v1756_v23  ;;  %v1772_v42 = vmul.f32 %v4995_v35, %v1771_v37 }
 0x86a   : > { %v1773_v46 = vmul.f32 0.5, %v1772_v42  ;;  %v1766_v33 = vsel %vm1765_vm12, %v1756_v23, %v1764_v38 }
 0x86b   : > { %v1769_v2 = vsel %vm1767_vm13, %v1768_v36, %v1766_v33 }
 0x86c   : > { %v1774_v40 = vsub.f32 1.5, %v1773_v46  ;;  %v1782_v43 = vadd.f32 1e-06, %v1769_v2 }
 0x86e   : > { %v1775_v41 = vmul.f32 %v4995_v35, %v1774_v40  ;;  %4996 = vrcp.f32 %v1782_v43 }
 0x870   : > { %v1776_v45 = vmul.f32 %v1775_v41, %v1757_v26 }
 0x872   : > { %v1778_v49 = vsel %vm1777_vm14, %v1757_v26, %v1776_v45 }
 0x873   : > { %v1781_v51 = vsel %vm1779_vm15, %v1780_v48, %v1778_v49 }
 0x874   : > { %v1783_v52 = vadd.f32 1e-06, %v1781_v51  ;;  %v4997_v54 = vpop.eup %4996 }
 0x875   : > { %v1789_v61 = vmul.f32 %v4997_v54, %v1787_v58 }
 0x876   : > { %4998 = vrcp.f32 %v1783_v52 }
 0x877   : > { %v1792_v13 = vadd.f32 %v1791_v57, %v1789_v61 }
 0x87c   : > { %v4999_v63 = vpop.eup %4998 }
 0x87d   : > { %v1790_v28 = vmul.f32 %v4999_v63, %v1788_v59 }
 0x87f   : > { %v1793_v62 = vadd.f32 %v1791_v57, %v1790_v28 }
 0x881   : > { %v1794_v15 = vpack.c.bf16 %v1793_v62, %v1792_v13 }
 0x883   : > { %4548 = vmatmul.msk.bf16.vlgmr.msrb.gmra.mxu0 %vm1212_vm0, %v1794_v15 }
 0x900   : > { %v1829_v22 = vpop.f32.mrf.mxu0 }
 0x901   : > { %v1830_v19 = vadd.f32 %v4938_v18, %v1829_v22 }
 0x903   : > { %v1841_v21 = vmul.f32 %v1830_v19, %v5550_v1  ;;  %v1843_v5 = vmul.f32 %v1830_v19, %v5553_v3  ;;  %v1845_v17 = vmul.f32 %v1830_v19, %v5556_v4  ;;  %v1847_v30 = vmul.f32 %v1830_v19, %v5568_v11 }
 0x908   : > { %v1831_v20 = vpop.f32.mrf.mxu0 }
 0x909   : > { %v1832_v14 = vadd.f32 %v4938_v18, %v1831_v20 }
 0x90b   : > { %v1842_v23 = vmul.f32 %v1832_v14, %v5559_v6  ;;  %v5744_v24 = vpack.c.bf16 %v1832_v14, %v1830_v19  ;;  %v1844_v25 = vmul.f32 %v1832_v14, %v5562_v7  ;;  %v1846_v26 = vmul.f32 %v1832_v14, %v5565_v8 }
 0x90c   : > { %v1848_v32 = vmul.f32 %v1832_v14, %v5571_v12 }
 0x90d   : > { %1855 = vrot.lane.b32.xlu0 %v5744_v24, %s6311_s3  ;;  %v1849_v31 = vpack.c.bf16 %v1842_v23, %v1841_v21  ;;  %v1850_v27 = vpack.c.bf16 %v1844_v25, %v1843_v5  ;;  %v1851_v35 = vpack.c.bf16 %v1846_v26, %v1845_v17 }
 0x90e   : > { %v1852_v0 = vpack.c.bf16 %v1848_v32, %v1847_v30 }
 0x97f   : > { %v1856_v37 = vpop.permute.xlu0 %1855 }
 0x980   : > { %v1870_v38 = vsel %vm1212_vm0, %v1856_v37, 0 }
 0x981   : > { %1879 = vmatpush.bf16.xpose.msra.mxu3 %v1870_v38 }
 0x988   : > { %4554 = vmatmul.msk.bf16.vlgmr.msra.gmra.mxu3 %vm1212_vm0, %v1849_v31 }
 0x998   : > { %4555 = vmatmul.msk.bf16.gmra.mxu3 %vm1212_vm0, %v1850_v27 }
 0x9a8   : > { %4556 = vmatmul.msk.bf16.gmra.mxu3 %vm1212_vm0, %v1851_v35 }
 0x9b8   : > { %4557 = vmatmul.msk.bf16.gmra.mxu3 %vm1212_vm0, %v1852_v0 }
 0xa0b   : > { %v1881_v42 = vpop.f32.mrf.mxu3 }
 0xa0c   : > { %v1901_v36 = vmul.f32 0.35355338, %v1881_v42 }
 0xa0e   : > { %v1909_v46 = vadd.f32 %v1901_v36, %v5597_v29 }
 0xa10   : > { %v1917_v33 = vsel %vm1395_vm6, %v1909_v46, -inf }
 0xa11   : > { %1918 = vmax.xlane.f32.xlu2 %v1917_v33 }
 0xa13   : > { %v1883_v2 = vpop.f32.mrf.mxu3 }
 0xa14   : > { %v1902_v40 = vmul.f32 0.35355338, %v1883_v2 }
 0xa16   : > { %v1910_v41 = vadd.f32 %v1902_v40, %v5602_v34 }
 0xa18   : > { %v1920_v43 = vsel %vm1395_vm6, %v1910_v41, -inf }
 0xa19   : > { %1921 = vmax.xlane.f32.xlu2 %v1920_v43 }
 0xa1b   : > { %v1886_v45 = vpop.f32.mrf.mxu3 }
 0xa1c   : > { %v1903_v48 = vmul.f32 0.35355338, %v1886_v45 }
 0xa1e   : > { %v1911_v49 = vadd.f32 %v1903_v48, %v5607_v39 }
 0xa20   : > { %v1923_v51 = vsel %vm1395_vm6, %v1911_v49, -inf }
 0xa21   : > { %1924 = vmax.xlane.f32.xlu1 %v1923_v51 }
 0xa23   : > { %v1888_v52 = vpop.f32.mrf.mxu3 }
 0xa24   : > { %v1904_v53 = vmul.f32 0.35355338, %v1888_v52 }
 0xa26   : > { %v1912_v29 = vadd.f32 %v1904_v53, %v5612_v44 }
 0xa28   : > { %v1926_v54 = vsel %vm1395_vm6, %v1912_v29, -inf }
 0xa29   : > { %1927 = vmax.xlane.f32.xlu2 %v1926_v54 }
 0xa2b   : > { %v1891_v58 = vpop.f32.mrf.mxu3 }
 0xa2c   : > { %v1905_v59 = vmul.f32 0.35355338, %v1891_v58 }
 0xa2e   : > { %v1913_v34 = vadd.f32 %v1905_v59, %v5617_v50 }
 0xa30   : > { %v1929_v61 = vsel %vm1395_vm6, %v1913_v34, -inf }
 0xa31   : > { %1930 = vmax.xlane.f32.xlu1 %v1929_v61 }
 0xa33   : > { %v1893_v57 = vpop.f32.mrf.mxu3 }
 0xa34   : > { %v1906_v63 = vmul.f32 0.35355338, %v1893_v57 }
 0xa36   : > { %v1914_v39 = vadd.f32 %v1906_v63, %v5622_v55 }
 0xa38   : > { %v1932_v28 = vsel %vm1395_vm6, %v1914_v39, -inf }
 0xa39   : > { %1933 = vmax.xlane.f32.xlu0 %v1932_v28 }
 0xa3b   : > { %v1896_v13 = vpop.f32.mrf.mxu3 }
 0xa3c   : > { %v1907_v62 = vmul.f32 0.35355338, %v1896_v13 }
 0xa3e   : > { %v1915_v44 = vadd.f32 %v1907_v62, %v5627_v60 }
 0xa40   : > { %v1935_v15 = vsel %vm1395_vm6, %v1915_v44, -inf }
 0xa41   : > { %1936 = vmax.xlane.f32.xlu2 %v1935_v15 }
 0xa43   : > { %v1898_v22 = vpop.f32.mrf.mxu3 }
 0xa44   : > { %v1908_v18 = vmul.f32 0.35355338, %v1898_v22 }
 0xa46   : > { %v1916_v50 = vadd.f32 %v1908_v18, %v5632_v9 }
 0xa48   : > { %v1938_v19 = vsel %vm1395_vm6, %v1916_v50, -inf }
 0xa49   : > { %1939 = vmax.xlane.f32.xlu1 %v1938_v19 }
 0xa84   : > { %v1919_v20 = vpop.xlane.xlu2 %1918 }
 0xa85   : > { %v1941_v14 = vsub.f32 %v1909_v46, %v1919_v20 }
 0xa87   : > { %v1949_v55 = vmul.f32 1.442695, %v1941_v14 }
 0xa89   : > { %5000 = vpow2.f32 %v1949_v55 }
 0xa8c   : > { %v1922_v21 = vpop.xlane.xlu2 %1921 }
 0xa8d   : > { %v1942_v5 = vsub.f32 %v1910_v41, %v1922_v21 }
 0xa8f   : > { %v5001_v17 = vpop.eup %5000  ;;  %v1951_v23 = vmul.f32 1.442695, %v1942_v5 }
 0xa90   : > { %v1965_v60 = vsel %vm1395_vm6, %v5001_v17, 0.0 }
 0xa91   : > { %5002 = vpow2.f32 %v1951_v23  ;;  %1966 = vadd.xlane.f32.xlu2 %v1965_v60 }
 0xa94   : > { %v1925_v25 = vpop.xlane.xlu1 %1924 }
 0xa95   : > { %v1943_v26 = vsub.f32 %v1911_v49, %v1925_v25 }
 0xa97   : > { %v5003_v30 = vpop.eup %5002  ;;  %v1953_v32 = vmul.f32 1.442695, %v1943_v26 }
 0xa98   : > { %v1968_v9 = vsel %vm1395_vm6, %v5003_v30, 0.0 }
 0xa99   : > { %5004 = vpow2.f32 %v1953_v32  ;;  %1969 = vadd.xlane.f32.xlu1 %v1968_v9 }
 0xa9c   : > { %v1928_v31 = vpop.xlane.xlu2 %1927 }
 0xa9d   : > { %v1944_v27 = vsub.f32 %v1912_v29, %v1928_v31 }
 0xa9f   : > { %v5005_v35 = vpop.eup %5004  ;;  %v1955_v0 = vmul.f32 1.442695, %v1944_v27 }
 0xaa0   : > { %v1971_v37 = vsel %vm1395_vm6, %v5005_v35, 0.0 }
 0xaa1   : > { %5006 = vpow2.f32 %v1955_v0  ;;  %1972 = vadd.xlane.f32.xlu1 %v1971_v37  ;;  %v4850_v37 = vld [vmem:[%s5656_s22 + $0x18] sm:$0xff] }
 0xaa2   : > { %2092 = vmatpush.bf16.msrb.mxu2 %v4850_v37 }
 0xaa4   : > { %v1931_v38 = vpop.xlane.xlu1 %1930 }
 0xaa5   : > { %v1945_v42 = vsub.f32 %v1913_v34, %v1931_v38 }
 0xaa7   : > { %v5007_v36 = vpop.eup %5006  ;;  %v1957_v46 = vmul.f32 1.442695, %v1945_v42 }
 0xaa8   : > { %v1974_v33 = vsel %vm1395_vm6, %v5007_v36, 0.0 }
 0xaa9   : > { %5008 = vpow2.f32 %v1957_v46  ;;  %2009 = vrot.lane.b32.xlu2 %v5744_v24, %s6312_s0  ;;  %1975 = vadd.xlane.f32.xlu1 %v1974_v33 }
 0xaac   : > { %v1934_v2 = vpop.xlane.xlu0 %1933 }
 0xaad   : > { %v1946_v40 = vsub.f32 %v1914_v39, %v1934_v2 }
 0xaaf   : > { %v5009_v41 = vpop.eup %5008  ;;  %v1959_v43 = vmul.f32 1.442695, %v1946_v40 }
 0xab0   : > { %v1977_v45 = vsel %vm1395_vm6, %v5009_v41, 0.0 }
 0xab1   : > { %5010 = vpow2.f32 %v1959_v43  ;;  %1978 = vadd.xlane.f32.xlu1 %v1977_v45  ;;  %v5048_v43 = vld [vmem:[%s5385_s30 + $0x10] sm:$0xff] }
 0xab4   : > { %v1937_v52 = vpop.xlane.xlu2 %1936 }
 0xab5   : > { %v1947_v54 = vsub.f32 %v1915_v44, %v1937_v52 }
 0xab7   : > { %v5011_v48 = vpop.eup %5010  ;;  %v1961_v24 = vmul.f32 1.442695, %v1947_v54  ;;  %v5052_v54 = vld [vmem:[%s5385_s30 + $0x20] sm:$0xff] }
 0xab8   : > { %v1980_v49 = vsel %vm1395_vm6, %v5011_v48, 0.0 }
 0xab9   : > { %1981 = vadd.xlane.f32.xlu0 %v1980_v49 }
 0xabc   : > { %v1940_v51 = vpop.xlane.xlu1 %1939 }
 0xabd   : > { %v1948_v53 = vsub.f32 %v1916_v50, %v1940_v51  ;;  %v5050_v51 = vld [vmem:[%s5385_s30] sm:$0xff] }
 0xabf   : > { %v1963_v29 = vmul.f32 1.442695, %v1948_v53  ;;  %v5051_v53 = vld [vmem:[%s5385_s30 + $0x8] sm:$0xff] }
 0xac1   : > { %5012 = vpow2.f32 %v1963_v29 }
 0xac2   : > { %5014 = vpow2.f32 %v1961_v24 }
 0xac7   : > { %v5013_v58 = vpop.eup %5012 }
 0xac8   : > { %v1986_v59 = vsel %vm1395_vm6, %v5013_v58, 0.0  ;;  %v5015_v34 = vpop.eup %5014 }
 0xac9   : > { %1987 = vadd.xlane.f32.xlu1 %v1986_v59  ;;  %v1983_v61 = vsel %vm1395_vm6, %v5015_v34, 0.0 }
 0xad2   : > { %1984 = vadd.xlane.f32.xlu2 %v1983_v61 }
 0xb04   : > { %v1967_v57 = vpop.xlane.xlu2 %1966 }
 0xb05   : > { %5016 = vrcp.f32 %v1967_v57  ;;  %v5054_v57 = vld [vmem:[%s5385_s30 + $0x30] sm:$0xff] }
 0xb0b   : > { %v5017_v28 = vpop.eup %5016 }
 0xb0c   : > { %v2010_v63 = vpop.permute.xlu2 %2009  ;;  %v1970_v39 = vpop.xlane.xlu1 %1969  ;;  %v1997_v62 = vmul.f32 %v5017_v28, %v5001_v17 }
 0xb0d   : > { %5018 = vrcp.f32 %v1970_v39  ;;  %2031 = vmatpush.bf16.msra.mxu0 %v2010_v63 }
 0xb13   : > { %v5019_v13 = vpop.eup %5018 }
 0xb14   : > { %v1998_v44 = vmul.f32 %v5019_v13, %v5003_v30  ;;  %v1973_v15 = vpop.xlane.xlu1 %1972 }
 0xb15   : > { %5020 = vrcp.f32 %v1973_v15 }
 0xb16   : > { %v2005_v22 = vpack.c.bf16 %v1998_v44, %v1997_v62  ;;  %v5055_v62 = vld [vmem:[%s5385_s30 + $0x38] sm:$0xff] }
 0xb18   : > { %4558 = vmatmul.msk.bf16.vlgmr.msra.gmra.mxu0 %vm1395_vm6, %v2005_v22 }
 0xb1b   : > { %v5021_v50 = vpop.eup %5020 }
 0xb1c   : > { %v1976_v18 = vpop.xlane.xlu1 %1975  ;;  %v1999_v20 = vmul.f32 %v5021_v50, %v5005_v35  ;;  %v4939_v50 = vld [vmem:[%s5652_s7 + $0x1] ss:$0 sm:$0xff] }
 0xb1d   : > { %5022 = vrcp.f32 %v1976_v18 }
 0xb23   : > { %v5023_v19 = vpop.eup %5022 }
 0xb24   : > { %v2000_v14 = vmul.f32 %v5023_v19, %v5007_v36  ;;  %v1979_v21 = vpop.xlane.xlu1 %1978  ;;  %v4849_v36 = vld [vmem:[%s5656_s22 + $0x10] sm:$0xff] }
 0xb25   : > { %5024 = vrcp.f32 %v1979_v21  ;;  %2093 = vmatpush.bf16.msrb.mxu2 %v4849_v36 }
 0xb26   : > { %v2006_v55 = vpack.c.bf16 %v2000_v14, %v1999_v20 }
 0xb28   : > { %4559 = vmatmul.msk.bf16.gmra.mxu0 %vm1395_vm6, %v2006_v55 }
 0xb2b   : > { %v5025_v17 = vpop.eup %5024 }
 0xb2c   : > { %v1982_v5 = vpop.xlane.xlu0 %1981  ;;  %v2001_v60 = vmul.f32 %v5025_v17, %v5009_v41 }
 0xb2d   : > { %5026 = vrcp.f32 %v1982_v5 }
 0xb33   : > { %v5027_v23 = vpop.eup %5026 }
 0xb34   : > { %v2002_v25 = vmul.f32 %v5027_v23, %v5011_v48  ;;  %v5049_v48 = vld [vmem:[%s5385_s30 + $0x18] sm:$0xff] }
 0xb36   : > { %v2007_v26 = vpack.c.bf16 %v2002_v25, %v2001_v60  ;;  %v4852_v60 = vld [vmem:[%s5692_s2 + $0x18] sm:$0xff] }
 0xb37   : > { %2190 = vmatpush.bf16.msra.mxu1 %v4852_v60  ;;  %v4853_v60 = vld [vmem:[%s5706_s5 + $0x20] sm:$0xff] }
 0xb38   : > { %4560 = vmatmul.msk.bf16.gmra.mxu0 %vm1395_vm6, %v2007_v26 }
 0xb3c   : > { %v1988_v30 = vpop.xlane.xlu1 %1987 }
 0xb3d   : > { %5028 = vrcp.f32 %v1988_v30 }
 0xb43   : > { %v5029_v9 = vpop.eup %5028 }
 0xb44   : > { %v2004_v35 = vmul.f32 %v5029_v9, %v5013_v58  ;;  %v5053_v58 = vld [vmem:[%s5385_s30 + $0x28] sm:$0xff] }
 0xb45   : > { %v1985_v32 = vpop.xlane.xlu2 %1984 }
 0xb46   : > { %5030 = vrcp.f32 %v1985_v32 }
 0xb4c   : > { %v5031_v31 = vpop.eup %5030 }
 0xb4d   : > { %v2003_v27 = vmul.f32 %v5031_v31, %v5015_v34 }
 0xb4f   : > { %v2008_v0 = vpack.c.bf16 %v2004_v35, %v2003_v27 }
 0xb51   : > { %4561 = vmatmul.msk.bf16.gmra.mxu0 %vm1395_vm6, %v2008_v0  ;;  %v4851_v0 = vld [vmem:[%s5692_s2 + $0x10] sm:$0xff] }
 0xb52   : > { %2191 = vmatpush.bf16.msra.mxu1 %v4851_v0 }
 0xb95   : > { %v2033_v38 = vpop.f32.mrf.mxu0 }
 0xb96   : > { %v2053_v52 = vmul.f32 %v5050_v51, %v2033_v38 }
 0xb9d   : > { %v2035_v42 = vpop.f32.mrf.mxu0 }
 0xb9e   : > { %v2054_v29 = vmul.f32 %v5051_v53, %v2035_v42 }
 0xba5   : > { %v2038_v46 = vpop.f32.mrf.mxu0 }
 0xba6   : > { %v2055_v45 = vmul.f32 %v5048_v43, %v2038_v46 }
 0xba8   : > { %v2061_v34 = vadd.f32 %v2055_v45, %v2053_v52 }
 0xbad   : > { %v2040_v33 = vpop.f32.mrf.mxu0 }
 0xbae   : > { %v2056_v49 = vmul.f32 %v5049_v48, %v2040_v33 }
 0xbb0   : > { %v2062_v61 = vadd.f32 %v2056_v49, %v2054_v29 }
 0xbb5   : > { %v2043_v2 = vpop.f32.mrf.mxu0 }
 0xbb6   : > { %v2057_v24 = vmul.f32 %v5052_v54, %v2043_v2 }
 0xbb8   : > { %v2063_v28 = vadd.f32 %v2061_v34, %v2057_v24 }
 0xbbd   : > { %v2045_v40 = vpop.f32.mrf.mxu0 }
 0xbbe   : > { %v2058_v59 = vmul.f32 %v5053_v58, %v2045_v40 }
 0xbc0   : > { %v2064_v13 = vadd.f32 %v2062_v61, %v2058_v59 }
 0xbce   : > { %v2048_v41 = vpop.f32.mrf.mxu0 }
 0xbcf   : > { %v2059_v63 = vmul.f32 %v5054_v57, %v2048_v41 }
 0xbd1   : > { %v2065_v15 = vadd.f32 %v2063_v28, %v2059_v63  ;;  %v2150_v28 = vperm.slane %v5734_v47, 2 }
 0xbd6   : > { %v2050_v39 = vpop.f32.mrf.mxu0 }
 0xbd7   : > { %v2060_v44 = vmul.f32 %v5055_v62, %v2050_v39 }
 0xbd9   : > { %v2066_v22 = vadd.f32 %v2064_v13, %v2060_v44  ;;  %v2155_v44 = vperm.slane %v5734_v47, 3 }
 0xbdb   : > { %v2067_v18 = vpack.c.bf16 %v2066_v22, %v2065_v15 }
 0xbdd   : > { %4570 = vmatmul.msk.bf16.vlgmr.msrb.gmra.mxu2 %vm1212_vm0, %v2067_v18 }
 0xc60   : > { %v2095_v19 = vpop.f32.mrf.mxu2 }
 0xc61   : > { %v2096_v20 = vadd.f32 %v4939_v50, %v2095_v19 }
 0xc63   : > { %v5800_v14 = vadd.f32 %v2096_v20, %v5716_v56 }
 0xc65   : > { %v2102_v55 = vsel %vm1212_vm0, %v5800_v14, 0.0 }
 0xc66   : > { %2103 = vadd.xlane.f32.xlu0 %v2102_v55 }
 0xc68   : > { %v2097_v21 = vpop.f32.mrf.mxu2 }
 0xc69   : > { %v2098_v5 = vadd.f32 %v4939_v50, %v2097_v21  ;;  %v4856_v21 = vld [vmem:[%s5706_s5 + $0x38] sm:$0xff] }
 0xc6a   : > { %2241 = vmatpush.bf16.msra.mxu2 %v4856_v21 }
 0xc6b   : > { %v5805_v17 = vadd.f32 %v2098_v5, %v5721_v16  ;;  %v4855_v5 = vld [vmem:[%s5706_s5 + $0x30] sm:$0xff] }
 0xc6d   : > { %v2105_v23 = vsel %vm1212_vm0, %v5805_v17, 0.0 }
 0xc6e   : > { %2106 = vadd.xlane.f32.xlu1 %v2105_v23  ;;  %2242 = vmatpush.bf16.msra.mxu2 %v4855_v5  ;;  %v4854_v23 = vld [vmem:[%s5706_s5 + $0x28] sm:$0xff]  ;;  %s1186_s5 = scalar_lea.vmem %s5380_s24, %s5523_s11 }
 0xc72   : > { %2243 = vmatpush.bf16.msra.mxu2 %v4854_v23 }
 0xc76   : > { %2244 = vmatpush.bf16.msra.mxu2 %v4853_v60 }
 0xcd9   : > { %v2104_v25 = vpop.xlane.xlu0 %2103 }
 0xcda   : > { %v2108_v56 = vmul.f32 %v2104_v25, %v5514_v10  ;;  %v4940_v25 = vld [vmem:[%s5688_s26 + $0x1] ss:$0 sm:$0xff] }
 0xcdc   : > { %v2110_v26 = vsub.f32 %v5800_v14, %v2108_v56 }
 0xcde   : > { %v2112_v30 = vmul.f32 %v2110_v26, %v2110_v26  ;;  %v2151_v62 = vmul.f32 %v2150_v28, %v2110_v26 }
 0xce0   : > { %v2114_v32 = vsel %vm1212_vm0, %v2112_v30, 0.0 }
 0xce1   : > { %v2107_v9 = vpop.xlane.xlu1 %2106  ;;  %2115 = vadd.xlane.f32.xlu0 %v2114_v32 }
 0xce2   : > { %v2109_v16 = vmul.f32 %v2107_v9, %v5514_v10 }
 0xce4   : > { %v2111_v31 = vsub.f32 %v5805_v17, %v2109_v16 }
 0xce6   : > { %v2113_v27 = vmul.f32 %v2111_v31, %v2111_v31  ;;  %v2152_v15 = vmul.f32 %v2150_v28, %v2111_v31  ;;  %v4941_v31 = vld [vmem:[%s5701_s16 + $0x1] ss:$0 sm:$0xff] }
 0xce8   : > { %v2117_v35 = vsel %vm1212_vm0, %v2113_v27, 0.0 }
 0xce9   : > { %2118 = vadd.xlane.f32.xlu1 %v2117_v35 }
 0xd54   : > { %v2116_v37 = vpop.xlane.xlu0 %2115 }
 0xd55   : > { %v2120_v38 = vmul.f32 0.032258064, %v2116_v37 }
 0xd57   : > { %5032 = vrsqrt.f32 %v2120_v38  ;;  %vm2129_vm1 = vcmp.eq.f32.partialorder %v2120_v38, inf  ;;  %v2132_v52 = vand.u32 2147483648, %v2120_v38  ;;  %vm2131_vm2 = vcmp.eq.f32.partialorder %v2120_v38, 0.0 }
 0xd5c   : > { %v2119_v42 = vpop.xlane.xlu1 %2118 }
 0xd5d   : > { %v5033_v36 = vpop.eup %5032  ;;  %v2121_v46 = vmul.f32 0.032258064, %v2119_v42 }
 0xd5e   : > { %v2123_v33 = vmul.f32 %v5033_v36, %v2120_v38 }
 0xd5f   : > { %5034 = vrsqrt.f32 %v2121_v46  ;;  %vm2141_vm3 = vcmp.eq.f32.partialorder %v2121_v46, inf  ;;  %v2144_v61 = vand.u32 2147483648, %v2121_v46  ;;  %vm2143_vm4 = vcmp.eq.f32.partialorder %v2121_v46, 0.0 }
 0xd60   : > { %v2124_v2 = vmul.f32 %v5033_v36, %v2123_v33 }
 0xd62   : > { %v2125_v40 = vmul.f32 0.5, %v2124_v2 }
 0xd64   : > { %v2126_v41 = vsub.f32 1.5, %v2125_v40 }
 0xd65   : > { %v5035_v43 = vpop.eup %5034 }
 0xd66   : > { %v2127_v45 = vmul.f32 %v5033_v36, %v2126_v41  ;;  %v2135_v48 = vmul.f32 %v5035_v43, %v2121_v46 }
 0xd68   : > { %v2128_v49 = vmul.f32 %v2127_v45, %v2120_v38  ;;  %v2136_v51 = vmul.f32 %v5035_v43, %v2135_v48 }
 0xd6a   : > { %v2130_v53 = vsel %vm2129_vm1, %v2120_v38, %v2128_v49  ;;  %v2137_v29 = vmul.f32 0.5, %v2136_v51 }
 0xd6b   : > { %v2133_v54 = vsel %vm2131_vm2, %v2132_v52, %v2130_v53 }
 0xd6c   : > { %v2138_v24 = vsub.f32 1.5, %v2137_v29  ;;  %v2146_v59 = vadd.f32 1e-06, %v2133_v54 }
 0xd6e   : > { %v2139_v58 = vmul.f32 %v5035_v43, %v2138_v24  ;;  %5036 = vrcp.f32 %v2146_v59 }
 0xd70   : > { %v2140_v34 = vmul.f32 %v2139_v58, %v2121_v46 }
 0xd72   : > { %v2142_v57 = vsel %vm2141_vm3, %v2121_v46, %v2140_v34 }
 0xd73   : > { %v2145_v63 = vsel %vm2143_vm4, %v2144_v61, %v2142_v57 }
 0xd74   : > { %v2147_v39 = vadd.f32 1e-06, %v2145_v63  ;;  %v5037_v13 = vpop.eup %5036 }
 0xd75   : > { %v2153_v22 = vmul.f32 %v5037_v13, %v2151_v62 }
 0xd76   : > { %5038 = vrcp.f32 %v2147_v39 }
 0xd77   : > { %v2156_v19 = vadd.f32 %v2155_v44, %v2153_v22  ;;  %v2260_v22 = vld [vmem:[%s1186_s5] sm:$0x3] }
 0xd78   : > { %v2314_v23 = vperm.slane %v2260_v22, 1 }
 0xd7c   : > { %v5039_v18 = vpop.eup %5038 }
 0xd7d   : > { %v2154_v50 = vmul.f32 %v5039_v18, %v2152_v15 }
 0xd7f   : > { %v2157_v20 = vadd.f32 %v2155_v44, %v2154_v50 }
 0xd81   : > { %v2158_v55 = vpack.c.bf16 %v2157_v20, %v2156_v19  ;;  %v2309_v20 = vperm.slane %v2260_v22, 0 }
 0xd83   : > { %4584 = vmatmul.msk.bf16.vlgmr.msra.gmra.mxu1 %vm1212_vm0, %v2158_v55 }
 0xe00   : > { %v2193_v47 = vpop.f32.mrf.mxu1 }
 0xe01   : > { %v2194_v56 = vadd.f32 %v4940_v25, %v2193_v47 }
 0xe03   : > { %v2198_v32 = vmax.f32 %v2194_v56, 0.0 }
 0xe08   : > { %v2195_v26 = vpop.f32.mrf.mxu1 }
 0xe09   : > { %v2196_v30 = vadd.f32 %v4940_v25, %v2195_v26 }
 0xe0b   : > { %v2199_v9 = vmax.f32 %v2196_v30, 0.0 }
 0xe0d   : > { %v2200_v16 = vpack.c.bf16 %v2199_v9, %v2198_v32 }
 0xe0f   : > { %4609 = vmatmul.msk.bf16.vlgmr.msra.gmra.mxu2 %vm1710_vm11, %v2200_v16 }
 0xe92   : > { %v2246_v27 = vpop.f32.mrf.mxu2 }
 0xe93   : > { %v2251_v35 = vadd.f32 %v2246_v27, %v5800_v14 }
 0xe95   : > { %v2258_v0 = vadd.f32 %v4941_v31, %v2251_v35 }
 0xe97   : > { %v2261_v37 = vsel %vm1212_vm0, %v2258_v0, 0.0 }
 0xe98   : > { %2262 = vadd.xlane.f32.xlu0 %v2261_v37 }
 0xe9a   : > { %v2248_v38 = vpop.f32.mrf.mxu2 }
 0xe9b   : > { %v2252_v42 = vadd.f32 %v2248_v38, %v5805_v17 }
 0xe9d   : > { %v2259_v36 = vadd.f32 %v4941_v31, %v2252_v42 }
 0xe9f   : > { %v2264_v46 = vsel %vm1212_vm0, %v2259_v36, 0.0 }
 0xea0   : > { %2265 = vadd.xlane.f32.xlu1 %v2264_v46 }
 0xf0b   : > { %v2263_v33 = vpop.xlane.xlu0 %2262 }
 0xf0c   : > { %v2267_v2 = vmul.f32 %v2263_v33, %v5514_v10 }
 0xf0e   : > { %v2269_v40 = vsub.f32 %v2258_v0, %v2267_v2 }
 0xf10   : > { %v2271_v41 = vmul.f32 %v2269_v40, %v2269_v40  ;;  %v2310_v60 = vmul.f32 %v2309_v20, %v2269_v40 }
 0xf12   : > { %v2273_v43 = vsel %vm1212_vm0, %v2271_v41, 0.0 }
 0xf13   : > { %2274 = vadd.xlane.f32.xlu0 %v2273_v43  ;;  %v2266_v14 = vpop.xlane.xlu1 %2265 }
 0xf14   : > { %v2268_v45 = vmul.f32 %v2266_v14, %v5514_v10 }
 0xf16   : > { %v2270_v48 = vsub.f32 %v2259_v36, %v2268_v45 }
 0xf18   : > { %v2272_v49 = vmul.f32 %v2270_v48, %v2270_v48  ;;  %v2311_v32 = vmul.f32 %v2309_v20, %v2270_v48 }
 0xf1a   : > { %v2276_v51 = vsel %vm1212_vm0, %v2272_v49, 0.0 }
 0xf1b   : > { %2277 = vadd.xlane.f32.xlu1 %v2276_v51 }
 0xf86   : > { %v2275_v17 = vpop.xlane.xlu0 %2274 }
 0xf87   : > { %v2279_v52 = vmul.f32 0.032258064, %v2275_v17 }
 0xf89   : > { %5040 = vrsqrt.f32 %v2279_v52  ;;  %vm2288_vm5 = vcmp.eq.f32.partialorder %v2279_v52, inf  ;;  %v2291_v13 = vand.u32 2147483648, %v2279_v52  ;;  %vm2290_vm7 = vcmp.eq.f32.partialorder %v2279_v52, 0.0 }
 0xf8e   : > { %v2278_v53 = vpop.xlane.xlu1 %2277 }
 0xf8f   : > { %v5041_v29 = vpop.eup %5040  ;;  %v2280_v54 = vmul.f32 0.032258064, %v2278_v53 }
 0xf90   : > { %v2282_v24 = vmul.f32 %v5041_v29, %v2279_v52 }
 0xf91   : > { %5042 = vrsqrt.f32 %v2280_v54  ;;  %vm2300_vm8 = vcmp.eq.f32.partialorder %v2280_v54, inf  ;;  %v2303_v21 = vand.u32 2147483648, %v2280_v54  ;;  %vm2302_vm9 = vcmp.eq.f32.partialorder %v2280_v54, 0.0 }
 0xf92   : > { %v2283_v58 = vmul.f32 %v5041_v29, %v2282_v24 }
 0xf94   : > { %v2284_v59 = vmul.f32 0.5, %v2283_v58 }
 0xf96   : > { %v2285_v34 = vsub.f32 1.5, %v2284_v59 }
 0xf97   : > { %v5043_v61 = vpop.eup %5042 }
 0xf98   : > { %v2286_v57 = vmul.f32 %v5041_v29, %v2285_v34  ;;  %v2294_v63 = vmul.f32 %v5043_v61, %v2280_v54 }
 0xf9a   : > { %v2287_v39 = vmul.f32 %v2286_v57, %v2279_v52  ;;  %v2295_v28 = vmul.f32 %v5043_v61, %v2294_v63 }
 0xf9c   : > { %v2289_v62 = vsel %vm2288_vm5, %v2279_v52, %v2287_v39  ;;  %v2296_v44 = vmul.f32 0.5, %v2295_v28 }
 0xf9d   : > { %v2292_v15 = vsel %vm2290_vm7, %v2291_v13, %v2289_v62 }
 0xf9e   : > { %v2305_v18 = vadd.f32 1e-06, %v2292_v15  ;;  %v2297_v50 = vsub.f32 1.5, %v2296_v44 }
 0xfa0   : > { %5044 = vrcp.f32 %v2305_v18  ;;  %v2298_v19 = vmul.f32 %v5043_v61, %v2297_v50 }
 0xfa2   : > { %v2299_v55 = vmul.f32 %v2298_v19, %v2280_v54 }
 0xfa4   : > { %v2301_v5 = vsel %vm2300_vm8, %v2280_v54, %v2299_v55 }
 0xfa5   : > { %v2304_v47 = vsel %vm2302_vm9, %v2303_v21, %v2301_v5 }
 0xfa6   : > { %v5045_v25 = vpop.eup %5044  ;;  %v2306_v56 = vadd.f32 1e-06, %v2304_v47 }
 0xfa7   : > { %v2312_v26 = vmul.f32 %v5045_v25, %v2310_v60 }
 0xfa8   : > { %5046 = vrcp.f32 %v2306_v56 }
 0xfa9   : > { %v5837_v30 = vadd.f32 %v2314_v23, %v2312_v26 }
 0xfad   : > { %2320 = sbr.rel (%p4611_p4) target bundleno = 4020 (0xfb4), region = 152 }
 0xfae   : > { %v5047_v9 = vpop.eup %5046 }
 0xfaf   : > { %v2313_v16 = vmul.f32 %v5047_v9, %v2311_v32 }
 0xfb1   : > { %v5839_v31 = vadd.f32 %v2314_v23, %v2313_v16 }
 0xfb2   : > { %2321 = vst.msk [vmem:[%s5504_s10] sm:$0xff] %vm1212_vm0, %v5837_v30 }
 0xfb3   : > { %2322 = vst.msk [vmem:[%s5504_s10 + $0x8] sm:$0xff] %vm1212_vm0, %v5839_v31 }
 0xfb4 PF: > { %p4612_p5 = scmp.ne.s32.totalorder %s5493_s1, 0 }
 0xfb5   : > { %s6313_s11 = sld [smem:[#allocation9_spill]] (!%p4612_p5)  ;;  %s6281_s18 = smov (!%p4612_p5), 96  }
 0xfb6   : > { %2326 = sbr.rel (%p4612_p5) target bundleno = 10272 (0x2820), region = 156  ;;  %s6314_s1 = sld [smem:[#allocation10_spill]] (!%p4612_p5) }
 0xfb7   : > { %s6315_s15 = sld [smem:[#allocation7_spill]] (!%p4612_p5)  ;;  %s6280_s23 = smov (!%p4612_p5), 64  }
 0xfb8   : > { %s6316_s26 = sld [smem:[#allocation11_spill]] (!%p4612_p5)  ;;  %s6329_s9 = smov (!%p4612_p5), 64  }
 0xfb9   : > { %s6317_s2 = sld [smem:[#allocation12_spill]] (!%p4612_p5) }
 0xfba   : > { %s6318_s22 = sld [smem:[#allocation15_spill]] (!%p4612_p5) }
 0xfbb   : > { %v5850_v27 = vld [vmem:[%s6305_s6] sm:$0xff]  ;;  %v5855_v0 = vld [vmem:[%s6305_s6 + $0x8] sm:$0xff]  ;;  %s6319_s7 = sld [smem:[#allocation13_spill]] }
 0xfbc   : > { %v2347_v35 = vsel %vm1212_vm0, %v5850_v27, 0.0  ;;  %v2350_v37 = vsel %vm1212_vm0, %v5855_v0, 0.0  ;;  %v4858_v45 = vld [vmem:[%s6313_s11 + $0x8] sm:$0xff]  ;;  %v4857_v48 = vld [vmem:[%s6313_s11] sm:$0xff]  ;;  %s6320_s16 = sld [smem:[#allocation16_spill]] }
 0xfbd   : > { %2348 = vadd.xlane.f32.xlu0 %v2347_v35  ;;  %2433 = vmatpush.bf16.msra.mxu0 %v4858_v45  ;;  %v5868_v19 = vld [vmem:[%s5475_s12] sm:$0x3f]  ;;  %s6321_s3 = sld [smem:[#allocation14_spill]] }
 0xfbe   : > { %v2395_v5 = vperm.slane %v5868_v19, 0  ;;  %v2400_v56 = vperm.slane %v5868_v19, 1  ;;  %s6322_s0 = sld [smem:[#allocation8_spill]] }
 0xfbf   : > { %s6323_s5 = sld [smem:[#allocation17_spill]] }
 0xfc0   : > { %s6326_s6 = sld [smem:[#allocation21_spill]] }
 0xfc1   : > { %2434 = vmatpush.bf16.msra.mxu0 %v4857_v48  ;;  %s6327_s8 = sld [smem:[#allocation20_spill]] }
 0xfc5   : > { %2351 = vadd.xlane.f32.xlu0 %v2350_v37 }
0x1030   : > { %v2349_v38 = vpop.xlane.xlu0 %2348 }
0x1031   : > { %v2353_v42 = vmul.f32 %v2349_v38, %v5514_v10  ;;  %v5056_v38 = vld [vmem:[%s6314_s1] ss:$0 sm:$0xff] }
0x1033   : > { %v2355_v36 = vsub.f32 %v5850_v27, %v2353_v42 }
0x1035   : > { %v2357_v46 = vmul.f32 %v2355_v36, %v2355_v36  ;;  %v2396_v60 = vmul.f32 %v2395_v5, %v2355_v36 }
0x1037   : > { %v2359_v33 = vsel %vm1212_vm0, %v2357_v46, 0.0 }
0x1038   : > { %2360 = vadd.xlane.f32.xlu1 %v2359_v33  ;;  %v2352_v2 = vpop.xlane.xlu0 %2351 }
0x1039   : > { %v2354_v40 = vmul.f32 %v2352_v2, %v5514_v10 }
0x103b   : > { %v2356_v41 = vsub.f32 %v5855_v0, %v2354_v40 }
0x103d   : > { %v2358_v43 = vmul.f32 %v2356_v41, %v2356_v41  ;;  %v2397_v47 = vmul.f32 %v2395_v5, %v2356_v41 }
0x103f   : > { %v2362_v14 = vsel %vm1212_vm0, %v2358_v43, 0.0 }
0x1040   : > { %2363 = vadd.xlane.f32.xlu1 %v2362_v14 }
0x10ab   : > { %v2361_v49 = vpop.xlane.xlu1 %2360 }
0x10ac   : > { %v2365_v51 = vmul.f32 0.032258064, %v2361_v49 }
0x10ae   : > { %5070 = vrsqrt.f32 %v2365_v51  ;;  %vm2374_vm10 = vcmp.eq.f32.partialorder %v2365_v51, inf  ;;  %v2377_v39 = vand.u32 2147483648, %v2365_v51  ;;  %vm2376_vm12 = vcmp.eq.f32.partialorder %v2365_v51, 0.0 }
0x10b3   : > { %v2364_v17 = vpop.xlane.xlu1 %2363 }
0x10b4   : > { %v5071_v52 = vpop.eup %5070  ;;  %v2366_v53 = vmul.f32 0.032258064, %v2364_v17 }
0x10b5   : > { %v2368_v29 = vmul.f32 %v5071_v52, %v2365_v51 }
0x10b6   : > { %5072 = vrsqrt.f32 %v2366_v53  ;;  %vm2386_vm13 = vcmp.eq.f32.partialorder %v2366_v53, inf  ;;  %v2389_v50 = vand.u32 2147483648, %v2366_v53  ;;  %vm2388_vm14 = vcmp.eq.f32.partialorder %v2366_v53, 0.0 }
0x10b7   : > { %v2369_v54 = vmul.f32 %v5071_v52, %v2368_v29 }
0x10b9   : > { %v2370_v24 = vmul.f32 0.5, %v2369_v54 }
0x10bb   : > { %v2371_v58 = vsub.f32 1.5, %v2370_v24 }
0x10bc   : > { %v5073_v59 = vpop.eup %5072 }
0x10bd   : > { %v2380_v34 = vmul.f32 %v5073_v59, %v2366_v53  ;;  %v2372_v61 = vmul.f32 %v5071_v52, %v2371_v58  ;;  %v2330_v58 = vld [vmem:[%s6315_s15] sm:$0xff] }
0x10bf   : > { %v2373_v57 = vmul.f32 %v2372_v61, %v2365_v51  ;;  %v2381_v63 = vmul.f32 %v5073_v59, %v2380_v34 }
0x10c1   : > { %v2375_v28 = vsel %vm2374_vm10, %v2365_v51, %v2373_v57  ;;  %v2382_v13 = vmul.f32 0.5, %v2381_v63  ;;  %v2331_v63 = vld [vmem:[%s6315_s15 + $0x8] sm:$0xff] }
0x10c2   : > { %v2378_v62 = vsel %vm2376_vm12, %v2377_v39, %v2375_v28 }
0x10c3   : > { %v2383_v44 = vsub.f32 1.5, %v2382_v13  ;;  %v2391_v22 = vadd.f32 1e-06, %v2378_v62 }
0x10c5   : > { %v2384_v15 = vmul.f32 %v5073_v59, %v2383_v44  ;;  %5074 = vrcp.f32 %v2391_v22  ;;  %v2332_v44 = vld [vmem:[%s6315_s15 + $0x10] sm:$0xff] }
0x10c7   : > { %v2385_v18 = vmul.f32 %v2384_v15, %v2366_v53 }
0x10c9   : > { %v2387_v20 = vsel %vm2386_vm13, %v2366_v53, %v2385_v18 }
0x10ca   : > { %v2390_v55 = vsel %vm2388_vm14, %v2389_v50, %v2387_v20  ;;  %v2333_v20 = vld [vmem:[%s6315_s15 + $0x18] sm:$0xff] }
0x10cb   : > { %v2392_v21 = vadd.f32 1e-06, %v2390_v55  ;;  %v5075_v23 = vpop.eup %5074 }
0x10cc   : > { %v2398_v25 = vmul.f32 %v5075_v23, %v2396_v60  ;;  %v2334_v60 = vld [vmem:[%s6315_s15 + $0x20] sm:$0xff] }
0x10cd   : > { %5076 = vrcp.f32 %v2392_v21 }
0x10ce   : > { %v2401_v9 = vadd.f32 %v2400_v56, %v2398_v25 }
0x10d3   : > { %v5077_v26 = vpop.eup %5076 }
0x10d4   : > { %v2399_v32 = vmul.f32 %v5077_v26, %v2397_v47 }
0x10d6   : > { %v2402_v16 = vadd.f32 %v2400_v56, %v2399_v32  ;;  %v2335_v32 = vld [vmem:[%s6315_s15 + $0x28] sm:$0xff] }
0x10d8   : > { %v2403_v35 = vpack.c.bf16 %v2402_v16, %v2401_v9 }
0x10da   : > { %4621 = vmatmul.msk.bf16.vlgmr.msra.gmra.mxu0 %vm1212_vm0, %v2403_v35 }
0x1157   : > { %v2436_v37 = vpop.f32.mrf.mxu0 }
0x1158   : > { %v2437_v42 = vadd.f32 %v5056_v38, %v2436_v37 }
0x115a   : > { %v2446_v2 = vmul.f32 %v2437_v42, %v5550_v1  ;;  %v2448_v36 = vmul.f32 %v2437_v42, %v5553_v3  ;;  %v2450_v40 = vmul.f32 %v2437_v42, %v5556_v4  ;;  %v2452_v48 = vmul.f32 %v2437_v42, %v5568_v11 }
0x115f   : > { %v2438_v46 = vpop.f32.mrf.mxu0 }
0x1160   : > { %v2439_v33 = vadd.f32 %v5056_v38, %v2438_v46  ;;  %v2336_v38 = vld [vmem:[%s6315_s15 + $0x30] sm:$0xff] }
0x1162   : > { %v5877_v41 = vpack.c.bf16 %v2439_v33, %v2437_v42  ;;  %v2447_v43 = vmul.f32 %v2439_v33, %v5559_v6  ;;  %v2449_v14 = vmul.f32 %v2439_v33, %v5562_v7  ;;  %v2451_v45 = vmul.f32 %v2439_v33, %v5565_v8 }
0x1163   : > { %v2453_v49 = vmul.f32 %v2439_v33, %v5571_v12 }
0x1164   : > { %2460 = vrot.lane.b32.xlu2 %v5877_v41, %s6281_s18  ;;  %v2454_v51 = vpack.c.bf16 %v2447_v43, %v2446_v2  ;;  %v2455_v17 = vpack.c.bf16 %v2449_v14, %v2448_v36  ;;  %v2456_v52 = vpack.c.bf16 %v2451_v45, %v2450_v40  ;;  %v2337_v36 = vld [vmem:[%s6315_s15 + $0x38] sm:$0xff] }
0x1165   : > { %v2457_v53 = vpack.c.bf16 %v2453_v49, %v2452_v48 }
0x11be   : > { %v2461_v29 = vpop.permute.xlu2 %2460 }
0x11bf   : > { %v2475_v54 = vsel %vm1212_vm0, %v2461_v29, 0 }
0x11c0   : > { %2484 = vmatpush.bf16.xpose.msra.mxu1 %v2475_v54 }
0x11c7   : > { %4622 = vmatmul.msk.bf16.vlgmr.msra.gmra.mxu1 %vm1212_vm0, %v2454_v51 }
0x11d7   : > { %4623 = vmatmul.msk.bf16.gmra.mxu1 %vm1212_vm0, %v2455_v17 }
0x11e7   : > { %4624 = vmatmul.msk.bf16.gmra.mxu1 %vm1212_vm0, %v2456_v52 }
0x11f7   : > { %4625 = vmatmul.msk.bf16.gmra.mxu1 %vm1212_vm0, %v2457_v53 }
0x1244   : > { %v2486_v24 = vpop.f32.mrf.mxu1 }
0x1245   : > { %v2506_v59 = vmul.f32 0.35355338, %v2486_v24 }
0x1247   : > { %v2514_v34 = vadd.f32 %v2506_v59, %v2330_v58 }
0x1249   : > { %v2522_v61 = vsel %vm1395_vm6, %v2514_v34, -inf }
0x124a   : > { %2523 = vmax.xlane.f32.xlu2 %v2522_v61 }
0x124c   : > { %v2488_v57 = vpop.f32.mrf.mxu1 }
0x124d   : > { %v2507_v39 = vmul.f32 0.35355338, %v2488_v57 }
0x124f   : > { %v2515_v28 = vadd.f32 %v2507_v39, %v2331_v63 }
0x1251   : > { %v2525_v13 = vsel %vm1395_vm6, %v2515_v28, -inf }
0x1252   : > { %2526 = vmax.xlane.f32.xlu0 %v2525_v13 }
0x1254   : > { %v2491_v62 = vpop.f32.mrf.mxu1 }
0x1255   : > { %v2508_v15 = vmul.f32 0.35355338, %v2491_v62 }
0x1257   : > { %v2516_v22 = vadd.f32 %v2508_v15, %v2332_v44 }
0x1259   : > { %v2528_v18 = vsel %vm1395_vm6, %v2516_v22, -inf }
0x125a   : > { %2529 = vmax.xlane.f32.xlu1 %v2528_v18 }
0x125c   : > { %v2493_v50 = vpop.f32.mrf.mxu1 }
0x125d   : > { %v2509_v55 = vmul.f32 0.35355338, %v2493_v50 }
0x125f   : > { %v2517_v21 = vadd.f32 %v2509_v55, %v2333_v20 }
0x1261   : > { %v2531_v5 = vsel %vm1395_vm6, %v2517_v21, -inf }
0x1262   : > { %2532 = vmax.xlane.f32.xlu0 %v2531_v5 }
0x1264   : > { %v2496_v23 = vpop.f32.mrf.mxu1 }
0x1265   : > { %v2510_v47 = vmul.f32 0.35355338, %v2496_v23 }
0x1267   : > { %v2518_v25 = vadd.f32 %v2510_v47, %v2334_v60 }
0x1269   : > { %v2534_v56 = vsel %vm1395_vm6, %v2518_v25, -inf }
0x126a   : > { %2535 = vmax.xlane.f32.xlu1 %v2534_v56 }
0x126c   : > { %v2498_v26 = vpop.f32.mrf.mxu1 }
0x126d   : > { %v2511_v9 = vmul.f32 0.35355338, %v2498_v26 }
0x126f   : > { %v2519_v16 = vadd.f32 %v2511_v9, %v2335_v32 }
0x1271   : > { %v2537_v35 = vsel %vm1395_vm6, %v2519_v16, -inf }
0x1272   : > { %2538 = vmax.xlane.f32.xlu0 %v2537_v35 }
0x1274   : > { %v2501_v37 = vpop.f32.mrf.mxu1 }
0x1275   : > { %v2512_v42 = vmul.f32 0.35355338, %v2501_v37 }
0x1277   : > { %v2520_v46 = vadd.f32 %v2512_v42, %v2336_v38 }
0x1279   : > { %v2540_v33 = vsel %vm1395_vm6, %v2520_v46, -inf }
0x127a   : > { %2541 = vmax.xlane.f32.xlu1 %v2540_v33 }
0x127c   : > { %v2503_v2 = vpop.f32.mrf.mxu1 }
0x127d   : > { %v2513_v40 = vmul.f32 0.35355338, %v2503_v2 }
0x127f   : > { %v2521_v43 = vadd.f32 %v2513_v40, %v2337_v36 }
0x1281   : > { %v2543_v14 = vsel %vm1395_vm6, %v2521_v43, -inf }
0x1282   : > { %2544 = vmax.xlane.f32.xlu0 %v2543_v14 }
0x12bd   : > { %v2524_v45 = vpop.xlane.xlu2 %2523 }
0x12be   : > { %v2546_v48 = vsub.f32 %v2514_v34, %v2524_v45 }
0x12c0   : > { %v2554_v49 = vmul.f32 1.442695, %v2546_v48 }
0x12c2   : > { %5078 = vpow2.f32 %v2554_v49 }
0x12c5   : > { %v2527_v51 = vpop.xlane.xlu0 %2526 }
0x12c6   : > { %v2547_v17 = vsub.f32 %v2515_v28, %v2527_v51 }
0x12c8   : > { %v5079_v52 = vpop.eup %5078  ;;  %v2556_v53 = vmul.f32 1.442695, %v2547_v17 }
0x12c9   : > { %v2570_v29 = vsel %vm1395_vm6, %v5079_v52, 0.0 }
0x12ca   : > { %5080 = vpow2.f32 %v2556_v53  ;;  %2571 = vadd.xlane.f32.xlu1 %v2570_v29 }
0x12cd   : > { %v2530_v54 = vpop.xlane.xlu1 %2529 }
0x12ce   : > { %v2548_v24 = vsub.f32 %v2516_v22, %v2530_v54 }
0x12d0   : > { %v5081_v58 = vpop.eup %5080  ;;  %v2558_v59 = vmul.f32 1.442695, %v2548_v24 }
0x12d1   : > { %v2573_v61 = vsel %vm1395_vm6, %v5081_v58, 0.0 }
0x12d2   : > { %5082 = vpow2.f32 %v2558_v59  ;;  %2574 = vadd.xlane.f32.xlu0 %v2573_v61 }
0x12d5   : > { %v2533_v57 = vpop.xlane.xlu0 %2532 }
0x12d6   : > { %v2549_v34 = vsub.f32 %v2517_v21, %v2533_v57 }
0x12d8   : > { %v5083_v63 = vpop.eup %5082  ;;  %v2560_v39 = vmul.f32 1.442695, %v2549_v34 }
0x12d9   : > { %v2576_v28 = vsel %vm1395_vm6, %v5083_v63, 0.0 }
0x12da   : > { %5084 = vpow2.f32 %v2560_v39  ;;  %2577 = vadd.xlane.f32.xlu2 %v2576_v28 }
0x12dd   : > { %v2536_v13 = vpop.xlane.xlu1 %2535 }
0x12de   : > { %v2550_v62 = vsub.f32 %v2518_v25, %v2536_v13 }
0x12e0   : > { %v5085_v44 = vpop.eup %5084  ;;  %v2562_v15 = vmul.f32 1.442695, %v2550_v62 }
0x12e1   : > { %v2579_v22 = vsel %vm1395_vm6, %v5085_v44, 0.0 }
0x12e2   : > { %5086 = vpow2.f32 %v2562_v15  ;;  %2580 = vadd.xlane.f32.xlu0 %v2579_v22  ;;  %v4860_v22 = vld [vmem:[%s6316_s26 + $0x8] sm:$0xff] }
0x12e3   : > { %2614 = vrot.lane.b32.xlu1 %v5877_v41, %s6280_s23  ;;  %2697 = vmatpush.bf16.msra.mxu3 %v4860_v22  ;;  %s6324_s23 = sld [smem:[#allocation18_spill]] }
0x12e5   : > { %v2539_v18 = vpop.xlane.xlu0 %2538 }
0x12e6   : > { %v2551_v50 = vsub.f32 %v2519_v16, %v2539_v18 }
0x12e8   : > { %v5087_v20 = vpop.eup %5086  ;;  %v2564_v55 = vmul.f32 1.442695, %v2551_v50  ;;  %v4859_v50 = vld [vmem:[%s6316_s26] sm:$0xff] }
0x12e9   : > { %v2582_v21 = vsel %vm1395_vm6, %v5087_v20, 0.0  ;;  %2698 = vmatpush.bf16.msra.mxu3 %v4859_v50 }
0x12ea   : > { %5088 = vpow2.f32 %v2564_v55  ;;  %2583 = vadd.xlane.f32.xlu2 %v2582_v21 }
0x12ed   : > { %v2542_v5 = vpop.xlane.xlu1 %2541 }
0x12ee   : > { %v2552_v23 = vsub.f32 %v2520_v46, %v2542_v5 }
0x12f0   : > { %v5089_v60 = vpop.eup %5088  ;;  %v2566_v47 = vmul.f32 1.442695, %v2552_v23 }
0x12f1   : > { %v2585_v25 = vsel %vm1395_vm6, %v5089_v60, 0.0 }
0x12f2   : > { %5090 = vpow2.f32 %v2566_v47  ;;  %2586 = vadd.xlane.f32.xlu0 %v2585_v25 }
0x12f5   : > { %v2545_v56 = vpop.xlane.xlu0 %2544 }
0x12f6   : > { %v2553_v26 = vsub.f32 %v2521_v43, %v2545_v56 }
0x12f8   : > { %v5091_v32 = vpop.eup %5090  ;;  %v2568_v41 = vmul.f32 1.442695, %v2553_v26 }
0x12f9   : > { %v2588_v9 = vsel %vm1395_vm6, %v5091_v32, 0.0 }
0x12fa   : > { %5092 = vpow2.f32 %v2568_v41  ;;  %2589 = vadd.xlane.f32.xlu2 %v2588_v9 }
0x1300   : > { %v5093_v16 = vpop.eup %5092 }
0x1301   : > { %v2591_v35 = vsel %vm1395_vm6, %v5093_v16, 0.0 }
0x1302   : > { %2592 = vadd.xlane.f32.xlu0 %v2591_v35 }
0x133d   : > { %v2572_v38 = vpop.xlane.xlu1 %2571 }
0x1345   : > { %v2575_v37 = vpop.xlane.xlu0 %2574 }
0x1346   : > { %5094 = vrcp.f32 %v2575_v37 }
0x1347   : > { %5096 = vrcp.f32 %v2572_v38 }
0x134c   : > { %v5095_v42 = vpop.eup %5094 }
0x134d   : > { %v5097_v46 = vpop.eup %5096  ;;  %v2603_v33 = vmul.f32 %v5095_v42, %v5081_v58  ;;  %v2578_v14 = vpop.xlane.xlu2 %2577 }
0x134e   : > { %v2602_v36 = vmul.f32 %v5097_v46, %v5079_v52 }
0x1350   : > { %v2610_v43 = vpack.c.bf16 %v2603_v33, %v2602_v36  ;;  %v5057_v33 = vld [vmem:[%s6317_s2] ss:$0 sm:$0xff] }
0x1355   : > { %v2615_v2 = vpop.permute.xlu1 %2614  ;;  %v2581_v40 = vpop.xlane.xlu0 %2580 }
0x1356   : > { %2636 = vmatpush.bf16.msra.mxu2 %v2615_v2  ;;  %5098 = vrcp.f32 %v2581_v40 }
0x1357   : > { %5100 = vrcp.f32 %v2578_v14 }
0x1359   : > { %4626 = vmatmul.msk.bf16.vlgmr.msra.gmra.mxu2 %vm1395_vm6, %v2610_v43 }
0x135c   : > { %v5099_v45 = vpop.eup %5098 }
0x135d   : > { %v5101_v48 = vpop.eup %5100  ;;  %v2605_v49 = vmul.f32 %v5099_v45, %v5085_v44  ;;  %v2584_v29 = vpop.xlane.xlu2 %2583 }
0x135e   : > { %v2604_v51 = vmul.f32 %v5101_v48, %v5083_v63 }
0x1360   : > { %v2611_v53 = vpack.c.bf16 %v2605_v49, %v2604_v51 }
0x1365   : > { %v2587_v17 = vpop.xlane.xlu0 %2586 }
0x1366   : > { %5102 = vrcp.f32 %v2587_v17 }
0x1367   : > { %5104 = vrcp.f32 %v2584_v29 }
0x1369   : > { %4627 = vmatmul.msk.bf16.gmra.mxu2 %vm1395_vm6, %v2611_v53 }
0x136c   : > { %v5103_v52 = vpop.eup %5102 }
0x136d   : > { %v5105_v54 = vpop.eup %5104  ;;  %v2607_v24 = vmul.f32 %v5103_v52, %v5089_v60  ;;  %v2590_v57 = vpop.xlane.xlu2 %2589 }
0x136e   : > { %v2606_v58 = vmul.f32 %v5105_v54, %v5087_v20 }
0x1370   : > { %v2612_v61 = vpack.c.bf16 %v2607_v24, %v2606_v58 }
0x1375   : > { %v2593_v59 = vpop.xlane.xlu0 %2592 }
0x1376   : > { %5106 = vrcp.f32 %v2593_v59  ;;  %v4864_v59 = vld [vmem:[%s6318_s22 + $0x8] sm:$0xff] }
0x1377   : > { %5108 = vrcp.f32 %v2590_v57  ;;  %2830 = vmatpush.bf16.msrb.mxu3 %v4864_v59  ;;  %v4863_v57 = vld [vmem:[%s6318_s22] sm:$0xff] }
0x1379   : > { %4628 = vmatmul.msk.bf16.gmra.mxu2 %vm1395_vm6, %v2612_v61  ;;  %v4862_v61 = vld [vmem:[%s6319_s7 + $0x8] sm:$0xff] }
0x137a   : > { %2793 = vmatpush.bf16.msrb.mxu0 %v4862_v61 }
0x137b   : > { %2831 = vmatpush.bf16.msrb.mxu3 %v4863_v57 }
0x137c   : > { %v5107_v34 = vpop.eup %5106 }
0x137d   : > { %v5109_v63 = vpop.eup %5108  ;;  %v2609_v39 = vmul.f32 %v5107_v34, %v5093_v16  ;;  %v4861_v34 = vld [vmem:[%s6319_s7] sm:$0xff] }
0x137e   : > { %v2608_v28 = vmul.f32 %v5109_v63, %v5091_v32  ;;  %v5955_v63 = vpack.c.bf16 %v5839_v31, %v5837_v30  ;;  %2794 = vmatpush.bf16.msrb.mxu0 %v4861_v34 }
0x1380   : > { %v2613_v13 = vpack.c.bf16 %v2609_v39, %v2608_v28 }
0x1389   : > { %4629 = vmatmul.msk.bf16.gmra.mxu2 %vm1395_vm6, %v2613_v13 }
0x13dc   : > { %v2638_v62 = vpop.f32.mrf.mxu2 }
0x13dd   : > { %v2658_v60 = vmul.f32 %v2638_v62, %v5550_v1 }
0x13e4   : > { %v2640_v44 = vpop.f32.mrf.mxu2 }
0x13e5   : > { %v2659_v47 = vmul.f32 %v2640_v44, %v5559_v6 }
0x13ec   : > { %v2643_v15 = vpop.f32.mrf.mxu2 }
0x13ed   : > { %v2660_v5 = vmul.f32 %v2643_v15, %v5553_v3 }
0x13ef   : > { %v2666_v26 = vadd.f32 %v2660_v5, %v2658_v60 }
0x13f4   : > { %v2645_v18 = vpop.f32.mrf.mxu2 }
0x13f5   : > { %v2661_v23 = vmul.f32 %v2645_v18, %v5562_v7 }
0x13f7   : > { %v2667_v32 = vadd.f32 %v2661_v23, %v2659_v47 }
0x13fc   : > { %v2648_v20 = vpop.f32.mrf.mxu2 }
0x13fd   : > { %v2662_v25 = vmul.f32 %v2648_v20, %v5556_v4 }
0x13ff   : > { %v2668_v16 = vadd.f32 %v2666_v26, %v2662_v25 }
0x1404   : > { %v2650_v55 = vpop.f32.mrf.mxu2 }
0x1405   : > { %v2663_v56 = vmul.f32 %v2650_v55, %v5565_v8 }
0x1407   : > { %v2669_v35 = vadd.f32 %v2667_v32, %v2663_v56 }
0x140c   : > { %v2653_v21 = vpop.f32.mrf.mxu2 }
0x140d   : > { %v2664_v41 = vmul.f32 %v2653_v21, %v5568_v11 }
0x140f   : > { %v2670_v38 = vadd.f32 %v2668_v16, %v2664_v41 }
0x1414   : > { %v2655_v9 = vpop.f32.mrf.mxu2 }
0x1415   : > { %v2665_v37 = vmul.f32 %v2655_v9, %v5571_v12 }
0x1417   : > { %v2671_v42 = vadd.f32 %v2669_v35, %v2665_v37  ;;  %v2755_v37 = vperm.slane %v5868_v19, 2 }
0x1419   : > { %v2672_v46 = vpack.c.bf16 %v2671_v42, %v2670_v38 }
0x141b   : > { %4638 = vmatmul.msk.bf16.vlgmr.msra.gmra.mxu3 %vm1212_vm0, %v2672_v46 }
0x142b   : > { %4656 = vmatmul.msk.bf16.vlgmr.msrb.gmra.mxu3 %vm1212_vm0, %v5955_v63 }
0x149e   : > { %v2700_v2 = vpop.f32.mrf.mxu3 }
0x149f   : > { %v2701_v36 = vadd.f32 %v5057_v33, %v2700_v2  ;;  %v2760_v2 = vperm.slane %v5868_v19, 3 }
0x14a1   : > { %v5934_v40 = vadd.f32 %v2701_v36, %v5850_v27 }
0x14a3   : > { %v2707_v43 = vsel %vm1212_vm0, %v5934_v40, 0.0 }
0x14a4   : > { %2708 = vadd.xlane.f32.xlu1 %v2707_v43 }
0x14a6   : > { %v2702_v14 = vpop.f32.mrf.mxu3 }
0x14a7   : > { %v2703_v45 = vadd.f32 %v5057_v33, %v2702_v14 }
0x14a9   : > { %v5939_v48 = vadd.f32 %v2703_v45, %v5855_v0 }
0x14ab   : > { %v2710_v49 = vsel %vm1212_vm0, %v5939_v48, 0.0 }
0x14ac   : > { %2711 = vadd.xlane.f32.xlu2 %v2710_v49 }
0x1517   : > { %v2709_v51 = vpop.xlane.xlu1 %2708 }
0x1518   : > { %v2713_v27 = vmul.f32 %v2709_v51, %v5514_v10  ;;  %v2833_v51 = vpop.f32.mrf.mxu3 }
0x151a   : > { %v2715_v17 = vsub.f32 %v5934_v40, %v2713_v27  ;;  %v5058_v27 = vld [vmem:[%s6320_s16] ss:$0 sm:$0xff] }
0x151c   : > { %v2717_v53 = vmul.f32 %v2715_v17, %v2715_v17  ;;  %v2756_v42 = vmul.f32 %v2755_v37, %v2715_v17 }
0x151e   : > { %v2719_v29 = vsel %vm1212_vm0, %v2717_v53, 0.0  ;;  %v2834_v53 = vadd.f32 %v5058_v27, %v2833_v51 }
0x151f   : > { %v2712_v52 = vpop.xlane.xlu2 %2711  ;;  %2720 = vadd.xlane.f32.xlu0 %v2719_v29 }
0x1520   : > { %v2714_v0 = vmul.f32 %v2712_v52, %v5514_v10  ;;  %v2835_v29 = vpop.f32.mrf.mxu3 }
0x1521   : > { %v2836_v52 = vadd.f32 %v5058_v27, %v2835_v29  ;;  %v2344_v29 = vld [vmem:[%s6322_s0 + $0x30] sm:$0xff] }
0x1522   : > { %v2716_v54 = vsub.f32 %v5939_v48, %v2714_v0 }
0x1523   : > { %v5963_v0 = vpack.c.bf16 %v2836_v52, %v2834_v53 }
0x1524   : > { %v2718_v24 = vmul.f32 %v2716_v54, %v2716_v54  ;;  %v2757_v46 = vmul.f32 %v2755_v37, %v2716_v54  ;;  %v5059_v54 = vld [vmem:[%s6321_s3] ss:$0 sm:$0xff] }
0x1525   : > { %v2869_v17 = vsel %vm1212_vm0, %v5963_v0, 0 }
0x1526   : > { %v2722_v58 = vsel %vm1212_vm0, %v2718_v24, 0.0  ;;  %2878 = vmatpush.bf16.xpose.msra.mxu0 %v2869_v17 }
0x1527   : > { %2723 = vadd.xlane.f32.xlu2 %v2722_v58 }
0x1592   : > { %v2721_v39 = vpop.xlane.xlu0 %2720 }
0x1593   : > { %v2725_v28 = vmul.f32 0.032258064, %v2721_v39 }
0x1595   : > { %5110 = vrsqrt.f32 %v2725_v28  ;;  %vm2734_vm15 = vcmp.eq.f32.partialorder %v2725_v28, inf  ;;  %v2737_v5 = vand.u32 2147483648, %v2725_v28  ;;  %vm2736_vm1 = vcmp.eq.f32.partialorder %v2725_v28, 0.0 }
0x159a   : > { %v2724_v13 = vpop.xlane.xlu2 %2723 }
0x159b   : > { %v5111_v62 = vpop.eup %5110  ;;  %v2726_v44 = vmul.f32 0.032258064, %v2724_v13 }
0x159c   : > { %v2728_v15 = vmul.f32 %v5111_v62, %v2725_v28 }
0x159d   : > { %5112 = vrsqrt.f32 %v2726_v44  ;;  %vm2746_vm2 = vcmp.eq.f32.partialorder %v2726_v44, inf  ;;  %v2749_v41 = vand.u32 2147483648, %v2726_v44  ;;  %vm2748_vm3 = vcmp.eq.f32.partialorder %v2726_v44, 0.0 }
0x159e   : > { %v2729_v22 = vmul.f32 %v5111_v62, %v2728_v15 }
0x15a0   : > { %v2730_v18 = vmul.f32 0.5, %v2729_v22 }
0x15a2   : > { %v2731_v50 = vsub.f32 1.5, %v2730_v18 }
0x15a3   : > { %v5113_v20 = vpop.eup %5112 }
0x15a4   : > { %v2740_v55 = vmul.f32 %v5113_v20, %v2726_v44  ;;  %v2732_v30 = vmul.f32 %v5111_v62, %v2731_v50 }
0x15a6   : > { %v2741_v31 = vmul.f32 %v5113_v20, %v2740_v55  ;;  %v2733_v21 = vmul.f32 %v2732_v30, %v2725_v28  ;;  %v2338_v55 = vld [vmem:[%s6322_s0] sm:$0xff] }
0x15a8   : > { %v2735_v23 = vsel %vm2734_vm15, %v2725_v28, %v2733_v21  ;;  %v2742_v60 = vmul.f32 0.5, %v2741_v31 }
0x15a9   : > { %v2738_v47 = vsel %vm2736_vm1, %v2737_v5, %v2735_v23  ;;  %v2339_v23 = vld [vmem:[%s6322_s0 + $0x8] sm:$0xff] }
0x15aa   : > { %v2743_v25 = vsub.f32 1.5, %v2742_v60  ;;  %v2751_v26 = vadd.f32 1e-06, %v2738_v47 }
0x15ac   : > { %v2744_v56 = vmul.f32 %v5113_v20, %v2743_v25  ;;  %5114 = vrcp.f32 %v2751_v26  ;;  %v2340_v26 = vld [vmem:[%s6322_s0 + $0x10] sm:$0xff] }
0x15ae   : > { %v2745_v32 = vmul.f32 %v2744_v56, %v2726_v44 }
0x15b0   : > { %v2747_v9 = vsel %vm2746_vm2, %v2726_v44, %v2745_v32 }
0x15b1   : > { %v2750_v16 = vsel %vm2748_vm3, %v2749_v41, %v2747_v9 }
0x15b2   : > { %v2752_v35 = vadd.f32 1e-06, %v2750_v16  ;;  %v5115_v38 = vpop.eup %5114 }
0x15b3   : > { %v2758_v33 = vmul.f32 %v5115_v38, %v2756_v42 }
0x15b4   : > { %5116 = vrcp.f32 %v2752_v35  ;;  %v2341_v35 = vld [vmem:[%s6322_s0 + $0x18] sm:$0xff] }
0x15b5   : > { %v2761_v14 = vadd.f32 %v2760_v2, %v2758_v33  ;;  %v2342_v33 = vld [vmem:[%s6322_s0 + $0x20] sm:$0xff] }
0x15ba   : > { %v5117_v36 = vpop.eup %5116 }
0x15bb   : > { %v2759_v43 = vmul.f32 %v5117_v36, %v2757_v46 }
0x15bd   : > { %v2762_v45 = vadd.f32 %v2760_v2, %v2759_v43 }
0x15bf   : > { %v2763_v49 = vpack.c.bf16 %v2762_v45, %v2761_v14  ;;  %v2343_v45 = vld [vmem:[%s6322_s0 + $0x28] sm:$0xff] }
0x15c1   : > { %4647 = vmatmul.msk.bf16.vlgmr.msrb.gmra.mxu0 %vm1212_vm0, %v2763_v49 }
0x163e   : > { %v2796_v19 = vpop.f32.mrf.mxu0 }
0x163f   : > { %v2797_v24 = vadd.f32 %v5059_v54, %v2796_v19 }
0x1641   : > { %v2843_v61 = vmul.f32 %v2797_v24, %v5550_v1  ;;  %v2845_v28 = vmul.f32 %v2797_v24, %v5553_v3  ;;  %v2847_v44 = vmul.f32 %v2797_v24, %v5556_v4  ;;  %v2849_v18 = vmul.f32 %v2797_v24, %v5568_v11  ;;  %v2345_v24 = vld [vmem:[%s6322_s0 + $0x38] sm:$0xff] }
0x1646   : > { %v2798_v58 = vpop.f32.mrf.mxu0 }
0x1647   : > { %v2799_v59 = vadd.f32 %v5059_v54, %v2798_v58 }
0x1649   : > { %v2844_v57 = vmul.f32 %v2799_v59, %v5559_v6  ;;  %v2846_v39 = vmul.f32 %v2799_v59, %v5562_v7  ;;  %v2848_v62 = vmul.f32 %v2799_v59, %v5565_v8  ;;  %v2850_v22 = vmul.f32 %v2799_v59, %v5571_v12 }
0x164b   : > { %v2851_v34 = vpack.c.bf16 %v2844_v57, %v2843_v61  ;;  %v2852_v13 = vpack.c.bf16 %v2846_v39, %v2845_v28  ;;  %v2853_v15 = vpack.c.bf16 %v2848_v62, %v2847_v44  ;;  %v2854_v50 = vpack.c.bf16 %v2850_v22, %v2849_v18 }
0x164d   : > { %4657 = vmatmul.msk.bf16.vlgmr.msra.gmra.mxu0 %vm1212_vm0, %v2851_v34 }
0x165d   : > { %4658 = vmatmul.msk.bf16.gmra.mxu0 %vm1212_vm0, %v2852_v13 }
0x166d   : > { %4659 = vmatmul.msk.bf16.gmra.mxu0 %vm1212_vm0, %v2853_v15 }
0x167d   : > { %4660 = vmatmul.msk.bf16.gmra.mxu0 %vm1212_vm0, %v2854_v50 }
0x16ca   : > { %v2880_v20 = vpop.f32.mrf.mxu0 }
0x16cb   : > { %v2900_v30 = vmul.f32 0.35355338, %v2880_v20 }
0x16cd   : > { %v2908_v31 = vadd.f32 %v2900_v30, %v2338_v55 }
0x16cf   : > { %v2916_v21 = vsel %vm1395_vm6, %v2908_v31, -inf }
0x16d0   : > { %2917 = vmax.xlane.f32.xlu0 %v2916_v21 }
0x16d2   : > { %v2882_v5 = vpop.f32.mrf.mxu0 }
0x16d3   : > { %v2901_v60 = vmul.f32 0.35355338, %v2882_v5 }
0x16d5   : > { %v2909_v47 = vadd.f32 %v2901_v60, %v2339_v23 }
0x16d7   : > { %v2919_v25 = vsel %vm1395_vm6, %v2909_v47, -inf }
0x16d8   : > { %2920 = vmax.xlane.f32.xlu2 %v2919_v25 }
0x16da   : > { %v2885_v56 = vpop.f32.mrf.mxu0 }
0x16db   : > { %v2902_v32 = vmul.f32 0.35355338, %v2885_v56 }
0x16dd   : > { %v2910_v41 = vadd.f32 %v2902_v32, %v2340_v26 }
0x16df   : > { %v2922_v9 = vsel %vm1395_vm6, %v2910_v41, -inf }
0x16e0   : > { %2923 = vmax.xlane.f32.xlu0 %v2922_v9 }
0x16e2   : > { %v2887_v16 = vpop.f32.mrf.mxu0 }
0x16e3   : > { %v2903_v37 = vmul.f32 0.35355338, %v2887_v16 }
0x16e5   : > { %v2911_v38 = vadd.f32 %v2903_v37, %v2341_v35 }
0x16e7   : > { %v2925_v42 = vsel %vm1395_vm6, %v2911_v38, -inf }
0x16e8   : > { %2926 = vmax.xlane.f32.xlu2 %v2925_v42 }
0x16ea   : > { %v2890_v46 = vpop.f32.mrf.mxu0 }
0x16eb   : > { %v2904_v2 = vmul.f32 0.35355338, %v2890_v46 }
0x16ed   : > { %v2912_v36 = vadd.f32 %v2904_v2, %v2342_v33 }
0x16ef   : > { %v2928_v43 = vsel %vm1395_vm6, %v2912_v36, -inf }
0x16f0   : > { %2929 = vmax.xlane.f32.xlu0 %v2928_v43 }
0x16f2   : > { %v2892_v14 = vpop.f32.mrf.mxu0 }
0x16f3   : > { %v2905_v49 = vmul.f32 0.35355338, %v2892_v14 }
0x16f5   : > { %v2913_v51 = vadd.f32 %v2905_v49, %v2343_v45 }
0x16f7   : > { %v2931_v27 = vsel %vm1395_vm6, %v2913_v51, -inf }
0x16f8   : > { %2932 = vmax.xlane.f32.xlu2 %v2931_v27 }
0x16fa   : > { %v2895_v53 = vpop.f32.mrf.mxu0 }
0x16fb   : > { %v2906_v52 = vmul.f32 0.35355338, %v2895_v53 }
0x16fd   : > { %v2914_v17 = vadd.f32 %v2906_v52, %v2344_v29 }
0x16ff   : > { %v2934_v19 = vsel %vm1395_vm6, %v2914_v17, -inf }
0x1700   : > { %2935 = vmax.xlane.f32.xlu0 %v2934_v19 }
0x1702   : > { %v2897_v54 = vpop.f32.mrf.mxu0 }
0x1703   : > { %v2907_v58 = vmul.f32 0.35355338, %v2897_v54 }
0x1705   : > { %v2915_v59 = vadd.f32 %v2907_v58, %v2345_v24 }
0x1707   : > { %v2937_v61 = vsel %vm1395_vm6, %v2915_v59, -inf }
0x1708   : > { %2938 = vmax.xlane.f32.xlu2 %v2937_v61 }
0x1720   : > { %3009 = vrot.lane.b32.xlu2 %v5963_v0, %s6281_s18  ;;  %s6325_s18 = sld [smem:[#allocation19_spill]] }
0x1743   : > { %v2918_v57 = vpop.xlane.xlu0 %2917 }
0x1744   : > { %v2940_v34 = vsub.f32 %v2908_v31, %v2918_v57 }
0x1746   : > { %v2948_v39 = vmul.f32 1.442695, %v2940_v34 }
0x1748   : > { %5118 = vpow2.f32 %v2948_v39 }
0x174b   : > { %v2921_v28 = vpop.xlane.xlu2 %2920 }
0x174c   : > { %v2941_v13 = vsub.f32 %v2909_v47, %v2921_v28 }
0x174e   : > { %v5119_v62 = vpop.eup %5118  ;;  %v2950_v44 = vmul.f32 1.442695, %v2941_v13 }
0x174f   : > { %v2964_v15 = vsel %vm1395_vm6, %v5119_v62, 0.0 }
0x1750   : > { %5120 = vpow2.f32 %v2950_v44  ;;  %2965 = vadd.xlane.f32.xlu1 %v2964_v15 }
0x1753   : > { %v2924_v22 = vpop.xlane.xlu0 %2923 }
0x1754   : > { %v2942_v18 = vsub.f32 %v2910_v41, %v2924_v22 }
0x1756   : > { %v5121_v50 = vpop.eup %5120  ;;  %v2952_v20 = vmul.f32 1.442695, %v2942_v18 }
0x1757   : > { %v2967_v55 = vsel %vm1395_vm6, %v5121_v50, 0.0 }
0x1758   : > { %5122 = vpow2.f32 %v2952_v20  ;;  %2968 = vadd.xlane.f32.xlu0 %v2967_v55 }
0x175b   : > { %v2927_v0 = vpop.xlane.xlu2 %2926 }
0x175c   : > { %v2943_v30 = vsub.f32 %v2911_v38, %v2927_v0 }
0x175e   : > { %v5123_v31 = vpop.eup %5122  ;;  %v2954_v21 = vmul.f32 1.442695, %v2943_v30 }
0x175f   : > { %v2970_v5 = vsel %vm1395_vm6, %v5123_v31, 0.0 }
0x1760   : > { %5124 = vpow2.f32 %v2954_v21  ;;  %2971 = vadd.xlane.f32.xlu1 %v2970_v5 }
0x1763   : > { %v2930_v23 = vpop.xlane.xlu0 %2929 }
0x1764   : > { %v2944_v60 = vsub.f32 %v2912_v36, %v2930_v23 }
0x1766   : > { %v5125_v47 = vpop.eup %5124  ;;  %v2956_v25 = vmul.f32 1.442695, %v2944_v60  ;;  %v4866_v60 = vld [vmem:[%s6323_s5 + $0x8] sm:$0xff] }
0x1767   : > { %v2973_v56 = vsel %vm1395_vm6, %v5125_v47, 0.0  ;;  %3092 = vmatpush.bf16.msrb.mxu2 %v4866_v60 }
0x1768   : > { %5126 = vpow2.f32 %v2956_v25  ;;  %2974 = vadd.xlane.f32.xlu0 %v2973_v56  ;;  %v4865_v56 = vld [vmem:[%s6323_s5] sm:$0xff] }
0x176b   : > { %v2933_v26 = vpop.xlane.xlu2 %2932  ;;  %3093 = vmatpush.bf16.msrb.mxu2 %v4865_v56 }
0x176c   : > { %v2945_v32 = vsub.f32 %v2913_v51, %v2933_v26 }
0x176e   : > { %v5127_v41 = vpop.eup %5126  ;;  %v2958_v9 = vmul.f32 1.442695, %v2945_v32 }
0x176f   : > { %v2976_v16 = vsel %vm1395_vm6, %v5127_v41, 0.0 }
0x1770   : > { %5128 = vpow2.f32 %v2958_v9  ;;  %2977 = vadd.xlane.f32.xlu1 %v2976_v16 }
0x1773   : > { %v2936_v35 = vpop.xlane.xlu0 %2935 }
0x1774   : > { %v2946_v37 = vsub.f32 %v2914_v17, %v2936_v35 }
0x1776   : > { %v5129_v38 = vpop.eup %5128  ;;  %v2960_v42 = vmul.f32 1.442695, %v2946_v37 }
0x1777   : > { %v2979_v46 = vsel %vm1395_vm6, %v5129_v38, 0.0 }
0x1778   : > { %5130 = vpow2.f32 %v2960_v42  ;;  %2980 = vadd.xlane.f32.xlu0 %v2979_v46 }
0x177b   : > { %v2939_v33 = vpop.xlane.xlu2 %2938 }
0x177c   : > { %v2947_v2 = vsub.f32 %v2915_v59, %v2939_v33 }
0x177e   : > { %v5131_v36 = vpop.eup %5130  ;;  %v2962_v43 = vmul.f32 1.442695, %v2947_v2 }
0x177f   : > { %v2982_v14 = vsel %vm1395_vm6, %v5131_v36, 0.0 }
0x1780   : > { %5132 = vpow2.f32 %v2962_v43  ;;  %2983 = vadd.xlane.f32.xlu1 %v2982_v14 }
0x1783   : > { %v3010_v45 = vpop.permute.xlu2 %3009 }
0x1784   : > { %3031 = vmatpush.bf16.msra.mxu3 %v3010_v45 }
0x1786   : > { %v5133_v49 = vpop.eup %5132 }
0x1787   : > { %v2985_v51 = vsel %vm1395_vm6, %v5133_v49, 0.0 }
0x1788   : > { %2986 = vadd.xlane.f32.xlu0 %v2985_v51 }
0x17c3   : > { %v2966_v27 = vpop.xlane.xlu1 %2965 }
0x17c4   : > { %5134 = vrcp.f32 %v2966_v27 }
0x17ca   : > { %v5135_v29 = vpop.eup %5134 }
0x17cb   : > { %v2969_v53 = vpop.xlane.xlu0 %2968  ;;  %v2996_v17 = vmul.f32 %v5135_v29, %v5119_v62 }
0x17cc   : > { %5136 = vrcp.f32 %v2969_v53  ;;  %v5060_v53 = vld [vmem:[%s6324_s23] ss:$0 sm:$0xff] }
0x17d2   : > { %v5137_v52 = vpop.eup %5136 }
0x17d3   : > { %v2997_v19 = vmul.f32 %v5137_v52, %v5121_v50  ;;  %v2972_v24 = vpop.xlane.xlu1 %2971 }
0x17d4   : > { %5138 = vrcp.f32 %v2972_v24 }
0x17d5   : > { %v3004_v54 = vpack.c.bf16 %v2997_v19, %v2996_v17 }
0x17d7   : > { %4661 = vmatmul.msk.bf16.vlgmr.msra.gmra.mxu3 %vm1395_vm6, %v3004_v54 }
0x17da   : > { %v5139_v59 = vpop.eup %5138 }
0x17db   : > { %v2975_v58 = vpop.xlane.xlu0 %2974  ;;  %v2998_v57 = vmul.f32 %v5139_v59, %v5123_v31 }
0x17dc   : > { %5140 = vrcp.f32 %v2975_v58 }
0x17e2   : > { %v5141_v61 = vpop.eup %5140 }
0x17e3   : > { %v2999_v34 = vmul.f32 %v5141_v61, %v5125_v47  ;;  %v2978_v28 = vpop.xlane.xlu1 %2977 }
0x17e4   : > { %5142 = vrcp.f32 %v2978_v28 }
0x17e5   : > { %v3005_v39 = vpack.c.bf16 %v2999_v34, %v2998_v57 }
0x17e7   : > { %4662 = vmatmul.msk.bf16.gmra.mxu3 %vm1395_vm6, %v3005_v39 }
0x17ea   : > { %v5143_v62 = vpop.eup %5142 }
0x17eb   : > { %v2981_v13 = vpop.xlane.xlu0 %2980  ;;  %v3000_v15 = vmul.f32 %v5143_v62, %v5127_v41 }
0x17ec   : > { %5144 = vrcp.f32 %v2981_v13 }
0x17f2   : > { %v5145_v44 = vpop.eup %5144 }
0x17f3   : > { %v3001_v22 = vmul.f32 %v5145_v44, %v5129_v38  ;;  %v2984_v50 = vpop.xlane.xlu1 %2983 }
0x17f4   : > { %5146 = vrcp.f32 %v2984_v50 }
0x17f5   : > { %v3006_v18 = vpack.c.bf16 %v3001_v22, %v3000_v15  ;;  %v4868_v15 = vld [vmem:[%s6325_s18 + $0x8] sm:$0xff]  ;;  %v4867_v22 = vld [vmem:[%s6325_s18] sm:$0xff] }
0x17f6   : > { %3188 = vmatpush.bf16.msrb.mxu1 %v4868_v15  ;;  %v5062_v15 = vld [vmem:[%s5470_s4] ss:$0 sm:$0xff] }
0x17f7   : > { %4663 = vmatmul.msk.bf16.gmra.mxu3 %vm1395_vm6, %v3006_v18 }
0x17fa   : > { %v5147_v55 = vpop.eup %5146  ;;  %3189 = vmatpush.bf16.msrb.mxu1 %v4867_v22 }
0x17fb   : > { %v2987_v20 = vpop.xlane.xlu0 %2986  ;;  %v3002_v30 = vmul.f32 %v5147_v55, %v5131_v36 }
0x17fc   : > { %5148 = vrcp.f32 %v2987_v20 }
0x1802   : > { %v5149_v0 = vpop.eup %5148 }
0x1803   : > { %v3003_v31 = vmul.f32 %v5149_v0, %v5133_v49 }
0x1805   : > { %v3007_v21 = vpack.c.bf16 %v3003_v31, %v3002_v30 }
0x1807   : > { %4664 = vmatmul.msk.bf16.gmra.mxu3 %vm1395_vm6, %v3007_v21 }
0x185a   : > { %v3033_v5 = vpop.f32.mrf.mxu3 }
0x185b   : > { %v3053_v35 = vmul.f32 %v3033_v5, %v5550_v1 }
0x1862   : > { %v3035_v23 = vpop.f32.mrf.mxu3 }
0x1863   : > { %v3054_v37 = vmul.f32 %v3035_v23, %v5559_v6 }
0x186a   : > { %v3038_v47 = vpop.f32.mrf.mxu3 }
0x186b   : > { %v3055_v9 = vmul.f32 %v3038_v47, %v5553_v3 }
0x186d   : > { %v3061_v46 = vadd.f32 %v3055_v9, %v3053_v35 }
0x1872   : > { %v3040_v25 = vpop.f32.mrf.mxu3 }
0x1873   : > { %v3056_v16 = vmul.f32 %v3040_v25, %v5562_v7 }
0x1875   : > { %v3062_v33 = vadd.f32 %v3056_v16, %v3054_v37 }
0x187a   : > { %v3043_v26 = vpop.f32.mrf.mxu3 }
0x187b   : > { %v3057_v38 = vmul.f32 %v3043_v26, %v5556_v4 }
0x187d   : > { %v3063_v43 = vadd.f32 %v3061_v46, %v3057_v38 }
0x1882   : > { %v3045_v32 = vpop.f32.mrf.mxu3 }
0x1883   : > { %v3058_v42 = vmul.f32 %v3045_v32, %v5565_v8 }
0x1885   : > { %v3064_v14 = vadd.f32 %v3062_v33, %v3058_v42 }
0x188a   : > { %v3048_v41 = vpop.f32.mrf.mxu3 }
0x188b   : > { %v3059_v2 = vmul.f32 %v3048_v41, %v5568_v11 }
0x188d   : > { %v3065_v49 = vadd.f32 %v3063_v43, %v3059_v2 }
0x1892   : > { %v3050_v36 = vpop.f32.mrf.mxu3 }
0x1893   : > { %v3060_v45 = vmul.f32 %v3050_v36, %v5571_v12  ;;  %v5254_v36 = vld [vmem:[%s5475_s12] sm:$0x3f] }
0x1894   : > { %v3150_v43 = vperm.slane %v5254_v36, 4 }
0x1895   : > { %v3066_v51 = vadd.f32 %v3064_v14, %v3060_v45 }
0x1897   : > { %v3067_v27 = vpack.c.bf16 %v3066_v51, %v3065_v49 }
0x1899   : > { %4673 = vmatmul.msk.bf16.vlgmr.msrb.gmra.mxu2 %vm1212_vm0, %v3067_v27  ;;  %v3155_v27 = vperm.slane %v5254_v36, 5 }
0x191c   : > { %v3095_v29 = vpop.f32.mrf.mxu2 }
0x191d   : > { %v3096_v52 = vadd.f32 %v5060_v53, %v3095_v29 }
0x191f   : > { %v6023_v17 = vadd.f32 %v3096_v52, %v5934_v40 }
0x1921   : > { %v3102_v19 = vsel %vm1212_vm0, %v6023_v17, 0.0 }
0x1922   : > { %3103 = vadd.xlane.f32.xlu2 %v3102_v19 }
0x1924   : > { %v3097_v54 = vpop.f32.mrf.mxu2 }
0x1925   : > { %v3098_v24 = vadd.f32 %v5060_v53, %v3097_v54 }
0x1927   : > { %v6028_v58 = vadd.f32 %v3098_v24, %v5939_v48  ;;  %v4872_v24 = vld [vmem:[%s6326_s6 + $0x18] sm:$0xff] }
0x1928   : > { %3238 = vmatpush.bf16.msra.mxu2 %v4872_v24 }
0x1929   : > { %v3105_v59 = vsel %vm1212_vm0, %v6028_v58, 0.0 }
0x192a   : > { %3106 = vadd.xlane.f32.xlu1 %v3105_v59  ;;  %v4871_v59 = vld [vmem:[%s6326_s6 + $0x10] sm:$0xff] }
0x192c   : > { %3239 = vmatpush.bf16.msra.mxu2 %v4871_v59 }
0x1995   : > { %v3104_v61 = vpop.xlane.xlu2 %3103 }
0x1996   : > { %v3108_v57 = vmul.f32 %v3104_v61, %v5514_v10  ;;  %v4870_v61 = vld [vmem:[%s6326_s6 + $0x8] sm:$0xff] }
0x1997   : > { %3240 = vmatpush.bf16.msra.mxu2 %v4870_v61  ;;  %v6068_v61 = vld [vmem:[%s5475_s12 + $0x8] sm:$0x3f] }
0x1998   : > { %v3110_v40 = vsub.f32 %v6023_v17, %v3108_v57  ;;  %v4869_v57 = vld [vmem:[%s6326_s6] sm:$0xff] }
0x199a   : > { %v3112_v34 = vmul.f32 %v3110_v40, %v3110_v40  ;;  %v3151_v45 = vmul.f32 %v3150_v43, %v3110_v40 }
0x199b   : > { %3241 = vmatpush.bf16.msra.mxu2 %v4869_v57 }
0x199c   : > { %v3114_v39 = vsel %vm1212_vm0, %v3112_v34, 0.0  ;;  %v5061_v34 = vld [vmem:[%s6327_s8] ss:$0 sm:$0xff] }
0x199d   : > { %v3107_v28 = vpop.xlane.xlu1 %3106  ;;  %3115 = vadd.xlane.f32.xlu0 %v3114_v39 }
0x199e   : > { %v3109_v13 = vmul.f32 %v3107_v28, %v5514_v10 }
0x19a0   : > { %v3111_v48 = vsub.f32 %v6028_v58, %v3109_v13 }
0x19a2   : > { %v3113_v62 = vmul.f32 %v3111_v48, %v3111_v48  ;;  %v3152_v49 = vmul.f32 %v3150_v43, %v3111_v48 }
0x19a4   : > { %v3117_v44 = vsel %vm1212_vm0, %v3113_v62, 0.0 }
0x19a5   : > { %3118 = vadd.xlane.f32.xlu1 %v3117_v44 }
0x1a10   : > { %v3116_v18 = vpop.xlane.xlu0 %3115 }
0x1a11   : > { %v3120_v50 = vmul.f32 0.032258064, %v3116_v18 }
0x1a13   : > { %5150 = vrsqrt.f32 %v3120_v50  ;;  %vm3129_vm4 = vcmp.eq.f32.partialorder %v3120_v50, inf  ;;  %v3132_v26 = vand.u32 2147483648, %v3120_v50  ;;  %vm3131_vm5 = vcmp.eq.f32.partialorder %v3120_v50, 0.0 }
0x1a18   : > { %v3119_v20 = vpop.xlane.xlu1 %3118 }
0x1a19   : > { %v5151_v55 = vpop.eup %5150  ;;  %v3121_v0 = vmul.f32 0.032258064, %v3119_v20 }
0x1a1a   : > { %v3123_v30 = vmul.f32 %v5151_v55, %v3120_v50 }
0x1a1b   : > { %5152 = vrsqrt.f32 %v3121_v0  ;;  %vm3141_vm7 = vcmp.eq.f32.partialorder %v3121_v0, inf  ;;  %v3144_v42 = vand.u32 2147483648, %v3121_v0  ;;  %vm3143_vm8 = vcmp.eq.f32.partialorder %v3121_v0, 0.0 }
0x1a1c   : > { %v3124_v31 = vmul.f32 %v5151_v55, %v3123_v30 }
0x1a1e   : > { %v3125_v21 = vmul.f32 0.5, %v3124_v31 }
0x1a20   : > { %v3126_v5 = vsub.f32 1.5, %v3125_v21 }
0x1a21   : > { %v5153_v23 = vpop.eup %5152 }
0x1a22   : > { %v3135_v60 = vmul.f32 %v5153_v23, %v3121_v0  ;;  %v3127_v47 = vmul.f32 %v5151_v55, %v3126_v5 }
0x1a24   : > { %v3136_v25 = vmul.f32 %v5153_v23, %v3135_v60  ;;  %v3128_v56 = vmul.f32 %v3127_v47, %v3120_v50 }
0x1a26   : > { %v3130_v32 = vsel %vm3129_vm4, %v3120_v50, %v3128_v56  ;;  %v3137_v41 = vmul.f32 0.5, %v3136_v25 }
0x1a27   : > { %v3133_v9 = vsel %vm3131_vm5, %v3132_v26, %v3130_v32  ;;  %v4874_v32 = vld [vmem:[%s6313_s11 + $0x18] sm:$0xff] }
0x1a28   : > { %v3138_v16 = vsub.f32 1.5, %v3137_v41  ;;  %v3146_v37 = vadd.f32 1e-06, %v3133_v9  ;;  %3346 = vmatpush.bf16.msra.mxu1 %v4874_v32  ;;  %v4873_v41 = vld [vmem:[%s6313_s11 + $0x10] sm:$0xff] }
0x1a2a   : > { %v3139_v35 = vmul.f32 %v5153_v23, %v3138_v16  ;;  %5154 = vrcp.f32 %v3146_v37 }
0x1a2c   : > { %v3140_v38 = vmul.f32 %v3139_v35, %v3121_v0  ;;  %3347 = vmatpush.bf16.msra.mxu1 %v4873_v41 }
0x1a2e   : > { %v3142_v46 = vsel %vm3141_vm7, %v3121_v0, %v3140_v38 }
0x1a2f   : > { %v3145_v33 = vsel %vm3143_vm8, %v3144_v42, %v3142_v46 }
0x1a30   : > { %v3147_v2 = vadd.f32 1e-06, %v3145_v33  ;;  %v5155_v14 = vpop.eup %5154 }
0x1a31   : > { %v3153_v51 = vmul.f32 %v5155_v14, %v3151_v45 }
0x1a32   : > { %5156 = vrcp.f32 %v3147_v2 }
0x1a33   : > { %v3156_v52 = vadd.f32 %v3155_v27, %v3153_v51 }
0x1a38   : > { %v5157_v53 = vpop.eup %5156 }
0x1a39   : > { %v3154_v29 = vmul.f32 %v5157_v53, %v3152_v49 }
0x1a3b   : > { %v3157_v19 = vadd.f32 %v3155_v27, %v3154_v29 }
0x1a3d   : > { %v3158_v54 = vpack.c.bf16 %v3157_v19, %v3156_v52 }
0x1a3f   : > { %4682 = vmatmul.msk.bf16.vlgmr.msrb.gmra.mxu1 %vm1212_vm0, %v3158_v54 }
0x1abc   : > { %v3191_v40 = vpop.f32.mrf.mxu1 }
0x1abd   : > { %v3192_v39 = vadd.f32 %v5061_v34, %v3191_v40 }
0x1abf   : > { %v3196_v48 = vmax.f32 %v3192_v39, 0.0  ;;  %v3306_v39 = vperm.slane %v6068_v61, 0 }
0x1ac4   : > { %v3193_v28 = vpop.f32.mrf.mxu1 }
0x1ac5   : > { %v3194_v13 = vadd.f32 %v5061_v34, %v3193_v28 }
0x1ac7   : > { %v3197_v62 = vmax.f32 %v3194_v13, 0.0 }
0x1ac9   : > { %v3198_v44 = vpack.c.bf16 %v3197_v62, %v3196_v48 }
0x1acb   : > { %4699 = vmatmul.msk.bf16.vlgmr.msra.gmra.mxu2 %vm1710_vm11, %v3198_v44  ;;  %v3311_v44 = vperm.slane %v6068_v61, 1 }
0x1b4e   : > { %v3243_v22 = vpop.f32.mrf.mxu2 }
0x1b4f   : > { %v3248_v18 = vadd.f32 %v3243_v22, %v6023_v17 }
0x1b51   : > { %v6050_v50 = vadd.f32 %v5062_v15, %v3248_v18 }
0x1b53   : > { %v3258_v20 = vsel %vm1212_vm0, %v6050_v50, 0.0 }
0x1b54   : > { %3259 = vadd.xlane.f32.xlu0 %v3258_v20 }
0x1b56   : > { %v3245_v55 = vpop.f32.mrf.mxu2 }
0x1b57   : > { %v3249_v0 = vadd.f32 %v3245_v55, %v6028_v58 }
0x1b59   : > { %v6055_v30 = vadd.f32 %v5062_v15, %v3249_v0 }
0x1b5b   : > { %v3261_v31 = vsel %vm1212_vm0, %v6055_v30, 0.0 }
0x1b5c   : > { %3262 = vadd.xlane.f32.xlu1 %v3261_v31  ;;  %v5063_v31 = vld [vmem:[%s6314_s1 + $0x1] ss:$0 sm:$0xff]  ;;  %s6328_s1 = smov 96  }
0x1bc7   : > { %v3260_v21 = vpop.xlane.xlu0 %3259 }
0x1bc8   : > { %v3264_v17 = vmul.f32 %v3260_v21, %v5514_v10 }
0x1bca   : > { %v3266_v5 = vsub.f32 %v6050_v50, %v3264_v17 }
0x1bcc   : > { %v3268_v23 = vmul.f32 %v3266_v5, %v3266_v5  ;;  %v3307_v13 = vmul.f32 %v3306_v39, %v3266_v5 }
0x1bce   : > { %v3270_v60 = vsel %vm1212_vm0, %v3268_v23, 0.0 }
0x1bcf   : > { %3271 = vadd.xlane.f32.xlu0 %v3270_v60  ;;  %v3263_v47 = vpop.xlane.xlu1 %3262 }
0x1bd0   : > { %v3265_v58 = vmul.f32 %v3263_v47, %v5514_v10 }
0x1bd2   : > { %v3267_v25 = vsub.f32 %v6055_v30, %v3265_v58 }
0x1bd4   : > { %v3269_v56 = vmul.f32 %v3267_v25, %v3267_v25  ;;  %v3308_v48 = vmul.f32 %v3306_v39, %v3267_v25 }
0x1bd6   : > { %v3273_v26 = vsel %vm1212_vm0, %v3269_v56, 0.0 }
0x1bd7   : > { %3274 = vadd.xlane.f32.xlu1 %v3273_v26 }
0x1c42   : > { %v3272_v9 = vpop.xlane.xlu0 %3271 }
0x1c43   : > { %v3276_v16 = vmul.f32 0.032258064, %v3272_v9 }
0x1c45   : > { %5158 = vrsqrt.f32 %v3276_v16  ;;  %vm3285_vm9 = vcmp.eq.f32.partialorder %v3276_v16, inf  ;;  %v3288_v51 = vand.u32 2147483648, %v3276_v16  ;;  %vm3287_vm10 = vcmp.eq.f32.partialorder %v3276_v16, 0.0 }
0x1c4a   : > { %v3275_v35 = vpop.xlane.xlu1 %3274 }
0x1c4b   : > { %v5159_v37 = vpop.eup %5158  ;;  %v3277_v38 = vmul.f32 0.032258064, %v3275_v35 }
0x1c4c   : > { %v3279_v42 = vmul.f32 %v5159_v37, %v3276_v16 }
0x1c4d   : > { %5160 = vrsqrt.f32 %v3277_v38  ;;  %vm3297_vm12 = vcmp.eq.f32.partialorder %v3277_v38, inf  ;;  %v3300_v59 = vand.u32 2147483648, %v3277_v38  ;;  %vm3299_vm13 = vcmp.eq.f32.partialorder %v3277_v38, 0.0 }
0x1c4e   : > { %v3280_v46 = vmul.f32 %v5159_v37, %v3279_v42 }
0x1c50   : > { %v3281_v33 = vmul.f32 0.5, %v3280_v46 }
0x1c52   : > { %v3282_v2 = vsub.f32 1.5, %v3281_v33 }
0x1c53   : > { %v5161_v36 = vpop.eup %5160 }
0x1c54   : > { %v3283_v43 = vmul.f32 %v5159_v37, %v3282_v2  ;;  %v3291_v14 = vmul.f32 %v5161_v36, %v3277_v38  ;;  %v5255_v2 = vld [vmem:[%s6315_s15] sm:$0xff] }
0x1c56   : > { %v3284_v45 = vmul.f32 %v3283_v43, %v3276_v16  ;;  %v3292_v49 = vmul.f32 %v5161_v36, %v3291_v14 }
0x1c58   : > { %v3293_v27 = vmul.f32 0.5, %v3292_v49  ;;  %v3286_v53 = vsel %vm3285_vm9, %v3276_v16, %v3284_v45  ;;  %v5256_v49 = vld [vmem:[%s6315_s15 + $0x8] sm:$0xff] }
0x1c59   : > { %v3289_v29 = vsel %vm3287_vm10, %v3288_v51, %v3286_v53 }
0x1c5a   : > { %v3294_v52 = vsub.f32 1.5, %v3293_v27  ;;  %v3302_v54 = vadd.f32 1e-06, %v3289_v29 }
0x1c5c   : > { %v3295_v19 = vmul.f32 %v5161_v36, %v3294_v52  ;;  %5162 = vrcp.f32 %v3302_v54  ;;  %v5257_v52 = vld [vmem:[%s6315_s15 + $0x10] sm:$0xff] }
0x1c5e   : > { %v3296_v24 = vmul.f32 %v3295_v19, %v3277_v38 }
0x1c60   : > { %v3298_v57 = vsel %vm3297_vm12, %v3277_v38, %v3296_v24 }
0x1c61   : > { %v3301_v40 = vsel %vm3299_vm13, %v3300_v59, %v3298_v57  ;;  %v5258_v57 = vld [vmem:[%s6315_s15 + $0x18] sm:$0xff] }
0x1c62   : > { %v3303_v34 = vadd.f32 1e-06, %v3301_v40  ;;  %v5163_v28 = vpop.eup %5162 }
0x1c63   : > { %v3309_v62 = vmul.f32 %v5163_v28, %v3307_v13  ;;  %v5259_v13 = vld [vmem:[%s6315_s15 + $0x20] sm:$0xff] }
0x1c64   : > { %5164 = vrcp.f32 %v3303_v34 }
0x1c65   : > { %v3312_v18 = vadd.f32 %v3311_v44, %v3309_v62 }
0x1c6a   : > { %v5165_v15 = vpop.eup %5164 }
0x1c6b   : > { %v3310_v22 = vmul.f32 %v5165_v15, %v3308_v48 }
0x1c6d   : > { %v3313_v20 = vadd.f32 %v3311_v44, %v3310_v22  ;;  %v5260_v22 = vld [vmem:[%s6315_s15 + $0x28] sm:$0xff] }
0x1c6f   : > { %v3314_v55 = vpack.c.bf16 %v3313_v20, %v3312_v18 }
0x1c71   : > { %4714 = vmatmul.msk.bf16.vlgmr.msra.gmra.mxu1 %vm1212_vm0, %v3314_v55 }
0x1cee   : > { %v3349_v0 = vpop.f32.mrf.mxu1 }
0x1cef   : > { %v3350_v21 = vadd.f32 %v5063_v31, %v3349_v0 }
0x1cf1   : > { %v3361_v60 = vmul.f32 %v3350_v21, %v5550_v1  ;;  %v3363_v5 = vmul.f32 %v3350_v21, %v5553_v3  ;;  %v3365_v47 = vmul.f32 %v3350_v21, %v5556_v4  ;;  %v3367_v32 = vmul.f32 %v3350_v21, %v5568_v11 }
0x1cf6   : > { %v3351_v17 = vpop.f32.mrf.mxu1 }
0x1cf7   : > { %v3352_v23 = vadd.f32 %v5063_v31, %v3351_v17  ;;  %v5261_v31 = vld [vmem:[%s6315_s15 + $0x30] sm:$0xff] }
0x1cf9   : > { %v6077_v58 = vpack.c.bf16 %v3352_v23, %v3350_v21  ;;  %v3362_v25 = vmul.f32 %v3352_v23, %v5559_v6  ;;  %v3364_v56 = vmul.f32 %v3352_v23, %v5562_v7  ;;  %v3366_v26 = vmul.f32 %v3352_v23, %v5565_v8 }
0x1cfa   : > { %v3368_v41 = vmul.f32 %v3352_v23, %v5571_v12 }
0x1cfb   : > { %3375 = vrot.lane.b32.xlu0 %v6077_v58, %s6328_s1  ;;  %v3369_v9 = vpack.c.bf16 %v3362_v25, %v3361_v60  ;;  %v3370_v16 = vpack.c.bf16 %v3364_v56, %v3363_v5  ;;  %v3371_v35 = vpack.c.bf16 %v3366_v26, %v3365_v47  ;;  %v5262_v5 = vld [vmem:[%s6315_s15 + $0x38] sm:$0xff] }
0x1cfc   : > { %v3372_v37 = vpack.c.bf16 %v3368_v41, %v3367_v32 }
0x1d6d   : > { %v3376_v38 = vpop.permute.xlu0 %3375 }
0x1d6e   : > { %v3390_v42 = vsel %vm1212_vm0, %v3376_v38, 0 }
0x1d6f   : > { %3399 = vmatpush.bf16.xpose.msrb.mxu2 %v3390_v42 }
0x1d76   : > { %4720 = vmatmul.msk.bf16.vlgmr.msrb.gmra.mxu2 %vm1212_vm0, %v3369_v9 }
0x1d86   : > { %4721 = vmatmul.msk.bf16.gmra.mxu2 %vm1212_vm0, %v3370_v16 }
0x1d96   : > { %4722 = vmatmul.msk.bf16.gmra.mxu2 %vm1212_vm0, %v3371_v35 }
0x1da6   : > { %4723 = vmatmul.msk.bf16.gmra.mxu2 %vm1212_vm0, %v3372_v37 }
0x1df9   : > { %v3401_v46 = vpop.f32.mrf.mxu2 }
0x1dfa   : > { %v3421_v33 = vmul.f32 0.35355338, %v3401_v46 }
0x1dfc   : > { %v3429_v36 = vadd.f32 %v5255_v2, %v3421_v33 }
0x1dfe   : > { %v3437_v43 = vsel %vm1395_vm6, %v3429_v36, -inf }
0x1dff   : > { %3438 = vmax.xlane.f32.xlu1 %v3437_v43 }
0x1e01   : > { %v3403_v14 = vpop.f32.mrf.mxu2 }
0x1e02   : > { %v3422_v45 = vmul.f32 0.35355338, %v3403_v14 }
0x1e04   : > { %v3430_v51 = vadd.f32 %v5256_v49, %v3422_v45 }
0x1e06   : > { %v3440_v27 = vsel %vm1395_vm6, %v3430_v51, -inf }
0x1e07   : > { %3441 = vmax.xlane.f32.xlu2 %v3440_v27 }
0x1e09   : > { %v3406_v53 = vpop.f32.mrf.mxu2 }
0x1e0a   : > { %v3423_v29 = vmul.f32 0.35355338, %v3406_v53 }
0x1e0c   : > { %v3431_v19 = vadd.f32 %v5257_v52, %v3423_v29 }
0x1e0e   : > { %v3443_v54 = vsel %vm1395_vm6, %v3431_v19, -inf }
0x1e0f   : > { %3444 = vmax.xlane.f32.xlu1 %v3443_v54 }
0x1e11   : > { %v3408_v24 = vpop.f32.mrf.mxu2 }
0x1e12   : > { %v3424_v59 = vmul.f32 0.35355338, %v3408_v24 }
0x1e14   : > { %v3432_v40 = vadd.f32 %v5258_v57, %v3424_v59 }
0x1e16   : > { %v3446_v34 = vsel %vm1395_vm6, %v3432_v40, -inf }
0x1e17   : > { %3447 = vmax.xlane.f32.xlu2 %v3446_v34 }
0x1e19   : > { %v3411_v39 = vpop.f32.mrf.mxu2 }
0x1e1a   : > { %v3425_v28 = vmul.f32 0.35355338, %v3411_v39 }
0x1e1c   : > { %v3433_v48 = vadd.f32 %v5259_v13, %v3425_v28 }
0x1e1e   : > { %v3449_v62 = vsel %vm1395_vm6, %v3433_v48, -inf }
0x1e1f   : > { %3450 = vmax.xlane.f32.xlu1 %v3449_v62 }
0x1e21   : > { %v3413_v44 = vpop.f32.mrf.mxu2 }
0x1e22   : > { %v3426_v15 = vmul.f32 0.35355338, %v3413_v44 }
0x1e24   : > { %v3434_v18 = vadd.f32 %v5260_v22, %v3426_v15 }
0x1e26   : > { %v3452_v20 = vsel %vm1395_vm6, %v3434_v18, -inf }
0x1e27   : > { %3453 = vmax.xlane.f32.xlu0 %v3452_v20 }
0x1e29   : > { %v3416_v55 = vpop.f32.mrf.mxu2 }
0x1e2a   : > { %v3427_v0 = vmul.f32 0.35355338, %v3416_v55 }
0x1e2c   : > { %v3435_v21 = vadd.f32 %v5261_v31, %v3427_v0 }
0x1e2e   : > { %v3455_v17 = vsel %vm1395_vm6, %v3435_v21, -inf }
0x1e2f   : > { %3456 = vmax.xlane.f32.xlu2 %v3455_v17 }
0x1e31   : > { %v3418_v23 = vpop.f32.mrf.mxu2 }
0x1e32   : > { %v3428_v60 = vmul.f32 0.35355338, %v3418_v23 }
0x1e34   : > { %v3436_v47 = vadd.f32 %v5262_v5, %v3428_v60 }
0x1e36   : > { %v3458_v25 = vsel %vm1395_vm6, %v3436_v47, -inf }
0x1e37   : > { %3459 = vmax.xlane.f32.xlu1 %v3458_v25 }
0x1e72   : > { %v3439_v56 = vpop.xlane.xlu1 %3438 }
0x1e73   : > { %v3461_v26 = vsub.f32 %v3429_v36, %v3439_v56 }
0x1e75   : > { %v3469_v32 = vmul.f32 1.442695, %v3461_v26 }
0x1e77   : > { %5166 = vpow2.f32 %v3469_v32 }
0x1e7a   : > { %v3442_v41 = vpop.xlane.xlu2 %3441 }
0x1e7b   : > { %v3462_v9 = vsub.f32 %v3430_v51, %v3442_v41 }
0x1e7d   : > { %v5167_v16 = vpop.eup %5166  ;;  %v3471_v35 = vmul.f32 1.442695, %v3462_v9 }
0x1e7e   : > { %v3485_v37 = vsel %vm1395_vm6, %v5167_v16, 0.0 }
0x1e7f   : > { %5168 = vpow2.f32 %v3471_v35  ;;  %3486 = vadd.xlane.f32.xlu2 %v3485_v37 }
0x1e82   : > { %v3445_v38 = vpop.xlane.xlu1 %3444 }
0x1e83   : > { %v3463_v42 = vsub.f32 %v3431_v19, %v3445_v38 }
0x1e85   : > { %v5169_v46 = vpop.eup %5168  ;;  %v3473_v33 = vmul.f32 1.442695, %v3463_v42 }
0x1e86   : > { %v3488_v2 = vsel %vm1395_vm6, %v5169_v46, 0.0 }
0x1e87   : > { %5170 = vpow2.f32 %v3473_v33  ;;  %3489 = vadd.xlane.f32.xlu1 %v3488_v2 }
0x1e8a   : > { %v3448_v43 = vpop.xlane.xlu2 %3447 }
0x1e8b   : > { %v3464_v36 = vsub.f32 %v3432_v40, %v3448_v43 }
0x1e8d   : > { %v5171_v14 = vpop.eup %5170  ;;  %v3475_v45 = vmul.f32 1.442695, %v3464_v36 }
0x1e8e   : > { %v3491_v49 = vsel %vm1395_vm6, %v5171_v14, 0.0 }
0x1e8f   : > { %5172 = vpow2.f32 %v3475_v45  ;;  %3492 = vadd.xlane.f32.xlu1 %v3491_v49 }
0x1e92   : > { %v3451_v51 = vpop.xlane.xlu1 %3450 }
0x1e93   : > { %v3465_v27 = vsub.f32 %v3433_v48, %v3451_v51 }
0x1e95   : > { %v5173_v53 = vpop.eup %5172  ;;  %v3477_v29 = vmul.f32 1.442695, %v3465_v27 }
0x1e96   : > { %v3494_v52 = vsel %vm1395_vm6, %v5173_v53, 0.0 }
0x1e97   : > { %5174 = vpow2.f32 %v3477_v29  ;;  %3529 = vrot.lane.b32.xlu2 %v6077_v58, %s6329_s9  ;;  %3495 = vadd.xlane.f32.xlu1 %v3494_v52  ;;  %v4876_v52 = vld [vmem:[%s6316_s26 + $0x18] sm:$0xff] }
0x1e98   : > { %3612 = vmatpush.bf16.msrb.mxu1 %v4876_v52 }
0x1e9a   : > { %v3454_v19 = vpop.xlane.xlu0 %3453 }
0x1e9b   : > { %v3466_v54 = vsub.f32 %v3434_v18, %v3454_v19  ;;  %v4875_v19 = vld [vmem:[%s6316_s26 + $0x10] sm:$0xff] }
0x1e9c   : > { %3613 = vmatpush.bf16.msrb.mxu1 %v4875_v19 }
0x1e9d   : > { %v5175_v24 = vpop.eup %5174  ;;  %v3479_v59 = vmul.f32 1.442695, %v3466_v54 }
0x1e9e   : > { %v3497_v57 = vsel %vm1395_vm6, %v5175_v24, 0.0 }
0x1e9f   : > { %5176 = vpow2.f32 %v3479_v59  ;;  %3498 = vadd.xlane.f32.xlu1 %v3497_v57 }
0x1ea2   : > { %v3457_v28 = vpop.xlane.xlu2 %3456 }
0x1ea3   : > { %v3467_v62 = vsub.f32 %v3435_v21, %v3457_v28 }
0x1ea5   : > { %v5177_v40 = vpop.eup %5176  ;;  %v3481_v58 = vmul.f32 1.442695, %v3467_v62 }
0x1ea6   : > { %v3500_v34 = vsel %vm1395_vm6, %v5177_v40, 0.0 }
0x1ea7   : > { %3501 = vadd.xlane.f32.xlu0 %v3500_v34 }
0x1eaa   : > { %v3460_v39 = vpop.xlane.xlu1 %3459 }
0x1eab   : > { %v3468_v13 = vsub.f32 %v3436_v47, %v3460_v39 }
0x1ead   : > { %v3483_v48 = vmul.f32 1.442695, %v3468_v13 }
0x1eaf   : > { %5178 = vpow2.f32 %v3483_v48 }
0x1eb0   : > { %5180 = vpow2.f32 %v3481_v58 }
0x1eb5   : > { %v5179_v44 = vpop.eup %5178 }
0x1eb6   : > { %v3506_v15 = vsel %vm1395_vm6, %v5179_v44, 0.0  ;;  %v5181_v22 = vpop.eup %5180 }
0x1eb7   : > { %3507 = vadd.xlane.f32.xlu1 %v3506_v15  ;;  %v3503_v18 = vsel %vm1395_vm6, %v5181_v22, 0.0 }
0x1ec0   : > { %3504 = vadd.xlane.f32.xlu2 %v3503_v18 }
0x1ef2   : > { %v3487_v20 = vpop.xlane.xlu2 %3486 }
0x1ef3   : > { %5182 = vrcp.f32 %v3487_v20 }
0x1ef9   : > { %v5183_v31 = vpop.eup %5182 }
0x1efa   : > { %v3530_v55 = vpop.permute.xlu2 %3529  ;;  %v3490_v0 = vpop.xlane.xlu1 %3489  ;;  %v3517_v21 = vmul.f32 %v5183_v31, %v5167_v16  ;;  %v5064_v31 = vld [vmem:[%s6317_s2 + $0x1] ss:$0 sm:$0xff] }
0x1efb   : > { %5184 = vrcp.f32 %v3490_v0  ;;  %3551 = vmatpush.bf16.msrb.mxu0 %v3530_v55 }
0x1f01   : > { %v5185_v17 = vpop.eup %5184 }
0x1f02   : > { %v3518_v23 = vmul.f32 %v5185_v17, %v5169_v46  ;;  %v3493_v60 = vpop.xlane.xlu1 %3492 }
0x1f03   : > { %5186 = vrcp.f32 %v3493_v60 }
0x1f04   : > { %v3525_v5 = vpack.c.bf16 %v3518_v23, %v3517_v21 }
0x1f06   : > { %4724 = vmatmul.msk.bf16.vlgmr.msrb.gmra.mxu0 %vm1395_vm6, %v3525_v5 }
0x1f09   : > { %v5187_v25 = vpop.eup %5186 }
0x1f0a   : > { %v3496_v47 = vpop.xlane.xlu1 %3495  ;;  %v3519_v26 = vmul.f32 %v5187_v25, %v5171_v14 }
0x1f0b   : > { %5188 = vrcp.f32 %v3496_v47 }
0x1f11   : > { %v5189_v56 = vpop.eup %5188 }
0x1f12   : > { %v3520_v32 = vmul.f32 %v5189_v56, %v5173_v53  ;;  %v3499_v9 = vpop.xlane.xlu1 %3498 }
0x1f13   : > { %5190 = vrcp.f32 %v3499_v9 }
0x1f14   : > { %v3526_v41 = vpack.c.bf16 %v3520_v32, %v3519_v26 }
0x1f16   : > { %4725 = vmatmul.msk.bf16.gmra.mxu0 %vm1395_vm6, %v3526_v41 }
0x1f19   : > { %v5191_v16 = vpop.eup %5190 }
0x1f1a   : > { %v3502_v35 = vpop.xlane.xlu0 %3501  ;;  %v3521_v38 = vmul.f32 %v5191_v16, %v5175_v24 }
0x1f1b   : > { %5192 = vrcp.f32 %v3502_v35 }
0x1f21   : > { %v5193_v37 = vpop.eup %5192 }
0x1f22   : > { %v3522_v42 = vmul.f32 %v5193_v37, %v5177_v40 }
0x1f24   : > { %v3527_v46 = vpack.c.bf16 %v3522_v42, %v3521_v38  ;;  %v4878_v42 = vld [vmem:[%s6319_s7 + $0x18] sm:$0xff] }
0x1f25   : > { %3710 = vmatpush.bf16.msrb.mxu3 %v4878_v42 }
0x1f26   : > { %4726 = vmatmul.msk.bf16.gmra.mxu0 %vm1395_vm6, %v3527_v46  ;;  %v4880_v46 = vld [vmem:[%s6318_s22 + $0x18] sm:$0xff] }
0x1f27   : > { %3746 = vmatpush.bf16.msra.mxu1 %v4880_v46 }
0x1f2a   : > { %v3508_v33 = vpop.xlane.xlu1 %3507 }
0x1f2b   : > { %5194 = vrcp.f32 %v3508_v33  ;;  %v4877_v33 = vld [vmem:[%s6319_s7 + $0x10] sm:$0xff] }
0x1f2c   : > { %3711 = vmatpush.bf16.msrb.mxu3 %v4877_v33 }
0x1f31   : > { %v5195_v43 = vpop.eup %5194 }
0x1f32   : > { %v3524_v45 = vmul.f32 %v5195_v43, %v5179_v44 }
0x1f33   : > { %v3505_v2 = vpop.xlane.xlu2 %3504 }
0x1f34   : > { %5196 = vrcp.f32 %v3505_v2  ;;  %v4879_v2 = vld [vmem:[%s6318_s22 + $0x10] sm:$0xff] }
0x1f35   : > { %3747 = vmatpush.bf16.msra.mxu1 %v4879_v2 }
0x1f3a   : > { %v5197_v36 = vpop.eup %5196 }
0x1f3b   : > { %v3523_v14 = vmul.f32 %v5197_v36, %v5181_v22 }
0x1f3d   : > { %v3528_v49 = vpack.c.bf16 %v3524_v45, %v3523_v14 }
0x1f3f   : > { %4727 = vmatmul.msk.bf16.gmra.mxu0 %vm1395_vm6, %v3528_v49 }
0x1f83   : > { %v3553_v51 = vpop.f32.mrf.mxu0 }
0x1f84   : > { %v3573_v34 = vmul.f32 %v3553_v51, %v5550_v1 }
0x1f8b   : > { %v3555_v27 = vpop.f32.mrf.mxu0 }
0x1f8c   : > { %v3574_v39 = vmul.f32 %v3555_v27, %v5559_v6 }
0x1f93   : > { %v3558_v53 = vpop.f32.mrf.mxu0 }
0x1f94   : > { %v3575_v57 = vmul.f32 %v3558_v53, %v5553_v3 }
0x1f96   : > { %v3581_v48 = vadd.f32 %v3575_v57, %v3573_v34 }
0x1f9b   : > { %v3560_v29 = vpop.f32.mrf.mxu0 }
0x1f9c   : > { %v3576_v40 = vmul.f32 %v3560_v29, %v5562_v7 }
0x1f9e   : > { %v3582_v62 = vadd.f32 %v3576_v40, %v3574_v39 }
0x1fa3   : > { %v3563_v54 = vpop.f32.mrf.mxu0 }
0x1fa4   : > { %v3577_v28 = vmul.f32 %v3563_v54, %v5556_v4 }
0x1fa6   : > { %v3583_v15 = vadd.f32 %v3581_v48, %v3577_v28 }
0x1fab   : > { %v3565_v24 = vpop.f32.mrf.mxu0 }
0x1fac   : > { %v3578_v13 = vmul.f32 %v3565_v24, %v5565_v8 }
0x1fae   : > { %v3584_v22 = vadd.f32 %v3582_v62, %v3578_v13 }
0x1fbc   : > { %v3568_v59 = vpop.f32.mrf.mxu0 }
0x1fbd   : > { %v3579_v58 = vmul.f32 %v3568_v59, %v5568_v11 }
0x1fbf   : > { %v3585_v20 = vadd.f32 %v3583_v15, %v3579_v58 }
0x1fc4   : > { %v3570_v44 = vpop.f32.mrf.mxu0 }
0x1fc5   : > { %v3580_v18 = vmul.f32 %v3570_v44, %v5571_v12 }
0x1fc7   : > { %v3586_v55 = vadd.f32 %v3584_v22, %v3580_v18  ;;  %v3670_v22 = vperm.slane %v6068_v61, 2 }
0x1fc9   : > { %v3587_v0 = vpack.c.bf16 %v3586_v55, %v3585_v20 }
0x1fcb   : > { %4736 = vmatmul.msk.bf16.vlgmr.msrb.gmra.mxu1 %vm1212_vm0, %v3587_v0 }
0x1fdb   : > { %4764 = vmatmul.msk.bf16.vlgmr.msra.gmra.mxu1 %vm1212_vm0, %v5955_v63 }
0x2048   : > { %v3615_v17 = vpop.f32.mrf.mxu1 }
0x2049   : > { %v3616_v21 = vadd.f32 %v5064_v31, %v3615_v17 }
0x204b   : > { %v6134_v23 = vadd.f32 %v3616_v21, %v6050_v50 }
0x204d   : > { %v3622_v60 = vsel %vm1212_vm0, %v6134_v23, 0.0 }
0x204e   : > { %3623 = vadd.xlane.f32.xlu0 %v3622_v60 }
0x2050   : > { %v3617_v5 = vpop.f32.mrf.mxu1 }
0x2051   : > { %v3618_v47 = vadd.f32 %v5064_v31, %v3617_v5  ;;  %v3675_v31 = vperm.slane %v6068_v61, 3 }
0x2053   : > { %v6139_v25 = vadd.f32 %v3618_v47, %v6055_v30 }
0x2055   : > { %v3625_v56 = vsel %vm1212_vm0, %v6139_v25, 0.0 }
0x2056   : > { %3626 = vadd.xlane.f32.xlu1 %v3625_v56 }
0x2058   : > { %v3749_v56 = vpop.f32.mrf.mxu1 }
0x20c1   : > { %v3624_v26 = vpop.xlane.xlu0 %3623 }
0x20c2   : > { %v3628_v50 = vmul.f32 %v3624_v26, %v5514_v10  ;;  %v5065_v26 = vld [vmem:[%s6320_s16 + $0x1] ss:$0 sm:$0xff] }
0x20c4   : > { %v3630_v32 = vsub.f32 %v6134_v23, %v3628_v50  ;;  %v3750_v50 = vadd.f32 %v5065_v26, %v3749_v56 }
0x20c6   : > { %v3632_v41 = vmul.f32 %v3630_v32, %v3630_v32  ;;  %v3671_v20 = vmul.f32 %v3670_v22, %v3630_v32 }
0x20c8   : > { %v3634_v9 = vsel %vm1212_vm0, %v3632_v41, 0.0  ;;  %v3751_v41 = vpop.f32.mrf.mxu1 }
0x20c9   : > { %v3627_v35 = vpop.xlane.xlu1 %3626  ;;  %3635 = vadd.xlane.f32.xlu0 %v3634_v9  ;;  %v3752_v9 = vadd.f32 %v5065_v26, %v3751_v41  ;;  %v5269_v41 = vld [vmem:[%s6322_s0 + $0x30] sm:$0xff] }
0x20ca   : > { %v3629_v30 = vmul.f32 %v3627_v35, %v5514_v10 }
0x20cb   : > { %v6159_v35 = vpack.c.bf16 %v3752_v9, %v3750_v50 }
0x20cc   : > { %v3631_v16 = vsub.f32 %v6139_v25, %v3629_v30  ;;  %v5066_v30 = vld [vmem:[%s6321_s3 + $0x1] ss:$0 sm:$0xff] }
0x20cd   : > { %v3787_v32 = vsel %vm1212_vm0, %v6159_v35, 0 }
0x20ce   : > { %v3633_v37 = vmul.f32 %v3631_v16, %v3631_v16  ;;  %v3672_v55 = vmul.f32 %v3670_v22, %v3631_v16  ;;  %3796 = vmatpush.bf16.xpose.msra.mxu3 %v3787_v32 }
0x20d0   : > { %v3637_v38 = vsel %vm1212_vm0, %v3633_v37, 0.0 }
0x20d1   : > { %3638 = vadd.xlane.f32.xlu1 %v3637_v38 }
0x213c   : > { %v3636_v43 = vpop.xlane.xlu0 %3635 }
0x213d   : > { %v3640_v36 = vmul.f32 0.032258064, %v3636_v43 }
0x213f   : > { %5198 = vrsqrt.f32 %v3640_v36  ;;  %vm3649_vm14 = vcmp.eq.f32.partialorder %v3640_v36, inf  ;;  %v3652_v57 = vand.u32 2147483648, %v3640_v36  ;;  %vm3651_vm15 = vcmp.eq.f32.partialorder %v3640_v36, 0.0 }
0x2144   : > { %v3639_v14 = vpop.xlane.xlu1 %3638 }
0x2145   : > { %v5199_v45 = vpop.eup %5198  ;;  %v3641_v49 = vmul.f32 0.032258064, %v3639_v14 }
0x2146   : > { %v3643_v51 = vmul.f32 %v5199_v45, %v3640_v36 }
0x2147   : > { %5200 = vrsqrt.f32 %v3641_v49  ;;  %vm3661_vm1 = vcmp.eq.f32.partialorder %v3641_v49, inf  ;;  %v3664_v62 = vand.u32 2147483648, %v3641_v49  ;;  %vm3663_vm2 = vcmp.eq.f32.partialorder %v3641_v49, 0.0 }
0x2148   : > { %v3644_v27 = vmul.f32 %v5199_v45, %v3643_v51 }
0x214a   : > { %v3645_v53 = vmul.f32 0.5, %v3644_v27 }
0x214c   : > { %v3646_v29 = vsub.f32 1.5, %v3645_v53 }
0x214d   : > { %v5201_v52 = vpop.eup %5200 }
0x214e   : > { %v3647_v19 = vmul.f32 %v5199_v45, %v3646_v29  ;;  %v3655_v54 = vmul.f32 %v5201_v52, %v3641_v49 }
0x2150   : > { %v3648_v24 = vmul.f32 %v3647_v19, %v3640_v36  ;;  %v3656_v59 = vmul.f32 %v5201_v52, %v3655_v54  ;;  %v5263_v19 = vld [vmem:[%s6322_s0] sm:$0xff] }
0x2152   : > { %v3657_v40 = vmul.f32 0.5, %v3656_v59  ;;  %v3650_v34 = vsel %vm3649_vm14, %v3640_v36, %v3648_v24 }
0x2153   : > { %v3653_v39 = vsel %vm3651_vm15, %v3652_v57, %v3650_v34 }
0x2154   : > { %v3658_v63 = vsub.f32 1.5, %v3657_v40  ;;  %v3666_v13 = vadd.f32 1e-06, %v3653_v39  ;;  %v5264_v40 = vld [vmem:[%s6322_s0 + $0x8] sm:$0xff] }
0x2156   : > { %v3659_v28 = vmul.f32 %v5201_v52, %v3658_v63  ;;  %5202 = vrcp.f32 %v3666_v13  ;;  %v5265_v13 = vld [vmem:[%s6322_s0 + $0x10] sm:$0xff] }
0x2158   : > { %v3660_v48 = vmul.f32 %v3659_v28, %v3641_v49 }
0x215a   : > { %v3662_v58 = vsel %vm3661_vm1, %v3641_v49, %v3660_v48 }
0x215b   : > { %v3665_v44 = vsel %vm3663_vm2, %v3664_v62, %v3662_v58 }
0x215c   : > { %v3667_v15 = vadd.f32 1e-06, %v3665_v44  ;;  %v5203_v18 = vpop.eup %5202 }
0x215d   : > { %v3673_v0 = vmul.f32 %v5203_v18, %v3671_v20 }
0x215e   : > { %5204 = vrcp.f32 %v3667_v15  ;;  %v5266_v15 = vld [vmem:[%s6322_s0 + $0x18] sm:$0xff] }
0x215f   : > { %v3676_v60 = vadd.f32 %v3675_v31, %v3673_v0  ;;  %v5267_v0 = vld [vmem:[%s6322_s0 + $0x20] sm:$0xff] }
0x2164   : > { %v5205_v17 = vpop.eup %5204 }
0x2165   : > { %v3674_v21 = vmul.f32 %v5205_v17, %v3672_v55 }
0x2167   : > { %v3677_v5 = vadd.f32 %v3675_v31, %v3674_v21 }
0x2169   : > { %v3678_v47 = vpack.c.bf16 %v3677_v5, %v3676_v60  ;;  %v5268_v5 = vld [vmem:[%s6322_s0 + $0x28] sm:$0xff] }
0x216b   : > { %4750 = vmatmul.msk.bf16.vlgmr.msrb.gmra.mxu3 %vm1212_vm0, %v3678_v47 }
0x21ee   : > { %v3713_v61 = vpop.f32.mrf.mxu3 }
0x21ef   : > { %v3714_v16 = vadd.f32 %v5066_v30, %v3713_v61 }
0x21f1   : > { %v3761_v42 = vmul.f32 %v3714_v16, %v5550_v1  ;;  %v3763_v43 = vmul.f32 %v3714_v16, %v5553_v3  ;;  %v3765_v45 = vmul.f32 %v3714_v16, %v5556_v4  ;;  %v3767_v27 = vmul.f32 %v3714_v16, %v5568_v11  ;;  %v5270_v16 = vld [vmem:[%s6322_s0 + $0x38] sm:$0xff] }
0x21f6   : > { %v3715_v37 = vpop.f32.mrf.mxu3 }
0x21f7   : > { %v3716_v38 = vadd.f32 %v5066_v30, %v3715_v37 }
0x21f9   : > { %v3762_v46 = vmul.f32 %v3716_v38, %v5559_v6  ;;  %v3764_v2 = vmul.f32 %v3716_v38, %v5562_v7  ;;  %v3766_v14 = vmul.f32 %v3716_v38, %v5565_v8  ;;  %v3768_v51 = vmul.f32 %v3716_v38, %v5571_v12 }
0x21fb   : > { %v3769_v33 = vpack.c.bf16 %v3762_v46, %v3761_v42  ;;  %v3770_v36 = vpack.c.bf16 %v3764_v2, %v3763_v43  ;;  %v3771_v49 = vpack.c.bf16 %v3766_v14, %v3765_v45  ;;  %v3772_v53 = vpack.c.bf16 %v3768_v51, %v3767_v27 }
0x21fd   : > { %4770 = vmatmul.msk.bf16.vlgmr.msra.gmra.mxu3 %vm1212_vm0, %v3769_v33 }
0x220d   : > { %4771 = vmatmul.msk.bf16.gmra.mxu3 %vm1212_vm0, %v3770_v36 }
0x221d   : > { %4772 = vmatmul.msk.bf16.gmra.mxu3 %vm1212_vm0, %v3771_v49 }
0x222d   : > { %4773 = vmatmul.msk.bf16.gmra.mxu3 %vm1212_vm0, %v3772_v53 }
0x2280   : > { %v3798_v29 = vpop.f32.mrf.mxu3 }
0x2281   : > { %v3818_v52 = vmul.f32 0.35355338, %v3798_v29 }
0x2283   : > { %v3826_v54 = vadd.f32 %v5263_v19, %v3818_v52 }
0x2285   : > { %v3834_v24 = vsel %vm1395_vm6, %v3826_v54, -inf }
0x2286   : > { %3835 = vmax.xlane.f32.xlu0 %v3834_v24 }
0x2288   : > { %v3800_v59 = vpop.f32.mrf.mxu3 }
0x2289   : > { %v3819_v57 = vmul.f32 0.35355338, %v3800_v59 }
0x228b   : > { %v3827_v34 = vadd.f32 %v5264_v40, %v3819_v57 }
0x228d   : > { %v3837_v39 = vsel %vm1395_vm6, %v3827_v34, -inf }
0x228e   : > { %3838 = vmax.xlane.f32.xlu1 %v3837_v39 }
0x2290   : > { %v3803_v63 = vpop.f32.mrf.mxu3 }
0x2291   : > { %v3820_v28 = vmul.f32 0.35355338, %v3803_v63 }
0x2293   : > { %v3828_v48 = vadd.f32 %v5265_v13, %v3820_v28 }
0x2295   : > { %v3840_v62 = vsel %vm1395_vm6, %v3828_v48, -inf }
0x2296   : > { %3841 = vmax.xlane.f32.xlu0 %v3840_v62 }
0x2298   : > { %v3805_v58 = vpop.f32.mrf.mxu3 }
0x2299   : > { %v3821_v44 = vmul.f32 0.35355338, %v3805_v58 }
0x229b   : > { %v3829_v22 = vadd.f32 %v5266_v15, %v3821_v44 }
0x229d   : > { %v3843_v18 = vsel %vm1395_vm6, %v3829_v22, -inf }
0x229e   : > { %3844 = vmax.xlane.f32.xlu1 %v3843_v18 }
0x22a0   : > { %v3808_v20 = vpop.f32.mrf.mxu3 }
0x22a1   : > { %v3822_v55 = vmul.f32 0.35355338, %v3808_v20 }
0x22a3   : > { %v3830_v31 = vadd.f32 %v5267_v0, %v3822_v55 }
0x22a5   : > { %v3846_v17 = vsel %vm1395_vm6, %v3830_v31, -inf }
0x22a6   : > { %3847 = vmax.xlane.f32.xlu0 %v3846_v17 }
0x22a8   : > { %v3810_v21 = vpop.f32.mrf.mxu3 }
0x22a9   : > { %v3823_v60 = vmul.f32 0.35355338, %v3810_v21 }
0x22ab   : > { %v3831_v47 = vadd.f32 %v5268_v5, %v3823_v60 }
0x22ad   : > { %v3849_v56 = vsel %vm1395_vm6, %v3831_v47, -inf }
0x22ae   : > { %3850 = vmax.xlane.f32.xlu1 %v3849_v56 }
0x22b0   : > { %v3813_v26 = vpop.f32.mrf.mxu3 }
0x22b1   : > { %v3824_v50 = vmul.f32 0.35355338, %v3813_v26 }
0x22b3   : > { %v3832_v9 = vadd.f32 %v5269_v41, %v3824_v50 }
0x22b5   : > { %v3852_v32 = vsel %vm1395_vm6, %v3832_v9, -inf }
0x22b6   : > { %3853 = vmax.xlane.f32.xlu2 %v3852_v32 }
0x22b8   : > { %v3815_v61 = vpop.f32.mrf.mxu3 }
0x22b9   : > { %v3825_v30 = vmul.f32 0.35355338, %v3815_v61 }
0x22bb   : > { %v3833_v37 = vadd.f32 %v5270_v16, %v3825_v30 }
0x22bd   : > { %v3855_v38 = vsel %vm1395_vm6, %v3833_v37, -inf }
0x22be   : > { %3856 = vmax.xlane.f32.xlu0 %v3855_v38 }
0x22d2   : > { %3927 = vrot.lane.b32.xlu0 %v6159_v35, %s6328_s1 }
0x22f9   : > { %v3836_v42 = vpop.xlane.xlu0 %3835 }
0x22fa   : > { %v3858_v46 = vsub.f32 %v3826_v54, %v3836_v42 }
0x22fc   : > { %v3866_v33 = vmul.f32 1.442695, %v3858_v46 }
0x22fe   : > { %5206 = vpow2.f32 %v3866_v33 }
0x2301   : > { %v3839_v2 = vpop.xlane.xlu1 %3838 }
0x2302   : > { %v3859_v43 = vsub.f32 %v3827_v34, %v3839_v2 }
0x2304   : > { %v5207_v36 = vpop.eup %5206  ;;  %v3868_v14 = vmul.f32 1.442695, %v3859_v43 }
0x2305   : > { %v3882_v45 = vsel %vm1395_vm6, %v5207_v36, 0.0 }
0x2306   : > { %5208 = vpow2.f32 %v3868_v14  ;;  %3883 = vadd.xlane.f32.xlu1 %v3882_v45 }
0x2309   : > { %v3842_v49 = vpop.xlane.xlu0 %3841 }
0x230a   : > { %v3860_v51 = vsub.f32 %v3828_v48, %v3842_v49 }
0x230c   : > { %v5209_v27 = vpop.eup %5208  ;;  %v3870_v53 = vmul.f32 1.442695, %v3860_v51 }
0x230d   : > { %v3885_v29 = vsel %vm1395_vm6, %v5209_v27, 0.0 }
0x230e   : > { %5210 = vpow2.f32 %v3870_v53  ;;  %3886 = vadd.xlane.f32.xlu2 %v3885_v29 }
0x2311   : > { %v3845_v35 = vpop.xlane.xlu1 %3844 }
0x2312   : > { %v3861_v52 = vsub.f32 %v3829_v22, %v3845_v35 }
0x2314   : > { %v5211_v19 = vpop.eup %5210  ;;  %v3872_v54 = vmul.f32 1.442695, %v3861_v52 }
0x2315   : > { %v3888_v24 = vsel %vm1395_vm6, %v5211_v19, 0.0 }
0x2316   : > { %5212 = vpow2.f32 %v3872_v54  ;;  %3889 = vadd.xlane.f32.xlu1 %v3888_v24 }
0x2319   : > { %v3848_v59 = vpop.xlane.xlu0 %3847 }
0x231a   : > { %v3862_v57 = vsub.f32 %v3830_v31, %v3848_v59  ;;  %v4882_v59 = vld [vmem:[%s6323_s5 + $0x18] sm:$0xff] }
0x231b   : > { %4010 = vmatpush.bf16.msra.mxu2 %v4882_v59 }
0x231c   : > { %v5213_v40 = vpop.eup %5212  ;;  %v3874_v34 = vmul.f32 1.442695, %v3862_v57 }
0x231d   : > { %v3891_v39 = vsel %vm1395_vm6, %v5213_v40, 0.0 }
0x231e   : > { %5214 = vpow2.f32 %v3874_v34  ;;  %3892 = vadd.xlane.f32.xlu2 %v3891_v39  ;;  %v4881_v34 = vld [vmem:[%s6323_s5 + $0x10] sm:$0xff] }
0x231f   : > { %4011 = vmatpush.bf16.msra.mxu2 %v4881_v34 }
0x2321   : > { %v3851_v63 = vpop.xlane.xlu1 %3850 }
0x2322   : > { %v3863_v28 = vsub.f32 %v3831_v47, %v3851_v63 }
0x2324   : > { %v5215_v13 = vpop.eup %5214  ;;  %v3876_v48 = vmul.f32 1.442695, %v3863_v28 }
0x2325   : > { %v3894_v62 = vsel %vm1395_vm6, %v5215_v13, 0.0 }
0x2326   : > { %5216 = vpow2.f32 %v3876_v48  ;;  %3895 = vadd.xlane.f32.xlu1 %v3894_v62 }
0x2329   : > { %v3854_v58 = vpop.xlane.xlu2 %3853 }
0x232a   : > { %v3864_v44 = vsub.f32 %v3832_v9, %v3854_v58 }
0x232c   : > { %v5217_v15 = vpop.eup %5216  ;;  %v3878_v22 = vmul.f32 1.442695, %v3864_v44 }
0x232d   : > { %v3897_v18 = vsel %vm1395_vm6, %v5217_v15, 0.0 }
0x232e   : > { %5218 = vpow2.f32 %v3878_v22  ;;  %3898 = vadd.xlane.f32.xlu2 %v3897_v18 }
0x2331   : > { %v3857_v20 = vpop.xlane.xlu0 %3856 }
0x2332   : > { %v3865_v55 = vsub.f32 %v3833_v37, %v3857_v20 }
0x2334   : > { %v5219_v0 = vpop.eup %5218  ;;  %v3880_v31 = vmul.f32 1.442695, %v3865_v55 }
0x2335   : > { %v3900_v17 = vsel %vm1395_vm6, %v5219_v0, 0.0 }
0x2336   : > { %5220 = vpow2.f32 %v3880_v31  ;;  %3901 = vadd.xlane.f32.xlu0 %v3900_v17 }
0x233c   : > { %v5221_v21 = vpop.eup %5220 }
0x233d   : > { %v3903_v60 = vsel %vm1395_vm6, %v5221_v21, 0.0 }
0x233e   : > { %3904 = vadd.xlane.f32.xlu1 %v3903_v60 }
0x2344   : > { %v3928_v5 = vpop.permute.xlu0 %3927 }
0x2345   : > { %3949 = vmatpush.bf16.msrb.mxu1 %v3928_v5 }
0x2379   : > { %v3884_v47 = vpop.xlane.xlu1 %3883 }
0x237a   : > { %5222 = vrcp.f32 %v3884_v47 }
0x2380   : > { %v5223_v26 = vpop.eup %5222 }
0x2381   : > { %v3887_v56 = vpop.xlane.xlu2 %3886  ;;  %v3914_v41 = vmul.f32 %v5223_v26, %v5207_v36 }
0x2382   : > { %5224 = vrcp.f32 %v3887_v56 }
0x2388   : > { %v5225_v50 = vpop.eup %5224 }
0x2389   : > { %v3915_v9 = vmul.f32 %v5225_v50, %v5209_v27  ;;  %v3890_v61 = vpop.xlane.xlu1 %3889 }
0x238a   : > { %5226 = vrcp.f32 %v3890_v61 }
0x238b   : > { %v3922_v32 = vpack.c.bf16 %v3915_v9, %v3914_v41 }
0x238d   : > { %4774 = vmatmul.msk.bf16.vlgmr.msrb.gmra.mxu1 %vm1395_vm6, %v3922_v32 }
0x2390   : > { %v5227_v16 = vpop.eup %5226 }
0x2391   : > { %v3893_v30 = vpop.xlane.xlu2 %3892  ;;  %v3916_v38 = vmul.f32 %v5227_v16, %v5211_v19  ;;  %v4884_v16 = vld [vmem:[%s6325_s18 + $0x18] sm:$0xff] }
0x2392   : > { %5228 = vrcp.f32 %v3893_v30  ;;  %4108 = vmatpush.bf16.msra.mxu0 %v4884_v16 }
0x2398   : > { %v5229_v37 = vpop.eup %5228 }
0x2399   : > { %v3917_v42 = vmul.f32 %v5229_v37, %v5213_v40  ;;  %v3896_v33 = vpop.xlane.xlu1 %3895  ;;  %v4883_v37 = vld [vmem:[%s6325_s18 + $0x10] sm:$0xff] }
0x239a   : > { %5230 = vrcp.f32 %v3896_v33  ;;  %4109 = vmatpush.bf16.msra.mxu0 %v4883_v37 }
0x239b   : > { %v3923_v46 = vpack.c.bf16 %v3917_v42, %v3916_v38 }
0x239d   : > { %4775 = vmatmul.msk.bf16.gmra.mxu1 %vm1395_vm6, %v3923_v46 }
0x23a0   : > { %v5231_v43 = vpop.eup %5230 }
0x23a1   : > { %v3899_v2 = vpop.xlane.xlu2 %3898  ;;  %v3918_v14 = vmul.f32 %v5231_v43, %v5215_v13 }
0x23a2   : > { %5232 = vrcp.f32 %v3899_v2 }
0x23a8   : > { %v5233_v36 = vpop.eup %5232 }
0x23a9   : > { %v3919_v45 = vmul.f32 %v5233_v36, %v5217_v15  ;;  %v3902_v51 = vpop.xlane.xlu0 %3901 }
0x23aa   : > { %5234 = vrcp.f32 %v3902_v51 }
0x23ab   : > { %v3924_v49 = vpack.c.bf16 %v3919_v45, %v3918_v14 }
0x23ad   : > { %4776 = vmatmul.msk.bf16.gmra.mxu1 %vm1395_vm6, %v3924_v49 }
0x23b0   : > { %v5235_v53 = vpop.eup %5234 }
0x23b1   : > { %v3905_v27 = vpop.xlane.xlu1 %3904  ;;  %v3920_v35 = vmul.f32 %v5235_v53, %v5219_v0 }
0x23b2   : > { %5236 = vrcp.f32 %v3905_v27 }
0x23b8   : > { %v5237_v29 = vpop.eup %5236 }
0x23b9   : > { %v3921_v52 = vmul.f32 %v5237_v29, %v5221_v21 }
0x23bb   : > { %v3925_v19 = vpack.c.bf16 %v3921_v52, %v3920_v35 }
0x23bd   : > { %4777 = vmatmul.msk.bf16.gmra.mxu1 %vm1395_vm6, %v3925_v19 }
0x240a   : > { %v3951_v54 = vpop.f32.mrf.mxu1 }
0x240b   : > { %v3971_v62 = vmul.f32 %v3951_v54, %v5550_v1  ;;  %v5067_v1 = vld [vmem:[%s6324_s23 + $0x1] ss:$0 sm:$0xff] }
0x2412   : > { %v3953_v24 = vpop.f32.mrf.mxu1 }
0x2413   : > { %v3972_v58 = vmul.f32 %v3953_v24, %v5559_v6 }
0x241a   : > { %v3956_v57 = vpop.f32.mrf.mxu1 }
0x241b   : > { %v3973_v13 = vmul.f32 %v3956_v57, %v5553_v3 }
0x241d   : > { %v3979_v22 = vadd.f32 %v3973_v13, %v3971_v62  ;;  %v5271_v13 = vld [vmem:[%s5475_s12 + $0x8] sm:$0x3f] }
0x2422   : > { %v3958_v40 = vpop.f32.mrf.mxu1 }
0x2423   : > { %v3974_v48 = vmul.f32 %v3958_v40, %v5562_v7 }
0x2425   : > { %v3980_v18 = vadd.f32 %v3974_v48, %v3972_v58  ;;  %v4068_v48 = vperm.slane %v5271_v13, 4 }
0x242a   : > { %v3961_v39 = vpop.f32.mrf.mxu1 }
0x242b   : > { %v3975_v44 = vmul.f32 %v3961_v39, %v5556_v4 }
0x242d   : > { %v3981_v0 = vadd.f32 %v3979_v22, %v3975_v44  ;;  %v4073_v22 = vperm.slane %v5271_v13, 5 }
0x2432   : > { %v3963_v63 = vpop.f32.mrf.mxu1 }
0x2433   : > { %v3976_v15 = vmul.f32 %v3963_v63, %v5565_v8 }
0x2435   : > { %v3982_v31 = vadd.f32 %v3980_v18, %v3976_v15 }
0x243a   : > { %v3966_v28 = vpop.f32.mrf.mxu1 }
0x243b   : > { %v3977_v20 = vmul.f32 %v3966_v28, %v5568_v11 }
0x243d   : > { %v3983_v17 = vadd.f32 %v3981_v0, %v3977_v20 }
0x2442   : > { %v3968_v55 = vpop.f32.mrf.mxu1 }
0x2443   : > { %v3978_v3 = vmul.f32 %v3968_v55, %v5571_v12 }
0x2445   : > { %v3984_v7 = vadd.f32 %v3982_v31, %v3978_v3  ;;  %v4888_v3 = vld [vmem:[%s6326_s6 + $0x38] sm:$0xff] }
0x2446   : > { %4159 = vmatpush.bf16.msrb.mxu2 %v4888_v3 }
0x2447   : > { %v3985_v21 = vpack.c.bf16 %v3984_v7, %v3983_v17  ;;  %v4887_v17 = vld [vmem:[%s6326_s6 + $0x30] sm:$0xff]  ;;  %v4886_v7 = vld [vmem:[%s6326_s6 + $0x28] sm:$0xff] }
0x2449   : > { %4786 = vmatmul.msk.bf16.vlgmr.msra.gmra.mxu2 %vm1212_vm0, %v3985_v21  ;;  %v4885_v21 = vld [vmem:[%s6326_s6 + $0x20] sm:$0xff] }
0x244a   : > { %4160 = vmatpush.bf16.msrb.mxu2 %v4887_v17 }
0x244e   : > { %4161 = vmatpush.bf16.msrb.mxu2 %v4886_v7 }
0x2452   : > { %4162 = vmatpush.bf16.msrb.mxu2 %v4885_v21 }
0x24cc   : > { %v4013_v6 = vpop.f32.mrf.mxu2 }
0x24cd   : > { %v4014_v60 = vadd.f32 %v5067_v1, %v4013_v6  ;;  %v5068_v6 = vld [vmem:[%s6327_s8 + $0x1] ss:$0 sm:$0xff] }
0x24cf   : > { %v6219_v4 = vadd.f32 %v4014_v60, %v6134_v23 }
0x24d1   : > { %v4020_v8 = vsel %vm1212_vm0, %v6219_v4, 0.0 }
0x24d2   : > { %4021 = vadd.xlane.f32.xlu2 %v4020_v8 }
0x24d4   : > { %v4015_v11 = vpop.f32.mrf.mxu2 }
0x24d5   : > { %v4016_v5 = vadd.f32 %v5067_v1, %v4015_v11 }
0x24d7   : > { %v6224_v12 = vadd.f32 %v4016_v5, %v6139_v25 }
0x24d9   : > { %v4023_v47 = vsel %vm1212_vm0, %v6224_v12, 0.0 }
0x24da   : > { %4024 = vadd.xlane.f32.xlu1 %v4023_v47 }
0x2545   : > { %v4022_v56 = vpop.xlane.xlu2 %4021 }
0x2546   : > { %v4026_v26 = vmul.f32 %v4022_v56, %v5514_v10 }
0x2548   : > { %v4028_v23 = vsub.f32 %v6219_v4, %v4026_v26  ;;  %v5069_v26 = vld [vmem:[%s5470_s4 + $0x1] ss:$0 sm:$0xff] }
0x254a   : > { %v4030_v50 = vmul.f32 %v4028_v23, %v4028_v23  ;;  %v4069_v58 = vmul.f32 %v4068_v48, %v4028_v23 }
0x254c   : > { %v4032_v41 = vsel %vm1212_vm0, %v4030_v50, 0.0 }
0x254d   : > { %v4025_v9 = vpop.xlane.xlu1 %4024  ;;  %4033 = vadd.xlane.f32.xlu2 %v4032_v41 }
0x254e   : > { %v4027_v32 = vmul.f32 %v4025_v9, %v5514_v10 }
0x2550   : > { %v4029_v25 = vsub.f32 %v6224_v12, %v4027_v32 }
0x2552   : > { %v4031_v61 = vmul.f32 %v4029_v25, %v4029_v25  ;;  %v4070_v44 = vmul.f32 %v4068_v48, %v4029_v25 }
0x2554   : > { %v4035_v30 = vsel %vm1212_vm0, %v4031_v61, 0.0 }
0x2555   : > { %4036 = vadd.xlane.f32.xlu1 %v4035_v30 }
0x25c0   : > { %v4034_v38 = vpop.xlane.xlu2 %4033 }
0x25c1   : > { %v4038_v42 = vmul.f32 0.032258064, %v4034_v38 }
0x25c3   : > { %5238 = vrsqrt.f32 %v4038_v42  ;;  %vm4047_vm6 = vcmp.eq.f32.partialorder %v4038_v42, inf  ;;  %v4050_v35 = vand.u32 2147483648, %v4038_v42  ;;  %vm4049_vm3 = vcmp.eq.f32.partialorder %v4038_v42, 0.0 }
0x25c8   : > { %v4037_v46 = vpop.xlane.xlu1 %4036 }
0x25c9   : > { %v5239_v33 = vpop.eup %5238  ;;  %v4039_v2 = vmul.f32 0.032258064, %v4037_v46 }
0x25ca   : > { %v4041_v43 = vmul.f32 %v5239_v33, %v4038_v42 }
0x25cb   : > { %5240 = vrsqrt.f32 %v4039_v2  ;;  %vm4059_vm4 = vcmp.eq.f32.partialorder %v4039_v2, inf  ;;  %v4062_v34 = vand.u32 2147483648, %v4039_v2  ;;  %vm4061_vm5 = vcmp.eq.f32.partialorder %v4039_v2, 0.0 }
0x25cc   : > { %v4042_v36 = vmul.f32 %v5239_v33, %v4041_v43 }
0x25ce   : > { %v4043_v14 = vmul.f32 0.5, %v4042_v36 }
0x25d0   : > { %v4044_v45 = vsub.f32 1.5, %v4043_v14 }
0x25d1   : > { %v5241_v49 = vpop.eup %5240 }
0x25d2   : > { %v4045_v51 = vmul.f32 %v5239_v33, %v4044_v45  ;;  %v4053_v27 = vmul.f32 %v5241_v49, %v4039_v2 }
0x25d4   : > { %v4046_v53 = vmul.f32 %v4045_v51, %v4038_v42  ;;  %v4054_v29 = vmul.f32 %v5241_v49, %v4053_v27 }
0x25d6   : > { %v4055_v52 = vmul.f32 0.5, %v4054_v29  ;;  %v4048_v19 = vsel %vm4047_vm6, %v4038_v42, %v4046_v53 }
0x25d7   : > { %v4051_v54 = vsel %vm4049_vm3, %v4050_v35, %v4048_v19 }
0x25d8   : > { %v4056_v24 = vsub.f32 1.5, %v4055_v52  ;;  %v4064_v57 = vadd.f32 1e-06, %v4051_v54 }
0x25da   : > { %v4057_v59 = vmul.f32 %v5241_v49, %v4056_v24  ;;  %5242 = vrcp.f32 %v4064_v57 }
0x25dc   : > { %v4058_v40 = vmul.f32 %v4057_v59, %v4039_v2 }
0x25de   : > { %v4060_v39 = vsel %vm4059_vm4, %v4039_v2, %v4058_v40 }
0x25df   : > { %v4063_v63 = vsel %vm4061_vm5, %v4062_v34, %v4060_v39  ;;  %v4178_v39 = vld [vmem:[%s5480_s20] sm:$0x3] }
0x25e0   : > { %v4065_v28 = vadd.f32 1e-06, %v4063_v63  ;;  %v5243_v62 = vpop.eup %5242  ;;  %v4227_v48 = vperm.slane %v4178_v39, 0 }
0x25e1   : > { %v4071_v15 = vmul.f32 %v5243_v62, %v4069_v58 }
0x25e2   : > { %5244 = vrcp.f32 %v4065_v28 }
0x25e3   : > { %v4074_v55 = vadd.f32 %v4073_v22, %v4071_v15  ;;  %v4232_v15 = vperm.slane %v4178_v39, 1 }
0x25e8   : > { %v5245_v18 = vpop.eup %5244 }
0x25e9   : > { %v4072_v20 = vmul.f32 %v5245_v18, %v4070_v44 }
0x25eb   : > { %v4075_v0 = vadd.f32 %v4073_v22, %v4072_v20 }
0x25ed   : > { %v4076_v31 = vpack.c.bf16 %v4075_v0, %v4074_v55 }
0x25ef   : > { %4800 = vmatmul.msk.bf16.vlgmr.msra.gmra.mxu0 %vm1212_vm0, %v4076_v31 }
0x266c   : > { %v4111_v1 = vpop.f32.mrf.mxu0 }
0x266d   : > { %v4112_v60 = vadd.f32 %v5068_v6, %v4111_v1 }
0x266f   : > { %v4116_v5 = vmax.f32 %v4112_v60, 0.0 }
0x2674   : > { %v4113_v8 = vpop.f32.mrf.mxu0 }
0x2675   : > { %v4114_v11 = vadd.f32 %v5068_v6, %v4113_v8 }
0x2677   : > { %v4117_v47 = vmax.f32 %v4114_v11, 0.0 }
0x2679   : > { %v4118_v56 = vpack.c.bf16 %v4117_v47, %v4116_v5 }
0x267b   : > { %4825 = vmatmul.msk.bf16.vlgmr.msrb.gmra.mxu2 %vm1710_vm11, %v4118_v56 }
0x26fe   : > { %v4164_v23 = vpop.f32.mrf.mxu2 }
0x26ff   : > { %v4169_v50 = vadd.f32 %v4164_v23, %v6219_v4 }
0x2701   : > { %v4176_v41 = vadd.f32 %v5069_v26, %v4169_v50 }
0x2703   : > { %v4179_v9 = vsel %vm1212_vm0, %v4176_v41, 0.0 }
0x2704   : > { %4180 = vadd.xlane.f32.xlu2 %v4179_v9 }
0x2706   : > { %v4166_v32 = vpop.f32.mrf.mxu2 }
0x2707   : > { %v4170_v25 = vadd.f32 %v4166_v32, %v6224_v12 }
0x2709   : > { %v4177_v61 = vadd.f32 %v5069_v26, %v4170_v25 }
0x270b   : > { %v4182_v30 = vsel %vm1212_vm0, %v4177_v61, 0.0 }
0x270c   : > { %4183 = vadd.xlane.f32.xlu1 %v4182_v30 }
0x2777   : > { %v4181_v16 = vpop.xlane.xlu2 %4180 }
0x2778   : > { %v4185_v37 = vmul.f32 %v4181_v16, %v5514_v10 }
0x277a   : > { %v4187_v38 = vsub.f32 %v4176_v41, %v4185_v37 }
0x277c   : > { %v4189_v42 = vmul.f32 %v4187_v38, %v4187_v38  ;;  %v4228_v22 = vmul.f32 %v4227_v48, %v4187_v38 }
0x277e   : > { %v4191_v46 = vsel %vm1212_vm0, %v4189_v42, 0.0 }
0x277f   : > { %4192 = vadd.xlane.f32.xlu2 %v4191_v46  ;;  %v4184_v4 = vpop.xlane.xlu1 %4183 }
0x2780   : > { %v4186_v33 = vmul.f32 %v4184_v4, %v5514_v10 }
0x2782   : > { %v4188_v2 = vsub.f32 %v4177_v61, %v4186_v33 }
0x2784   : > { %v4190_v43 = vmul.f32 %v4188_v2, %v4188_v2  ;;  %v4229_v3 = vmul.f32 %v4227_v48, %v4188_v2 }
0x2786   : > { %v4194_v36 = vsel %vm1212_vm0, %v4190_v43, 0.0 }
0x2787   : > { %4195 = vadd.xlane.f32.xlu1 %v4194_v36 }
0x27f2   : > { %v4193_v12 = vpop.xlane.xlu2 %4192 }
0x27f3   : > { %v4197_v14 = vmul.f32 0.032258064, %v4193_v12 }
0x27f5   : > { %5246 = vrsqrt.f32 %v4197_v14  ;;  %vm4206_vm11 = vcmp.eq.f32.partialorder %v4197_v14, inf  ;;  %v4209_v59 = vand.u32 2147483648, %v4197_v14  ;;  %vm4208_vm7 = vcmp.eq.f32.partialorder %v4197_v14, 0.0 }
0x27fa   : > { %v4196_v45 = vpop.xlane.xlu1 %4195 }
0x27fb   : > { %v5247_v49 = vpop.eup %5246  ;;  %v4198_v51 = vmul.f32 0.032258064, %v4196_v45 }
0x27fc   : > { %v4200_v27 = vmul.f32 %v5247_v49, %v4197_v14 }
0x27fd   : > { %5248 = vrsqrt.f32 %v4198_v51  ;;  %vm4218_vm8 = vcmp.eq.f32.partialorder %v4198_v51, inf  ;;  %v4221_v58 = vand.u32 2147483648, %v4198_v51  ;;  %vm4220_vm9 = vcmp.eq.f32.partialorder %v4198_v51, 0.0 }
0x27fe   : > { %v4201_v53 = vmul.f32 %v5247_v49, %v4200_v27 }
0x2800   : > { %v4202_v29 = vmul.f32 0.5, %v4201_v53 }
0x2802   : > { %v4203_v35 = vsub.f32 1.5, %v4202_v29 }
0x2803   : > { %v5249_v52 = vpop.eup %5248 }
0x2804   : > { %v4204_v19 = vmul.f32 %v5247_v49, %v4203_v35  ;;  %v4212_v10 = vmul.f32 %v5249_v52, %v4198_v51 }
0x2806   : > { %v4205_v54 = vmul.f32 %v4204_v19, %v4197_v14  ;;  %v4213_v24 = vmul.f32 %v5249_v52, %v4212_v10 }
0x2808   : > { %v4207_v57 = vsel %vm4206_vm11, %v4197_v14, %v4205_v54  ;;  %v4214_v40 = vmul.f32 0.5, %v4213_v24 }
0x2809   : > { %v4210_v34 = vsel %vm4208_vm7, %v4209_v59, %v4207_v57 }
0x280a   : > { %v4223_v63 = vadd.f32 1e-06, %v4210_v34  ;;  %v4215_v28 = vsub.f32 1.5, %v4214_v40 }
0x280c   : > { %5250 = vrcp.f32 %v4223_v63  ;;  %v4216_v13 = vmul.f32 %v5249_v52, %v4215_v28 }
0x280e   : > { %v4217_v62 = vmul.f32 %v4216_v13, %v4198_v51 }
0x2810   : > { %v4219_v44 = vsel %vm4218_vm8, %v4198_v51, %v4217_v62 }
0x2811   : > { %v4222_v18 = vsel %vm4220_vm9, %v4221_v58, %v4219_v44 }
0x2812   : > { %v5251_v20 = vpop.eup %5250  ;;  %v4224_v55 = vadd.f32 1e-06, %v4222_v18 }
0x2813   : > { %v4230_v0 = vmul.f32 %v5251_v20, %v4228_v22 }
0x2814   : > { %5252 = vrcp.f32 %v4224_v55 }
0x2815   : > { %v4233_v31 = vadd.f32 %v4232_v15, %v4230_v0 }
0x2817   : > { %4235 = vst.msk [vmem:[%s5504_s10] sm:$0xff] %vm1212_vm0, %v4233_v31 }
0x281a   : > { %v5253_v17 = vpop.eup %5252 }
0x281b   : > { %v4231_v7 = vmul.f32 %v5253_v17, %v4229_v3 }
0x281d   : > { %v4234_v21 = vadd.f32 %v4232_v15, %v4231_v7 }
0x281f   : > { %4236 = vst.msk [vmem:[%s5504_s10 + $0x8] sm:$0xff] %vm1212_vm0, %v4234_v21 }
0x2820 PF: > { %s75_s28 = sadd.s32 1, %s5278_s28  }
0x2821   : > { %p72_p6 = scmp.ge.s32.totalorder %s75_s28, 4  }
0x2823   :  { %74 = sbr.rel (!%p72_p6) target bundleno = 61 (0x3d), region = 275 }

</bundles_post_ra>
